<compile_context>
chip_gen: v7x
topology: tpu7x:2x2x1
jax: 0.10.0
libtpu: 0.0.40
codegen_flags: <defaults>
</compile_context>

<pallas_src>
import functools
import math

import jax
import jax.numpy as jnp
from jax.experimental import pallas as pl
from jax.experimental.pallas import tpu as pltpu

NUM_PROPOSALS = 8
ANCHOR_SCALES = (4.0, 8.0, 16.0)
ROI_SIZE = 4
BBOX_XFORM_CLIP = math.log(1000.0 / 16.0)   # torchvision dw/dh clamp
_MXU_DTYPE = jnp.bfloat16                   # MXU operand dtype; accumulation stays f32
_VMEM_LIMIT = 32 * 1024 * 1024              # safe on v5e/v6e (128 MiB) and v7x (64 MiB)


def _ceil_to(x, m):
    return ((x + m - 1) // m) * m


# ----------------------------------------------------------------------------
# Pallas kernels
# ----------------------------------------------------------------------------
def _normalize_kernel(x_ref, m_ref, s_ref, o_ref):
    # (x - mean) * inv_std; mean / inv_std are (rows, 1) columns broadcast on lanes.
    o_ref[...] = (x_ref[...] - m_ref[...]) * s_ref[...]


def pallas_normalize(x2d, mean_col, invstd_col):
    """Elementwise normalization of a [rows, cols] slab with per-row scalars."""
    R, C = x2d.shape
    return pl.pallas_call(
        _normalize_kernel,
        grid=(1,),
        in_specs=[
            pl.BlockSpec((R, C), lambda i: (0, 0)),
            pl.BlockSpec((R, 1), lambda i: (0, 0)),
            pl.BlockSpec((R, 1), lambda i: (0, 0)),
        ],
        out_specs=pl.BlockSpec((R, C), lambda i: (0, 0)),
        out_shape=jax.ShapeDtypeStruct((R, C), jnp.float32),
        compiler_params=pltpu.CompilerParams(
            dimension_semantics=("arbitrary",),
            vmem_limit_bytes=_VMEM_LIMIT),
    )(x2d, mean_col, invstd_col)


def _matmul_kernel(x_ref, w_ref, b_ref, o_ref, acc_ref, *, relu):
    # Tiled matmul with f32 VMEM accumulator; bias + ReLU fused in the epilogue.
    k = pl.program_id(2)

    @pl.when(k == 0)
    def _():
        acc_ref[...] = jnp.zeros_like(acc_ref)

    acc_ref[...] += jnp.dot(
        x_ref[...].astype(_MXU_DTYPE),
        w_ref[...].astype(_MXU_DTYPE),
        preferred_element_type=jnp.float32)

    @pl.when(k == pl.num_programs(2) - 1)
    def _():
        out = acc_ref[...] + b_ref[...]
        if relu:
            out = jnp.maximum(out, 0.0)
        o_ref[...] = out.astype(o_ref.dtype)


def _pick_tile(dim, tile_max):
    # Dims that fit in one tile use a full-extent block (exempt from the 8x128
    # divisibility rule) -> no wrapper pad/slice.  Larger dims are padded to a
    # multiple of the (128-aligned) tile.
    if dim <= tile_max:
        return dim, dim
    return _ceil_to(dim, tile_max), tile_max


def pallas_linear(x, w, b, relu=False, *, tm_max=256, tn_max=512, tk_max=512):
    """y = relu?(x @ w + b) on the MXU, tiled over an (M, N, K) grid."""
    M, K = x.shape
    K2, N = w.shape
    assert K == K2
    Mp, tm = _pick_tile(M, tm_max)
    Kp, tk = _pick_tile(K, tk_max)
    Np, tn = _pick_tile(N, tn_max)

    xp = x if (Mp == M and Kp == K) else jnp.pad(x, ((0, Mp - M), (0, Kp - K)))
    wp = w if (Kp == K and Np == N) else jnp.pad(w, ((0, Kp - K), (0, Np - N)))
    bp = b.reshape(1, N)
    if Np != N:
        bp = jnp.pad(bp, ((0, 0), (0, Np - N)))

    grid = (Mp // tm, Np // tn, Kp // tk)
    out = pl.pallas_call(
        functools.partial(_matmul_kernel, relu=relu),
        grid=grid,
        in_specs=[
            pl.BlockSpec((tm, tk), lambda i, j, k: (i, k)),
            pl.BlockSpec((tk, tn), lambda i, j, k: (k, j)),
            pl.BlockSpec((1, tn), lambda i, j, k: (0, j)),
        ],
        out_specs=pl.BlockSpec((tm, tn), lambda i, j, k: (i, j)),
        out_shape=jax.ShapeDtypeStruct((Mp, Np), jnp.float32),
        scratch_shapes=[pltpu.VMEM((tm, tn), jnp.float32)],
        compiler_params=pltpu.CompilerParams(
            dimension_semantics=("parallel", "parallel", "arbitrary"),
            vmem_limit_bytes=_VMEM_LIMIT),
    )(xp, wp, bp)
    if (Mp, Np) != (M, N):
        out = out[:M, :N]
    return out


def _conv3x3_kernel(x_ref, w_ref, b_ref, o_ref, *, H, W, relu):
    # x_ref: (1, H+2, W+2, C) halo-padded image block
    # w_ref: (9, C, Cf) tap-major weights, b_ref: (1, Cf), o_ref: (H*W, Cf)
    x = x_ref[0]
    C = x.shape[-1]
    Cf = w_ref.shape[-1]
    acc = jnp.zeros((H * W, Cf), jnp.float32)
    for t in range(9):
        dy, dx = t // 3, t % 3
        patch = x[dy:dy + H, dx:dx + W, :].reshape(H * W, C)
        acc = acc + jnp.dot(
            patch.astype(_MXU_DTYPE),
            w_ref[t].astype(_MXU_DTYPE),
            preferred_element_type=jnp.float32)
    acc = acc + b_ref[...]
    if relu:
        acc = jnp.maximum(acc, 0.0)
    o_ref[...] = acc.astype(o_ref.dtype)


def pallas_conv3x3(x_nhwc, w9, b, relu=False):
    """3x3 'same' conv with im2col fused into the kernel (9 shifted matmuls).

    Only a +1 halo pad is materialized in HBM; the 9x-expanded column matrix
    never leaves VMEM.  Grid over batch is 'parallel' (megacore on v7x).
    """
    N, H, W, C = x_nhwc.shape
    Cf = w9.shape[-1]
    xp = jnp.pad(x_nhwc, ((0, 0), (1, 1), (1, 1), (0, 0)))
    return pl.pallas_call(
        functools.partial(_conv3x3_kernel, H=H, W=W, relu=relu),
        grid=(N,),
        in_specs=[
            pl.BlockSpec((1, H + 2, W + 2, C), lambda n: (n, 0, 0, 0)),
            pl.BlockSpec((9, C, Cf), lambda n: (0, 0, 0)),
            pl.BlockSpec((1, Cf), lambda n: (0, 0)),
        ],
        out_specs=pl.BlockSpec((H * W, Cf), lambda n: (n, 0)),
        out_shape=jax.ShapeDtypeStruct((N * H * W, Cf), jnp.float32),
        compiler_params=pltpu.CompilerParams(
            dimension_semantics=("parallel",),
            vmem_limit_bytes=_VMEM_LIMIT),
    )(xp, w9, b.reshape(1, Cf))


# ----------------------------------------------------------------------------
# JAX glue (anchors, gathers, box decode, ROI pooling)
# ----------------------------------------------------------------------------
def make_anchors(H, W, scales):
    ys, xs = jnp.meshgrid(jnp.arange(H, dtype=jnp.float32),
                          jnp.arange(W, dtype=jnp.float32), indexing="ij")
    ctr = jnp.stack([xs, ys], -1).reshape(-1, 2) + 0.5  # (H*W, 2) as (x, y)
    per_scale = []
    for s in scales:
        half = s / 2.0
        per_scale.append(jnp.concatenate([ctr - half, ctr + half], -1))
    return jnp.stack(per_scale, axis=1).reshape(-1, 4)  # (H*W*A, 4)


def decode_boxes(deltas, boxes):
    """Standard (dx, dy, dw, dh) box decode with the torchvision dw/dh clamp."""
    wa = boxes[..., 2] - boxes[..., 0]
    ha = boxes[..., 3] - boxes[..., 1]
    cxa = boxes[..., 0] + 0.5 * wa
    cya = boxes[..., 1] + 0.5 * ha
    dx, dy = deltas[..., 0], deltas[..., 1]
    dw = jnp.minimum(deltas[..., 2], BBOX_XFORM_CLIP)
    dh = jnp.minimum(deltas[..., 3], BBOX_XFORM_CLIP)
    cx = dx * wa + cxa
    cy = dy * ha + cya
    w = jnp.exp(dw) * wa
    h = jnp.exp(dh) * ha
    return jnp.stack([cx - 0.5 * w, cy - 0.5 * h, cx + 0.5 * w, cy + 0.5 * h], -1)


def roi_pool_nearest(feat_hwc, boxes, out_size=ROI_SIZE):
    """Nearest-neighbor ROI pooling of one image: (H,W,C), (P,4) -> (P, S*S*C)."""
    # TODO(synk): torchvision ROIAlign uses bilinear sampling with data-dependent
    # gathers; at P=16 / Cf=16 the XLA gather is off the critical path, so a
    # nearest-neighbor variant stays in plain JAX (a Pallas PrefetchScalarGridSpec
    # gather only pays off at much larger P / Cf).
    H, W, C = feat_hwc.shape
    x1, y1, x2, y2 = boxes[:, 0], boxes[:, 1], boxes[:, 2], boxes[:, 3]
    grid = (jnp.arange(out_size, dtype=jnp.float32) + 0.5) / out_size
    xs = x1[:, None] + grid[None, :] * (x2 - x1)[:, None]
    ys = y1[:, None] + grid[None, :] * (y2 - y1)[:, None]
    xi = jnp.clip(jnp.floor(xs), 0, W - 1).astype(jnp.int32)
    yi = jnp.clip(jnp.floor(ys), 0, H - 1).astype(jnp.int32)
    pooled = feat_hwc[yi[:, :, None], xi[:, None, :], :]  # (P, S, S, C)
    return pooled.reshape(boxes.shape[0], -1)


# ----------------------------------------------------------------------------
# Synthetic Faster R-CNN forward (eval mode -> returns detections)
# ----------------------------------------------------------------------------
def faster_rcnn_forward(images_nchw, params):
    N, C, H, W = images_nchw.shape
    HW = H * W
    # original_image_sizes: all images same size; synthetic transform does no resize.

    # --- transform: per-channel normalization (Pallas, no broadcast slabs) ---
    x2d = images_nchw.reshape(N * C, HW)
    mean_col = jnp.tile(params["img_mean"], N).reshape(N * C, 1)
    invstd_col = jnp.tile(1.0 / params["img_std"], N).reshape(N * C, 1)
    xn = pallas_normalize(x2d, mean_col, invstd_col).reshape(N, C, H, W)
    x_nhwc = jnp.transpose(xn, (0, 2, 3, 1))

    # --- backbone: fused 3x3 conv + bias + ReLU (im2col fused in-kernel) ---
    feat = pallas_conv3x3(x_nhwc, params["bb_w"], params["bb_b"], relu=True)  # (N*H*W, Cf)
    Cf = feat.shape[-1]
    feat_nhwc = feat.reshape(N, H, W, Cf)

    # --- RPN: fused 3x3 conv head + fused objectness/bbox 1x1 head ---
    rpn_h = pallas_conv3x3(feat_nhwc, params["rpn_conv_w"], params["rpn_conv_b"],
                           relu=True)
    rpn_out = pallas_linear(rpn_h, params["rpn_head_w"], params["rpn_head_b"])  # (N*H*W, 5A)
    A = rpn_out.shape[-1] // 5
    obj = rpn_out[:, :A].reshape(N, HW * A)
    reg = rpn_out[:, A:].reshape(N, HW * A, 4)

    anchors = make_anchors(H, W, ANCHOR_SCALES)                   # (H*W*A, 4)
    prop_all = decode_boxes(reg, anchors[None])                   # (N, H*W*A, 4)
    clip_max = jnp.array([W, H, W, H], jnp.float32)
    prop_all = jnp.clip(prop_all, 0.0, clip_max)

    scores_all = jax.nn.sigmoid(obj)
    _, top_idx = jax.lax.top_k(scores_all, NUM_PROPOSALS)                   # (N, K)
    proposals = jnp.take_along_axis(prop_all, top_idx[..., None], axis=1)   # (N, K, 4)
    # TODO(synk): proposal NMS has no clean Pallas equivalent; omitted (top-k only).

    # --- roi_heads: ROI pool -> 2x FC (Pallas) -> fused cls/box predictor ---
    pooled = jax.vmap(roi_pool_nearest, in_axes=(0, 0))(feat_nhwc, proposals)
    P = N * NUM_PROPOSALS
    pooled_flat = pooled.reshape(P, Cf * ROI_SIZE * ROI_SIZE)
    h1 = pallas_linear(pooled_flat, params["fc1_w"], params["fc1_b"], relu=True)
    h2 = pallas_linear(h1, params["fc2_w"], params["fc2_b"], relu=True)
    det = pallas_linear(h2, params["det_w"], params["det_b"])               # (P, 5*nc)
    num_classes = det.shape[-1] // 5
    cls_logits = det[:, :num_classes]
    box_deltas = det[:, num_classes:]

    probs = jax.nn.softmax(cls_logits, axis=-1)
    fg_probs = probs[:, 1:]                                      # drop background
    labels = (jnp.argmax(fg_probs, axis=-1) + 1).astype(jnp.int32)
    scores = jnp.max(fg_probs, axis=-1)
    box_deltas = box_deltas.reshape(P, num_classes, 4)
    sel_deltas = jnp.take_along_axis(box_deltas, labels[:, None, None], axis=1)[:, 0, :]
    det_boxes = decode_boxes(sel_deltas, proposals.reshape(P, 4))
    det_boxes = jnp.clip(det_boxes, 0.0, clip_max)

    # --- transform.postprocess: rescale boxes to original image sizes ---
    # (synthetic transform does no resize -> ratio == 1)
    ratios = jnp.ones((N, 1, 1), jnp.float32)
    det_boxes = det_boxes.reshape(N, NUM_PROPOSALS, 4) * ratios

    detections = {
        "boxes": det_boxes,                               # (N, K, 4)
        "scores": scores.reshape(N, NUM_PROPOSALS),       # (N, K)
        "labels": labels.reshape(N, NUM_PROPOSALS),       # (N, K)
    }
    return detections  # eval mode: eager_outputs returns detections


# ----------------------------------------------------------------------------
# Deterministic parameter init
# ----------------------------------------------------------------------------
def init_params(key, c_in=3, c_feat=16, num_anchors=3, num_classes=5,
                roi_size=ROI_SIZE, hidden=32):
    ks = jax.random.split(key, 8)
    w = lambda k, shape, s=0.1: jax.random.normal(k, shape, jnp.float32) * s
    rpn_cls_w = w(ks[2], (c_feat, num_anchors))
    rpn_reg_w = w(ks[3], (c_feat, 4 * num_anchors), 0.02)
    cls_w = w(ks[6], (hidden, num_classes))
    box_w = w(ks[7], (hidden, 4 * num_classes), 0.02)
    return {
        "img_mean": jnp.array([0.485, 0.456, 0.406], jnp.float32),
        "img_std": jnp.array([0.229, 0.224, 0.225], jnp.float32),
        # 3x3 convs stored tap-major: (9, Cin, Cout)
        "bb_w": w(ks[0], (9, c_in, c_feat)),
        "bb_b": jnp.zeros((c_feat,), jnp.float32),
        "rpn_conv_w": w(ks[1], (9, c_feat, c_feat)),
        "rpn_conv_b": jnp.zeros((c_feat,), jnp.float32),
        # fused RPN head: [objectness (A) | bbox deltas (4A)]
        "rpn_head_w": jnp.concatenate([rpn_cls_w, rpn_reg_w], axis=1),
        "rpn_head_b": jnp.zeros((5 * num_anchors,), jnp.float32),
        "fc1_w": w(ks[4], (c_feat * roi_size * roi_size, hidden)),
        "fc1_b": jnp.zeros((hidden,), jnp.float32),
        "fc2_w": w(ks[5], (hidden, hidden)),
        "fc2_b": jnp.zeros((hidden,), jnp.float32),
        # fused detection head: [cls logits (nc) | box deltas (4*nc)]
        "det_w": jnp.concatenate([cls_w, box_w], axis=1),
        "det_b": jnp.zeros((5 * num_classes,), jnp.float32),
    }


if __name__ == "__main__":
    key = jax.random.PRNGKey(0)
    k_img, k_par = jax.random.split(key)
    images = jax.random.uniform(k_img, (2, 3, 16, 16), jnp.float32)  # NCHW
    params = init_params(k_par)
    fwd = jax.jit(faster_rcnn_forward)
    detections = fwd(images, params)
    jax.block_until_ready(detections)
    assert detections["boxes"].shape == (2, NUM_PROPOSALS, 4)
    assert detections["scores"].shape == (2, NUM_PROPOSALS)
    assert detections["labels"].shape == (2, NUM_PROPOSALS)
    print("KERNEL_OK")
</pallas_src>

<mosaic_0001>
module attributes {stable_mosaic.version = 11 : i64} {
  func.func @_normalize_kernel(%arg0: i32, %arg1: memref<6x256xf32, #tpu.memory_space<vmem>>, %arg2: memref<6x1xf32, #tpu.memory_space<vmem>>, %arg3: memref<6x1xf32, #tpu.memory_space<vmem>>, %arg4: memref<6x256xf32, #tpu.memory_space<vmem>>) attributes {dimension_semantics = [#tpu.dimension_semantics<arbitrary>], iteration_bounds = array<i64: 1>, scalar_prefetch = 0 : i64, scratch_operands = 0 : i64, tpu.core_type = #tpu.core_type<tc>, window_params = [{pipeline_mode = #tpu.pipeline_mode<synchronous>, transform_indices = @transform_0, window_bounds = array<i64: 6, 256>}, {pipeline_mode = #tpu.pipeline_mode<synchronous>, transform_indices = @transform_1, window_bounds = array<i64: 6, 1>}, {pipeline_mode = #tpu.pipeline_mode<synchronous>, transform_indices = @transform_2, window_bounds = array<i64: 6, 1>}, {pipeline_mode = #tpu.pipeline_mode<synchronous>, transform_indices = @transform_3, window_bounds = array<i64: 6, 256>}]} {
    %c0 = arith.constant 0 : index
    %c0_0 = arith.constant 0 : index
    %0 = vector.load %arg1[%c0, %c0_0] : memref<6x256xf32, #tpu.memory_space<vmem>>, vector<6x256xf32>
    %c0_1 = arith.constant 0 : index
    %c0_2 = arith.constant 0 : index
    %1 = vector.load %arg2[%c0_1, %c0_2] : memref<6x1xf32, #tpu.memory_space<vmem>>, vector<6x1xf32>
    %2 = vector.broadcast %1 : vector<6x1xf32> to vector<6x256xf32>
    %3 = arith.subf %0, %2 : vector<6x256xf32>
    %c0_3 = arith.constant 0 : index
    %c0_4 = arith.constant 0 : index
    %4 = vector.load %arg3[%c0_3, %c0_4] : memref<6x1xf32, #tpu.memory_space<vmem>>, vector<6x1xf32>
    %5 = vector.broadcast %4 : vector<6x1xf32> to vector<6x256xf32>
    %6 = arith.mulf %3, %5 : vector<6x256xf32>
    %c0_5 = arith.constant 0 : index
    %c0_6 = arith.constant 0 : index
    %7 = vector.load %arg4[%c0_5, %c0_6] : memref<6x256xf32, #tpu.memory_space<vmem>>, vector<6x256xf32>
    tpu.vector_store %arg4[%c0_5, %c0_6], %6 {strides = array<i32>} : memref<6x256xf32, #tpu.memory_space<vmem>>, vector<6x256xf32>,
    return
  }
  func.func @transform_0(%arg0: i32) -> (i32, i32) {
    %c0_i32 = arith.constant 0 : i32
    %c0_i32_0 = arith.constant 0 : i32
    %c0_i32_1 = arith.constant 0 : i32
    return %c0_i32, %c0_i32_0 : i32, i32
  }
  func.func @transform_1(%arg0: i32) -> (i32, i32) {
    %c0_i32 = arith.constant 0 : i32
    %c0_i32_0 = arith.constant 0 : i32
    %c0_i32_1 = arith.constant 0 : i32
    return %c0_i32, %c0_i32_0 : i32, i32
  }
  func.func @transform_2(%arg0: i32) -> (i32, i32) {
    %c0_i32 = arith.constant 0 : i32
    %c0_i32_0 = arith.constant 0 : i32
    %c0_i32_1 = arith.constant 0 : i32
    return %c0_i32, %c0_i32_0 : i32, i32
  }
  func.func @transform_3(%arg0: i32) -> (i32, i32) {
    %c0_i32 = arith.constant 0 : i32
    %c0_i32_0 = arith.constant 0 : i32
    %c0_i32_1 = arith.constant 0 : i32
    return %c0_i32, %c0_i32_0 : i32, i32
  }
}

module attributes {stable_mosaic.version = 11 : i64} {
  func.func @_conv3x3_kernel(%arg0: i32, %arg1: memref<1x18x18x3xf32, #tpu.memory_space<vmem>>, %arg2: memref<9x3x16xf32, #tpu.memory_space<vmem>>, %arg3: memref<1x16xf32, #tpu.memory_space<vmem>>, %arg4: memref<256x16xf32, #tpu.memory_space<vmem>>) attributes {dimension_semantics = [#tpu.dimension_semantics<parallel>], iteration_bounds = array<i64: 2>, scalar_prefetch = 0 : i64, scratch_operands = 0 : i64, tpu.core_type = #tpu.core_type<tc>, window_params = [{transform_indices = @transform_0, window_bounds = array<i64: 1, 18, 18, 3>}, {pipeline_mode = #tpu.pipeline_mode<synchronous>, transform_indices = @transform_1, window_bounds = array<i64: 9, 3, 16>}, {pipeline_mode = #tpu.pipeline_mode<synchronous>, transform_indices = @transform_2, window_bounds = array<i64: 1, 16>}, {transform_indices = @transform_3, window_bounds = array<i64: 256, 16>}]} {
    %c0 = arith.constant 0 : index
    %c0_0 = arith.constant 0 : index
    %c0_1 = arith.constant 0 : index
    %c0_2 = arith.constant 0 : index
    %0 = vector.load %arg1[%c0, %c0_0, %c0_1, %c0_2] : memref<1x18x18x3xf32, #tpu.memory_space<vmem>>, vector<1x18x18x3xf32>
    %1 = vector.shape_cast %0 : vector<1x18x18x3xf32> to vector<18x18x3xf32>
    %cst = arith.constant 0.000000e+00 : f32
    %2 = vector.broadcast %cst : f32 to vector<256x16xf32>
    %3 = vector.extract_strided_slice %1 {offsets = [0, 0, 0], sizes = [16, 16, 3], strides = [1, 1, 1]} : vector<18x18x3xf32> to vector<16x16x3xf32>
    %4 = vector.shape_cast %3 : vector<16x16x3xf32> to vector<256x3xf32>
    %5 = arith.truncf %4 : vector<256x3xf32> to vector<256x3xbf16>
    %c0_3 = arith.constant 0 : index
    %c0_4 = arith.constant 0 : index
    %c0_5 = arith.constant 0 : index
    %6 = vector.load %arg2[%c0_3, %c0_4, %c0_5] : memref<9x3x16xf32, #tpu.memory_space<vmem>>, vector<1x3x16xf32>
    %7 = vector.shape_cast %6 : vector<1x3x16xf32> to vector<3x16xf32>
    %8 = arith.truncf %7 : vector<3x16xf32> to vector<3x16xbf16>
    %cst_6 = arith.constant dense<0.000000e+00> : vector<256x16xf32>
    %9 = tpu.matmul %5, %8, %cst_6 {dimension_numbers = #tpu.dot_dimension_numbers<[1], [0], [0], [1], [0, 0, 1, 1], [], []>} : vector<256x3xbf16>, vector<3x16xbf16>, vector<256x16xf32> -> vector<256x16xf32>
    %10 = arith.addf %2, %9 : vector<256x16xf32>
    %11 = vector.extract_strided_slice %1 {offsets = [0, 1, 0], sizes = [16, 16, 3], strides = [1, 1, 1]} : vector<18x18x3xf32> to vector<16x16x3xf32>
    %12 = vector.shape_cast %11 : vector<16x16x3xf32> to vector<256x3xf32>
    %13 = arith.truncf %12 : vector<256x3xf32> to vector<256x3xbf16>
    %c1 = arith.constant 1 : index
    %c0_7 = arith.constant 0 : index
    %c0_8 = arith.constant 0 : index
    %14 = vector.load %arg2[%c1, %c0_7, %c0_8] : memref<9x3x16xf32, #tpu.memory_space<vmem>>, vector<1x3x16xf32>
    %15 = vector.shape_cast %14 : vector<1x3x16xf32> to vector<3x16xf32>
    %16 = arith.truncf %15 : vector<3x16xf32> to vector<3x16xbf16>
    %cst_9 = arith.constant dense<0.000000e+00> : vector<256x16xf32>
    %17 = tpu.matmul %13, %16, %cst_9 {dimension_numbers = #tpu.dot_dimension_numbers<[1], [0], [0], [1], [0, 0, 1, 1], [], []>} : vector<256x3xbf16>, vector<3x16xbf16>, vector<256x16xf32> -> vector<256x16xf32>
    %18 = arith.addf %10, %17 : vector<256x16xf32>
    %19 = vector.extract_strided_slice %1 {offsets = [0, 2, 0], sizes = [16, 16, 3], strides = [1, 1, 1]} : vector<18x18x3xf32> to vector<16x16x3xf32>
    %20 = vector.shape_cast %19 : vector<16x16x3xf32> to vector<256x3xf32>
    %21 = arith.truncf %20 : vector<256x3xf32> to vector<256x3xbf16>
    %c2 = arith.constant 2 : index
    %c0_10 = arith.constant 0 : index
    %c0_11 = arith.constant 0 : index
    %22 = vector.load %arg2[%c2, %c0_10, %c0_11] : memref<9x3x16xf32, #tpu.memory_space<vmem>>, vector<1x3x16xf32>
    %23 = vector.shape_cast %22 : vector<1x3x16xf32> to vector<3x16xf32>
    %24 = arith.truncf %23 : vector<3x16xf32> to vector<3x16xbf16>
    %cst_12 = arith.constant dense<0.000000e+00> : vector<256x16xf32>
    %25 = tpu.matmul %21, %24, %cst_12 {dimension_numbers = #tpu.dot_dimension_numbers<[1], [0], [0], [1], [0, 0, 1, 1], [], []>} : vector<256x3xbf16>, vector<3x16xbf16>, vector<256x16xf32> -> vector<256x16xf32>
    %26 = arith.addf %18, %25 : vector<256x16xf32>
    %27 = vector.extract_strided_slice %1 {offsets = [1, 0, 0], sizes = [16, 16, 3], strides = [1, 1, 1]} : vector<18x18x3xf32> to vector<16x16x3xf32>
    %28 = vector.shape_cast %27 : vector<16x16x3xf32> to vector<256x3xf32>
    %29 = arith.truncf %28 : vector<256x3xf32> to vector<256x3xbf16>
    %c3 = arith.constant 3 : index
    %c0_13 = arith.constant 0 : index
    %c0_14 = arith.constant 0 : index
    %30 = vector.load %arg2[%c3, %c0_13, %c0_14] : memref<9x3x16xf32, #tpu.memory_space<vmem>>, vector<1x3x16xf32>
    %31 = vector.shape_cast %30 : vector<1x3x16xf32> to vector<3x16xf32>
    %32 = arith.truncf %31 : vector<3x16xf32> to vector<3x16xbf16>
    %cst_15 = arith.constant dense<0.000000e+00> : vector<256x16xf32>
    %33 = tpu.matmul %29, %32, %cst_15 {dimension_numbers = #tpu.dot_dimension_numbers<[1], [0], [0], [1], [0, 0, 1, 1], [], []>} : vector<256x3xbf16>, vector<3x16xbf16>, vector<256x16xf32> -> vector<256x16xf32>
    %34 = arith.addf %26, %33 : vector<256x16xf32>
    %35 = vector.extract_strided_slice %1 {offsets = [1, 1, 0], sizes = [16, 16, 3], strides = [1, 1, 1]} : vector<18x18x3xf32> to vector<16x16x3xf32>
    %36 = vector.shape_cast %35 : vector<16x16x3xf32> to vector<256x3xf32>
    %37 = arith.truncf %36 : vector<256x3xf32> to vector<256x3xbf16>
    %c4 = arith.constant 4 : index
    %c0_16 = arith.constant 0 : index
    %c0_17 = arith.constant 0 : index
    %38 = vector.load %arg2[%c4, %c0_16, %c0_17] : memref<9x3x16xf32, #tpu.memory_space<vmem>>, vector<1x3x16xf32>
    %39 = vector.shape_cast %38 : vector<1x3x16xf32> to vector<3x16xf32>
    %40 = arith.truncf %39 : vector<3x16xf32> to vector<3x16xbf16>
    %cst_18 = arith.constant dense<0.000000e+00> : vector<256x16xf32>
    %41 = tpu.matmul %37, %40, %cst_18 {dimension_numbers = #tpu.dot_dimension_numbers<[1], [0], [0], [1], [0, 0, 1, 1], [], []>} : vector<256x3xbf16>, vector<3x16xbf16>, vector<256x16xf32> -> vector<256x16xf32>
    %42 = arith.addf %34, %41 : vector<256x16xf32>
    %43 = vector.extract_strided_slice %1 {offsets = [1, 2, 0], sizes = [16, 16, 3], strides = [1, 1, 1]} : vector<18x18x3xf32> to vector<16x16x3xf32>
    %44 = vector.shape_cast %43 : vector<16x16x3xf32> to vector<256x3xf32>
    %45 = arith.truncf %44 : vector<256x3xf32> to vector<256x3xbf16>
    %c5 = arith.constant 5 : index
    %c0_19 = arith.constant 0 : index
    %c0_20 = arith.constant 0 : index
    %46 = vector.load %arg2[%c5, %c0_19, %c0_20] : memref<9x3x16xf32, #tpu.memory_space<vmem>>, vector<1x3x16xf32>
    %47 = vector.shape_cast %46 : vector<1x3x16xf32> to vector<3x16xf32>
    %48 = arith.truncf %47 : vector<3x16xf32> to vector<3x16xbf16>
    %cst_21 = arith.constant dense<0.000000e+00> : vector<256x16xf32>
    %49 = tpu.matmul %45, %48, %cst_21 {dimension_numbers = #tpu.dot_dimension_numbers<[1], [0], [0], [1], [0, 0, 1, 1], [], []>} : vector<256x3xbf16>, vector<3x16xbf16>, vector<256x16xf32> -> vector<256x16xf32>
    %50 = arith.addf %42, %49 : vector<256x16xf32>
    %51 = vector.extract_strided_slice %1 {offsets = [2, 0, 0], sizes = [16, 16, 3], strides = [1, 1, 1]} : vector<18x18x3xf32> to vector<16x16x3xf32>
    %52 = vector.shape_cast %51 : vector<16x16x3xf32> to vector<256x3xf32>
    %53 = arith.truncf %52 : vector<256x3xf32> to vector<256x3xbf16>
    %c6 = arith.constant 6 : index
    %c0_22 = arith.constant 0 : index
    %c0_23 = arith.constant 0 : index
    %54 = vector.load %arg2[%c6, %c0_22, %c0_23] : memref<9x3x16xf32, #tpu.memory_space<vmem>>, vector<1x3x16xf32>
    %55 = vector.shape_cast %54 : vector<1x3x16xf32> to vector<3x16xf32>
    %56 = arith.truncf %55 : vector<3x16xf32> to vector<3x16xbf16>
    %cst_24 = arith.constant dense<0.000000e+00> : vector<256x16xf32>
    %57 = tpu.matmul %53, %56, %cst_24 {dimension_numbers = #tpu.dot_dimension_numbers<[1], [0], [0], [1], [0, 0, 1, 1], [], []>} : vector<256x3xbf16>, vector<3x16xbf16>, vector<256x16xf32> -> vector<256x16xf32>
    %58 = arith.addf %50, %57 : vector<256x16xf32>
    %59 = vector.extract_strided_slice %1 {offsets = [2, 1, 0], sizes = [16, 16, 3], strides = [1, 1, 1]} : vector<18x18x3xf32> to vector<16x16x3xf32>
    %60 = vector.shape_cast %59 : vector<16x16x3xf32> to vector<256x3xf32>
    %61 = arith.truncf %60 : vector<256x3xf32> to vector<256x3xbf16>
    %c7 = arith.constant 7 : index
    %c0_25 = arith.constant 0 : index
    %c0_26 = arith.constant 0 : index
    %62 = vector.load %arg2[%c7, %c0_25, %c0_26] : memref<9x3x16xf32, #tpu.memory_space<vmem>>, vector<1x3x16xf32>
    %63 = vector.shape_cast %62 : vector<1x3x16xf32> to vector<3x16xf32>
    %64 = arith.truncf %63 : vector<3x16xf32> to vector<3x16xbf16>
    %cst_27 = arith.constant dense<0.000000e+00> : vector<256x16xf32>
    %65 = tpu.matmul %61, %64, %cst_27 {dimension_numbers = #tpu.dot_dimension_numbers<[1], [0], [0], [1], [0, 0, 1, 1], [], []>} : vector<256x3xbf16>, vector<3x16xbf16>, vector<256x16xf32> -> vector<256x16xf32>
    %66 = arith.addf %58, %65 : vector<256x16xf32>
    %67 = vector.extract_strided_slice %1 {offsets = [2, 2, 0], sizes = [16, 16, 3], strides = [1, 1, 1]} : vector<18x18x3xf32> to vector<16x16x3xf32>
    %68 = vector.shape_cast %67 : vector<16x16x3xf32> to vector<256x3xf32>
    %69 = arith.truncf %68 : vector<256x3xf32> to vector<256x3xbf16>
    %c8 = arith.constant 8 : index
    %c0_28 = arith.constant 0 : index
    %c0_29 = arith.constant 0 : index
    %70 = vector.load %arg2[%c8, %c0_28, %c0_29] : memref<9x3x16xf32, #tpu.memory_space<vmem>>, vector<1x3x16xf32>
    %71 = vector.shape_cast %70 : vector<1x3x16xf32> to vector<3x16xf32>
    %72 = arith.truncf %71 : vector<3x16xf32> to vector<3x16xbf16>
    %cst_30 = arith.constant dense<0.000000e+00> : vector<256x16xf32>
    %73 = tpu.matmul %69, %72, %cst_30 {dimension_numbers = #tpu.dot_dimension_numbers<[1], [0], [0], [1], [0, 0, 1, 1], [], []>} : vector<256x3xbf16>, vector<3x16xbf16>, vector<256x16xf32> -> vector<256x16xf32>
    %74 = arith.addf %66, %73 : vector<256x16xf32>
    %c0_31 = arith.constant 0 : index
    %c0_32 = arith.constant 0 : index
    %75 = vector.load %arg3[%c0_31, %c0_32] : memref<1x16xf32, #tpu.memory_space<vmem>>, vector<1x16xf32>
    %76 = vector.broadcast %75 : vector<1x16xf32> to vector<256x16xf32>
    %77 = arith.addf %74, %76 : vector<256x16xf32>
    %cst_33 = arith.constant 0.000000e+00 : f32
    %78 = vector.broadcast %cst_33 : f32 to vector<256x16xf32>
    %79 = arith.maximumf %77, %78 : vector<256x16xf32>
    %c0_34 = arith.constant 0 : index
    %c0_35 = arith.constant 0 : index
    %80 = vector.load %arg4[%c0_34, %c0_35] : memref<256x16xf32, #tpu.memory_space<vmem>>, vector<256x16xf32>
    tpu.vector_store %arg4[%c0_34, %c0_35], %79 {strides = array<i32>} : memref<256x16xf32, #tpu.memory_space<vmem>>, vector<256x16xf32>,
    return
  }
  func.func @transform_0(%arg0: i32) -> (i32, i32, i32, i32) {
    %c0_i32 = arith.constant 0 : i32
    %c0_i32_0 = arith.constant 0 : i32
    %c0_i32_1 = arith.constant 0 : i32
    %c0_i32_2 = arith.constant 0 : i32
    return %arg0, %c0_i32, %c0_i32_0, %c0_i32_1 : i32, i32, i32, i32
  }
  func.func @transform_1(%arg0: i32) -> (i32, i32, i32) {
    %c0_i32 = arith.constant 0 : i32
    %c0_i32_0 = arith.constant 0 : i32
    %c0_i32_1 = arith.constant 0 : i32
    %c0_i32_2 = arith.constant 0 : i32
    return %c0_i32, %c0_i32_0, %c0_i32_1 : i32, i32, i32
  }
  func.func @transform_2(%arg0: i32) -> (i32, i32) {
    %c0_i32 = arith.constant 0 : i32
    %c0_i32_0 = arith.constant 0 : i32
    %c0_i32_1 = arith.constant 0 : i32
    return %c0_i32, %c0_i32_0 : i32, i32
  }
  func.func @transform_3(%arg0: i32) -> (i32, i32) {
    %c0_i32 = arith.constant 0 : i32
    %c0_i32_0 = arith.constant 0 : i32
    return %arg0, %c0_i32 : i32, i32
  }
}

module attributes {stable_mosaic.version = 11 : i64} {
  func.func @_conv3x3_kernel(%arg0: i32, %arg1: memref<1x18x18x16xf32, #tpu.memory_space<vmem>>, %arg2: memref<9x16x16xf32, #tpu.memory_space<vmem>>, %arg3: memref<1x16xf32, #tpu.memory_space<vmem>>, %arg4: memref<256x16xf32, #tpu.memory_space<vmem>>) attributes {dimension_semantics = [#tpu.dimension_semantics<parallel>], iteration_bounds = array<i64: 2>, scalar_prefetch = 0 : i64, scratch_operands = 0 : i64, tpu.core_type = #tpu.core_type<tc>, window_params = [{transform_indices = @transform_0, window_bounds = array<i64: 1, 18, 18, 16>}, {pipeline_mode = #tpu.pipeline_mode<synchronous>, transform_indices = @transform_1, window_bounds = array<i64: 9, 16, 16>}, {pipeline_mode = #tpu.pipeline_mode<synchronous>, transform_indices = @transform_2, window_bounds = array<i64: 1, 16>}, {transform_indices = @transform_3, window_bounds = array<i64: 256, 16>}]} {
    %c0 = arith.constant 0 : index
    %c0_0 = arith.constant 0 : index
    %c0_1 = arith.constant 0 : index
    %c0_2 = arith.constant 0 : index
    %0 = vector.load %arg1[%c0, %c0_0, %c0_1, %c0_2] : memref<1x18x18x16xf32, #tpu.memory_space<vmem>>, vector<1x18x18x16xf32>
    %1 = vector.shape_cast %0 : vector<1x18x18x16xf32> to vector<18x18x16xf32>
    %cst = arith.constant 0.000000e+00 : f32
    %2 = vector.broadcast %cst : f32 to vector<256x16xf32>
    %3 = vector.extract_strided_slice %1 {offsets = [0, 0, 0], sizes = [16, 16, 16], strides = [1, 1, 1]} : vector<18x18x16xf32> to vector<16x16x16xf32>
    %4 = vector.shape_cast %3 : vector<16x16x16xf32> to vector<256x16xf32>
    %5 = arith.truncf %4 : vector<256x16xf32> to vector<256x16xbf16>
    %c0_3 = arith.constant 0 : index
    %c0_4 = arith.constant 0 : index
    %c0_5 = arith.constant 0 : index
    %6 = vector.load %arg2[%c0_3, %c0_4, %c0_5] : memref<9x16x16xf32, #tpu.memory_space<vmem>>, vector<1x16x16xf32>
    %7 = vector.shape_cast %6 : vector<1x16x16xf32> to vector<16x16xf32>
    %8 = arith.truncf %7 : vector<16x16xf32> to vector<16x16xbf16>
    %cst_6 = arith.constant dense<0.000000e+00> : vector<256x16xf32>
    %9 = tpu.matmul %5, %8, %cst_6 {dimension_numbers = #tpu.dot_dimension_numbers<[1], [0], [0], [1], [0, 0, 1, 1], [], []>} : vector<256x16xbf16>, vector<16x16xbf16>, vector<256x16xf32> -> vector<256x16xf32>
    %10 = arith.addf %2, %9 : vector<256x16xf32>
    %11 = vector.extract_strided_slice %1 {offsets = [0, 1, 0], sizes = [16, 16, 16], strides = [1, 1, 1]} : vector<18x18x16xf32> to vector<16x16x16xf32>
    %12 = vector.shape_cast %11 : vector<16x16x16xf32> to vector<256x16xf32>
    %13 = arith.truncf %12 : vector<256x16xf32> to vector<256x16xbf16>
    %c1 = arith.constant 1 : index
    %c0_7 = arith.constant 0 : index
    %c0_8 = arith.constant 0 : index
    %14 = vector.load %arg2[%c1, %c0_7, %c0_8] : memref<9x16x16xf32, #tpu.memory_space<vmem>>, vector<1x16x16xf32>
    %15 = vector.shape_cast %14 : vector<1x16x16xf32> to vector<16x16xf32>
    %16 = arith.truncf %15 : vector<16x16xf32> to vector<16x16xbf16>
    %cst_9 = arith.constant dense<0.000000e+00> : vector<256x16xf32>
    %17 = tpu.matmul %13, %16, %cst_9 {dimension_numbers = #tpu.dot_dimension_numbers<[1], [0], [0], [1], [0, 0, 1, 1], [], []>} : vector<256x16xbf16>, vector<16x16xbf16>, vector<256x16xf32> -> vector<256x16xf32>
    %18 = arith.addf %10, %17 : vector<256x16xf32>
    %19 = vector.extract_strided_slice %1 {offsets = [0, 2, 0], sizes = [16, 16, 16], strides = [1, 1, 1]} : vector<18x18x16xf32> to vector<16x16x16xf32>
    %20 = vector.shape_cast %19 : vector<16x16x16xf32> to vector<256x16xf32>
    %21 = arith.truncf %20 : vector<256x16xf32> to vector<256x16xbf16>
    %c2 = arith.constant 2 : index
    %c0_10 = arith.constant 0 : index
    %c0_11 = arith.constant 0 : index
    %22 = vector.load %arg2[%c2, %c0_10, %c0_11] : memref<9x16x16xf32, #tpu.memory_space<vmem>>, vector<1x16x16xf32>
    %23 = vector.shape_cast %22 : vector<1x16x16xf32> to vector<16x16xf32>
    %24 = arith.truncf %23 : vector<16x16xf32> to vector<16x16xbf16>
    %cst_12 = arith.constant dense<0.000000e+00> : vector<256x16xf32>
    %25 = tpu.matmul %21, %24, %cst_12 {dimension_numbers = #tpu.dot_dimension_numbers<[1], [0], [0], [1], [0, 0, 1, 1], [], []>} : vector<256x16xbf16>, vector<16x16xbf16>, vector<256x16xf32> -> vector<256x16xf32>
    %26 = arith.addf %18, %25 : vector<256x16xf32>
    %27 = vector.extract_strided_slice %1 {offsets = [1, 0, 0], sizes = [16, 16, 16], strides = [1, 1, 1]} : vector<18x18x16xf32> to vector<16x16x16xf32>
    %28 = vector.shape_cast %27 : vector<16x16x16xf32> to vector<256x16xf32>
    %29 = arith.truncf %28 : vector<256x16xf32> to vector<256x16xbf16>
    %c3 = arith.constant 3 : index
    %c0_13 = arith.constant 0 : index
    %c0_14 = arith.constant 0 : index
    %30 = vector.load %arg2[%c3, %c0_13, %c0_14] : memref<9x16x16xf32, #tpu.memory_space<vmem>>, vector<1x16x16xf32>
    %31 = vector.shape_cast %30 : vector<1x16x16xf32> to vector<16x16xf32>
    %32 = arith.truncf %31 : vector<16x16xf32> to vector<16x16xbf16>
    %cst_15 = arith.constant dense<0.000000e+00> : vector<256x16xf32>
    %33 = tpu.matmul %29, %32, %cst_15 {dimension_numbers = #tpu.dot_dimension_numbers<[1], [0], [0], [1], [0, 0, 1, 1], [], []>} : vector<256x16xbf16>, vector<16x16xbf16>, vector<256x16xf32> -> vector<256x16xf32>
    %34 = arith.addf %26, %33 : vector<256x16xf32>
    %35 = vector.extract_strided_slice %1 {offsets = [1, 1, 0], sizes = [16, 16, 16], strides = [1, 1, 1]} : vector<18x18x16xf32> to vector<16x16x16xf32>
    %36 = vector.shape_cast %35 : vector<16x16x16xf32> to vector<256x16xf32>
    %37 = arith.truncf %36 : vector<256x16xf32> to vector<256x16xbf16>
    %c4 = arith.constant 4 : index
    %c0_16 = arith.constant 0 : index
    %c0_17 = arith.constant 0 : index
    %38 = vector.load %arg2[%c4, %c0_16, %c0_17] : memref<9x16x16xf32, #tpu.memory_space<vmem>>, vector<1x16x16xf32>
    %39 = vector.shape_cast %38 : vector<1x16x16xf32> to vector<16x16xf32>
    %40 = arith.truncf %39 : vector<16x16xf32> to vector<16x16xbf16>
    %cst_18 = arith.constant dense<0.000000e+00> : vector<256x16xf32>
    %41 = tpu.matmul %37, %40, %cst_18 {dimension_numbers = #tpu.dot_dimension_numbers<[1], [0], [0], [1], [0, 0, 1, 1], [], []>} : vector<256x16xbf16>, vector<16x16xbf16>, vector<256x16xf32> -> vector<256x16xf32>
    %42 = arith.addf %34, %41 : vector<256x16xf32>
    %43 = vector.extract_strided_slice %1 {offsets = [1, 2, 0], sizes = [16, 16, 16], strides = [1, 1, 1]} : vector<18x18x16xf32> to vector<16x16x16xf32>
    %44 = vector.shape_cast %43 : vector<16x16x16xf32> to vector<256x16xf32>
    %45 = arith.truncf %44 : vector<256x16xf32> to vector<256x16xbf16>
    %c5 = arith.constant 5 : index
    %c0_19 = arith.constant 0 : index
    %c0_20 = arith.constant 0 : index
    %46 = vector.load %arg2[%c5, %c0_19, %c0_20] : memref<9x16x16xf32, #tpu.memory_space<vmem>>, vector<1x16x16xf32>
    %47 = vector.shape_cast %46 : vector<1x16x16xf32> to vector<16x16xf32>
    %48 = arith.truncf %47 : vector<16x16xf32> to vector<16x16xbf16>
    %cst_21 = arith.constant dense<0.000000e+00> : vector<256x16xf32>
    %49 = tpu.matmul %45, %48, %cst_21 {dimension_numbers = #tpu.dot_dimension_numbers<[1], [0], [0], [1], [0, 0, 1, 1], [], []>} : vector<256x16xbf16>, vector<16x16xbf16>, vector<256x16xf32> -> vector<256x16xf32>
    %50 = arith.addf %42, %49 : vector<256x16xf32>
    %51 = vector.extract_strided_slice %1 {offsets = [2, 0, 0], sizes = [16, 16, 16], strides = [1, 1, 1]} : vector<18x18x16xf32> to vector<16x16x16xf32>
    %52 = vector.shape_cast %51 : vector<16x16x16xf32> to vector<256x16xf32>
    %53 = arith.truncf %52 : vector<256x16xf32> to vector<256x16xbf16>
    %c6 = arith.constant 6 : index
    %c0_22 = arith.constant 0 : index
    %c0_23 = arith.constant 0 : index
    %54 = vector.load %arg2[%c6, %c0_22, %c0_23] : memref<9x16x16xf32, #tpu.memory_space<vmem>>, vector<1x16x16xf32>
    %55 = vector.shape_cast %54 : vector<1x16x16xf32> to vector<16x16xf32>
    %56 = arith.truncf %55 : vector<16x16xf32> to vector<16x16xbf16>
    %cst_24 = arith.constant dense<0.000000e+00> : vector<256x16xf32>
    %57 = tpu.matmul %53, %56, %cst_24 {dimension_numbers = #tpu.dot_dimension_numbers<[1], [0], [0], [1], [0, 0, 1, 1], [], []>} : vector<256x16xbf16>, vector<16x16xbf16>, vector<256x16xf32> -> vector<256x16xf32>
    %58 = arith.addf %50, %57 : vector<256x16xf32>
    %59 = vector.extract_strided_slice %1 {offsets = [2, 1, 0], sizes = [16, 16, 16], strides = [1, 1, 1]} : vector<18x18x16xf32> to vector<16x16x16xf32>
    %60 = vector.shape_cast %59 : vector<16x16x16xf32> to vector<256x16xf32>
    %61 = arith.truncf %60 : vector<256x16xf32> to vector<256x16xbf16>
    %c7 = arith.constant 7 : index
    %c0_25 = arith.constant 0 : index
    %c0_26 = arith.constant 0 : index
    %62 = vector.load %arg2[%c7, %c0_25, %c0_26] : memref<9x16x16xf32, #tpu.memory_space<vmem>>, vector<1x16x16xf32>
    %63 = vector.shape_cast %62 : vector<1x16x16xf32> to vector<16x16xf32>
    %64 = arith.truncf %63 : vector<16x16xf32> to vector<16x16xbf16>
    %cst_27 = arith.constant dense<0.000000e+00> : vector<256x16xf32>
    %65 = tpu.matmul %61, %64, %cst_27 {dimension_numbers = #tpu.dot_dimension_numbers<[1], [0], [0], [1], [0, 0, 1, 1], [], []>} : vector<256x16xbf16>, vector<16x16xbf16>, vector<256x16xf32> -> vector<256x16xf32>
    %66 = arith.addf %58, %65 : vector<256x16xf32>
    %67 = vector.extract_strided_slice %1 {offsets = [2, 2, 0], sizes = [16, 16, 16], strides = [1, 1, 1]} : vector<18x18x16xf32> to vector<16x16x16xf32>
    %68 = vector.shape_cast %67 : vector<16x16x16xf32> to vector<256x16xf32>
    %69 = arith.truncf %68 : vector<256x16xf32> to vector<256x16xbf16>
    %c8 = arith.constant 8 : index
    %c0_28 = arith.constant 0 : index
    %c0_29 = arith.constant 0 : index
    %70 = vector.load %arg2[%c8, %c0_28, %c0_29] : memref<9x16x16xf32, #tpu.memory_space<vmem>>, vector<1x16x16xf32>
    %71 = vector.shape_cast %70 : vector<1x16x16xf32> to vector<16x16xf32>
    %72 = arith.truncf %71 : vector<16x16xf32> to vector<16x16xbf16>
    %cst_30 = arith.constant dense<0.000000e+00> : vector<256x16xf32>
    %73 = tpu.matmul %69, %72, %cst_30 {dimension_numbers = #tpu.dot_dimension_numbers<[1], [0], [0], [1], [0, 0, 1, 1], [], []>} : vector<256x16xbf16>, vector<16x16xbf16>, vector<256x16xf32> -> vector<256x16xf32>
    %74 = arith.addf %66, %73 : vector<256x16xf32>
    %c0_31 = arith.constant 0 : index
    %c0_32 = arith.constant 0 : index
    %75 = vector.load %arg3[%c0_31, %c0_32] : memref<1x16xf32, #tpu.memory_space<vmem>>, vector<1x16xf32>
    %76 = vector.broadcast %75 : vector<1x16xf32> to vector<256x16xf32>
    %77 = arith.addf %74, %76 : vector<256x16xf32>
    %cst_33 = arith.constant 0.000000e+00 : f32
    %78 = vector.broadcast %cst_33 : f32 to vector<256x16xf32>
    %79 = arith.maximumf %77, %78 : vector<256x16xf32>
    %c0_34 = arith.constant 0 : index
    %c0_35 = arith.constant 0 : index
    %80 = vector.load %arg4[%c0_34, %c0_35] : memref<256x16xf32, #tpu.memory_space<vmem>>, vector<256x16xf32>
    tpu.vector_store %arg4[%c0_34, %c0_35], %79 {strides = array<i32>} : memref<256x16xf32, #tpu.memory_space<vmem>>, vector<256x16xf32>,
    return
  }
  func.func @transform_0(%arg0: i32) -> (i32, i32, i32, i32) {
    %c0_i32 = arith.constant 0 : i32
    %c0_i32_0 = arith.constant 0 : i32
    %c0_i32_1 = arith.constant 0 : i32
    %c0_i32_2 = arith.constant 0 : i32
    return %arg0, %c0_i32, %c0_i32_0, %c0_i32_1 : i32, i32, i32, i32
  }
  func.func @transform_1(%arg0: i32) -> (i32, i32, i32) {
    %c0_i32 = arith.constant 0 : i32
    %c0_i32_0 = arith.constant 0 : i32
    %c0_i32_1 = arith.constant 0 : i32
    %c0_i32_2 = arith.constant 0 : i32
    return %c0_i32, %c0_i32_0, %c0_i32_1 : i32, i32, i32
  }
  func.func @transform_2(%arg0: i32) -> (i32, i32) {
    %c0_i32 = arith.constant 0 : i32
    %c0_i32_0 = arith.constant 0 : i32
    %c0_i32_1 = arith.constant 0 : i32
    return %c0_i32, %c0_i32_0 : i32, i32
  }
  func.func @transform_3(%arg0: i32) -> (i32, i32) {
    %c0_i32 = arith.constant 0 : i32
    %c0_i32_0 = arith.constant 0 : i32
    return %arg0, %c0_i32 : i32, i32
  }
}

module attributes {stable_mosaic.version = 11 : i64} {
  func.func @_matmul_kernel(%arg0: i32, %arg1: i32, %arg2: i32, %arg3: memref<256x16xf32, #tpu.memory_space<vmem>>, %arg4: memref<16x15xf32, #tpu.memory_space<vmem>>, %arg5: memref<1x15xf32, #tpu.memory_space<vmem>>, %arg6: memref<256x15xf32, #tpu.memory_space<vmem>>, %arg7: memref<256x15xf32, #tpu.memory_space<vmem>>) attributes {dimension_semantics = [#tpu.dimension_semantics<parallel>, #tpu.dimension_semantics<parallel>, #tpu.dimension_semantics<arbitrary>], iteration_bounds = array<i64: 2, 1, 1>, scalar_prefetch = 0 : i64, scratch_operands = 1 : i64, tpu.core_type = #tpu.core_type<tc>, window_params = [{transform_indices = @transform_0, window_bounds = array<i64: 256, 16>}, {transform_indices = @transform_1, window_bounds = array<i64: 16, 15>}, {transform_indices = @transform_2, window_bounds = array<i64: 1, 15>}, {transform_indices = @transform_3, window_bounds = array<i64: 256, 15>}]} {
    %c0_i32 = arith.constant 0 : i32
    %0 = arith.cmpi eq, %arg2, %c0_i32 : i32
    %1 = arith.extui %0 : i1 to i32
    %c0_i32_0 = arith.constant 0 : i32
    %2 = arith.cmpi ne, %1, %c0_i32_0 : i32
    scf.if %2 {
      %cst_10 = arith.constant 0.000000e+00 : f32
      %14 = vector.broadcast %cst_10 : f32 to vector<256x15xf32>
      %c0_11 = arith.constant 0 : index
      %c0_12 = arith.constant 0 : index
      %15 = vector.load %arg7[%c0_11, %c0_12] : memref<256x15xf32, #tpu.memory_space<vmem>>, vector<256x15xf32>
      tpu.vector_store %arg7[%c0_11, %c0_12], %14 {strides = array<i32>} : memref<256x15xf32, #tpu.memory_space<vmem>>, vector<256x15xf32>,
    } else {
    }
    %c0 = arith.constant 0 : index
    %c0_1 = arith.constant 0 : index
    %3 = vector.load %arg7[%c0, %c0_1] : memref<256x15xf32, #tpu.memory_space<vmem>>, vector<256x15xf32>
    %c0_2 = arith.constant 0 : index
    %c0_3 = arith.constant 0 : index
    %4 = vector.load %arg3[%c0_2, %c0_3] : memref<256x16xf32, #tpu.memory_space<vmem>>, vector<256x16xf32>
    %5 = arith.truncf %4 : vector<256x16xf32> to vector<256x16xbf16>
    %c0_4 = arith.constant 0 : index
    %c0_5 = arith.constant 0 : index
    %6 = vector.load %arg4[%c0_4, %c0_5] : memref<16x15xf32, #tpu.memory_space<vmem>>, vector<16x15xf32>
    %7 = arith.truncf %6 : vector<16x15xf32> to vector<16x15xbf16>
    %cst = arith.constant dense<0.000000e+00> : vector<256x15xf32>
    %8 = tpu.matmul %5, %7, %cst {dimension_numbers = #tpu.dot_dimension_numbers<[1], [0], [0], [1], [0, 0, 1, 1], [], []>} : vector<256x16xbf16>, vector<16x15xbf16>, vector<256x15xf32> -> vector<256x15xf32>
    %9 = arith.addf %3, %8 : vector<256x15xf32>
    %c0_6 = arith.constant 0 : index
    %c0_7 = arith.constant 0 : index
    %10 = vector.load %arg7[%c0_6, %c0_7] : memref<256x15xf32, #tpu.memory_space<vmem>>, vector<256x15xf32>
    tpu.vector_store %arg7[%c0_6, %c0_7], %9 {strides = array<i32>} : memref<256x15xf32, #tpu.memory_space<vmem>>, vector<256x15xf32>,
    %c0_i32_8 = arith.constant 0 : i32
    %11 = arith.cmpi eq, %arg2, %c0_i32_8 : i32
    %12 = arith.extui %11 : i1 to i32
    %c0_i32_9 = arith.constant 0 : i32
    %13 = arith.cmpi ne, %12, %c0_i32_9 : i32
    scf.if %13 {
      %c0_10 = arith.constant 0 : index
      %c0_11 = arith.constant 0 : index
      %14 = vector.load %arg7[%c0_10, %c0_11] : memref<256x15xf32, #tpu.memory_space<vmem>>, vector<256x15xf32>
      %c0_12 = arith.constant 0 : index
      %c0_13 = arith.constant 0 : index
      %15 = vector.load %arg5[%c0_12, %c0_13] : memref<1x15xf32, #tpu.memory_space<vmem>>, vector<1x15xf32>
      %16 = vector.broadcast %15 : vector<1x15xf32> to vector<256x15xf32>
      %17 = arith.addf %14, %16 : vector<256x15xf32>
      %c0_14 = arith.constant 0 : index
      %c0_15 = arith.constant 0 : index
      %18 = vector.load %arg6[%c0_14, %c0_15] : memref<256x15xf32, #tpu.memory_space<vmem>>, vector<256x15xf32>
      tpu.vector_store %arg6[%c0_14, %c0_15], %17 {strides = array<i32>} : memref<256x15xf32, #tpu.memory_space<vmem>>, vector<256x15xf32>,
    } else {
    }
    return
  }
  func.func @transform_0(%arg0: i32, %arg1: i32, %arg2: i32) -> (i32, i32) {
    %c0_i32 = arith.constant 0 : i32
    return %arg0, %arg2 : i32, i32
  }
  func.func @transform_1(%arg0: i32, %arg1: i32, %arg2: i32) -> (i32, i32) {
    %c0_i32 = arith.constant 0 : i32
    return %arg2, %arg1 : i32, i32
  }
  func.func @transform_2(%arg0: i32, %arg1: i32, %arg2: i32) -> (i32, i32) {
    %c0_i32 = arith.constant 0 : i32
    %c0_i32_0 = arith.constant 0 : i32
    return %c0_i32, %arg1 : i32, i32
  }
  func.func @transform_3(%arg0: i32, %arg1: i32, %arg2: i32) -> (i32, i32) {
    %c0_i32 = arith.constant 0 : i32
    return %arg0, %arg1 : i32, i32
  }
}

module attributes {stable_mosaic.version = 11 : i64} {
  func.func @_matmul_kernel(%arg0: i32, %arg1: i32, %arg2: i32, %arg3: memref<16x256xf32, #tpu.memory_space<vmem>>, %arg4: memref<256x32xf32, #tpu.memory_space<vmem>>, %arg5: memref<1x32xf32, #tpu.memory_space<vmem>>, %arg6: memref<16x32xf32, #tpu.memory_space<vmem>>, %arg7: memref<16x32xf32, #tpu.memory_space<vmem>>) attributes {dimension_semantics = [#tpu.dimension_semantics<parallel>, #tpu.dimension_semantics<parallel>, #tpu.dimension_semantics<arbitrary>], iteration_bounds = array<i64: 1, 1, 1>, scalar_prefetch = 0 : i64, scratch_operands = 1 : i64, tpu.core_type = #tpu.core_type<tc>, window_params = [{transform_indices = @transform_0, window_bounds = array<i64: 16, 256>}, {transform_indices = @transform_1, window_bounds = array<i64: 256, 32>}, {transform_indices = @transform_2, window_bounds = array<i64: 1, 32>}, {transform_indices = @transform_3, window_bounds = array<i64: 16, 32>}]} {
    %c0_i32 = arith.constant 0 : i32
    %0 = arith.cmpi eq, %arg2, %c0_i32 : i32
    %1 = arith.extui %0 : i1 to i32
    %c0_i32_0 = arith.constant 0 : i32
    %2 = arith.cmpi ne, %1, %c0_i32_0 : i32
    scf.if %2 {
      %cst_10 = arith.constant 0.000000e+00 : f32
      %14 = vector.broadcast %cst_10 : f32 to vector<16x32xf32>
      %c0_11 = arith.constant 0 : index
      %c0_12 = arith.constant 0 : index
      %15 = vector.load %arg7[%c0_11, %c0_12] : memref<16x32xf32, #tpu.memory_space<vmem>>, vector<16x32xf32>
      tpu.vector_store %arg7[%c0_11, %c0_12], %14 {strides = array<i32>} : memref<16x32xf32, #tpu.memory_space<vmem>>, vector<16x32xf32>,
    } else {
    }
    %c0 = arith.constant 0 : index
    %c0_1 = arith.constant 0 : index
    %3 = vector.load %arg7[%c0, %c0_1] : memref<16x32xf32, #tpu.memory_space<vmem>>, vector<16x32xf32>
    %c0_2 = arith.constant 0 : index
    %c0_3 = arith.constant 0 : index
    %4 = vector.load %arg3[%c0_2, %c0_3] : memref<16x256xf32, #tpu.memory_space<vmem>>, vector<16x256xf32>
    %5 = arith.truncf %4 : vector<16x256xf32> to vector<16x256xbf16>
    %c0_4 = arith.constant 0 : index
    %c0_5 = arith.constant 0 : index
    %6 = vector.load %arg4[%c0_4, %c0_5] : memref<256x32xf32, #tpu.memory_space<vmem>>, vector<256x32xf32>
    %7 = arith.truncf %6 : vector<256x32xf32> to vector<256x32xbf16>
    %cst = arith.constant dense<0.000000e+00> : vector<16x32xf32>
    %8 = tpu.matmul %5, %7, %cst {dimension_numbers = #tpu.dot_dimension_numbers<[1], [0], [0], [1], [0, 0, 1, 1], [], []>} : vector<16x256xbf16>, vector<256x32xbf16>, vector<16x32xf32> -> vector<16x32xf32>
    %9 = arith.addf %3, %8 : vector<16x32xf32>
    %c0_6 = arith.constant 0 : index
    %c0_7 = arith.constant 0 : index
    %10 = vector.load %arg7[%c0_6, %c0_7] : memref<16x32xf32, #tpu.memory_space<vmem>>, vector<16x32xf32>
    tpu.vector_store %arg7[%c0_6, %c0_7], %9 {strides = array<i32>} : memref<16x32xf32, #tpu.memory_space<vmem>>, vector<16x32xf32>,
    %c0_i32_8 = arith.constant 0 : i32
    %11 = arith.cmpi eq, %arg2, %c0_i32_8 : i32
    %12 = arith.extui %11 : i1 to i32
    %c0_i32_9 = arith.constant 0 : i32
    %13 = arith.cmpi ne, %12, %c0_i32_9 : i32
    scf.if %13 {
      %c0_10 = arith.constant 0 : index
      %c0_11 = arith.constant 0 : index
      %14 = vector.load %arg7[%c0_10, %c0_11] : memref<16x32xf32, #tpu.memory_space<vmem>>, vector<16x32xf32>
      %c0_12 = arith.constant 0 : index
      %c0_13 = arith.constant 0 : index
      %15 = vector.load %arg5[%c0_12, %c0_13] : memref<1x32xf32, #tpu.memory_space<vmem>>, vector<1x32xf32>
      %16 = vector.broadcast %15 : vector<1x32xf32> to vector<16x32xf32>
      %17 = arith.addf %14, %16 : vector<16x32xf32>
      %cst_14 = arith.constant 0.000000e+00 : f32
      %18 = vector.broadcast %cst_14 : f32 to vector<16x32xf32>
      %19 = arith.maximumf %17, %18 : vector<16x32xf32>
      %c0_15 = arith.constant 0 : index
      %c0_16 = arith.constant 0 : index
      %20 = vector.load %arg6[%c0_15, %c0_16] : memref<16x32xf32, #tpu.memory_space<vmem>>, vector<16x32xf32>
      tpu.vector_store %arg6[%c0_15, %c0_16], %19 {strides = array<i32>} : memref<16x32xf32, #tpu.memory_space<vmem>>, vector<16x32xf32>,
    } else {
    }
    return
  }
  func.func @transform_0(%arg0: i32, %arg1: i32, %arg2: i32) -> (i32, i32) {
    %c0_i32 = arith.constant 0 : i32
    return %arg0, %arg2 : i32, i32
  }
  func.func @transform_1(%arg0: i32, %arg1: i32, %arg2: i32) -> (i32, i32) {
    %c0_i32 = arith.constant 0 : i32
    return %arg2, %arg1 : i32, i32
  }
  func.func @transform_2(%arg0: i32, %arg1: i32, %arg2: i32) -> (i32, i32) {
    %c0_i32 = arith.constant 0 : i32
    %c0_i32_0 = arith.constant 0 : i32
    return %c0_i32, %arg1 : i32, i32
  }
  func.func @transform_3(%arg0: i32, %arg1: i32, %arg2: i32) -> (i32, i32) {
    %c0_i32 = arith.constant 0 : i32
    return %arg0, %arg1 : i32, i32
  }
}

module attributes {stable_mosaic.version = 11 : i64} {
  func.func @_matmul_kernel(%arg0: i32, %arg1: i32, %arg2: i32, %arg3: memref<16x32xf32, #tpu.memory_space<vmem>>, %arg4: memref<32x32xf32, #tpu.memory_space<vmem>>, %arg5: memref<1x32xf32, #tpu.memory_space<vmem>>, %arg6: memref<16x32xf32, #tpu.memory_space<vmem>>, %arg7: memref<16x32xf32, #tpu.memory_space<vmem>>) attributes {dimension_semantics = [#tpu.dimension_semantics<parallel>, #tpu.dimension_semantics<parallel>, #tpu.dimension_semantics<arbitrary>], iteration_bounds = array<i64: 1, 1, 1>, scalar_prefetch = 0 : i64, scratch_operands = 1 : i64, tpu.core_type = #tpu.core_type<tc>, window_params = [{transform_indices = @transform_0, window_bounds = array<i64: 16, 32>}, {transform_indices = @transform_1, window_bounds = array<i64: 32, 32>}, {transform_indices = @transform_2, window_bounds = array<i64: 1, 32>}, {transform_indices = @transform_3, window_bounds = array<i64: 16, 32>}]} {
    %c0_i32 = arith.constant 0 : i32
    %0 = arith.cmpi eq, %arg2, %c0_i32 : i32
    %1 = arith.extui %0 : i1 to i32
    %c0_i32_0 = arith.constant 0 : i32
    %2 = arith.cmpi ne, %1, %c0_i32_0 : i32
    scf.if %2 {
      %cst_10 = arith.constant 0.000000e+00 : f32
      %14 = vector.broadcast %cst_10 : f32 to vector<16x32xf32>
      %c0_11 = arith.constant 0 : index
      %c0_12 = arith.constant 0 : index
      %15 = vector.load %arg7[%c0_11, %c0_12] : memref<16x32xf32, #tpu.memory_space<vmem>>, vector<16x32xf32>
      tpu.vector_store %arg7[%c0_11, %c0_12], %14 {strides = array<i32>} : memref<16x32xf32, #tpu.memory_space<vmem>>, vector<16x32xf32>,
    } else {
    }
    %c0 = arith.constant 0 : index
    %c0_1 = arith.constant 0 : index
    %3 = vector.load %arg7[%c0, %c0_1] : memref<16x32xf32, #tpu.memory_space<vmem>>, vector<16x32xf32>
    %c0_2 = arith.constant 0 : index
    %c0_3 = arith.constant 0 : index
    %4 = vector.load %arg3[%c0_2, %c0_3] : memref<16x32xf32, #tpu.memory_space<vmem>>, vector<16x32xf32>
    %5 = arith.truncf %4 : vector<16x32xf32> to vector<16x32xbf16>
    %c0_4 = arith.constant 0 : index
    %c0_5 = arith.constant 0 : index
    %6 = vector.load %arg4[%c0_4, %c0_5] : memref<32x32xf32, #tpu.memory_space<vmem>>, vector<32x32xf32>
    %7 = arith.truncf %6 : vector<32x32xf32> to vector<32x32xbf16>
    %cst = arith.constant dense<0.000000e+00> : vector<16x32xf32>
    %8 = tpu.matmul %5, %7, %cst {dimension_numbers = #tpu.dot_dimension_numbers<[1], [0], [0], [1], [0, 0, 1, 1], [], []>} : vector<16x32xbf16>, vector<32x32xbf16>, vector<16x32xf32> -> vector<16x32xf32>
    %9 = arith.addf %3, %8 : vector<16x32xf32>
    %c0_6 = arith.constant 0 : index
    %c0_7 = arith.constant 0 : index
    %10 = vector.load %arg7[%c0_6, %c0_7] : memref<16x32xf32, #tpu.memory_space<vmem>>, vector<16x32xf32>
    tpu.vector_store %arg7[%c0_6, %c0_7], %9 {strides = array<i32>} : memref<16x32xf32, #tpu.memory_space<vmem>>, vector<16x32xf32>,
    %c0_i32_8 = arith.constant 0 : i32
    %11 = arith.cmpi eq, %arg2, %c0_i32_8 : i32
    %12 = arith.extui %11 : i1 to i32
    %c0_i32_9 = arith.constant 0 : i32
    %13 = arith.cmpi ne, %12, %c0_i32_9 : i32
    scf.if %13 {
      %c0_10 = arith.constant 0 : index
      %c0_11 = arith.constant 0 : index
      %14 = vector.load %arg7[%c0_10, %c0_11] : memref<16x32xf32, #tpu.memory_space<vmem>>, vector<16x32xf32>
      %c0_12 = arith.constant 0 : index
      %c0_13 = arith.constant 0 : index
      %15 = vector.load %arg5[%c0_12, %c0_13] : memref<1x32xf32, #tpu.memory_space<vmem>>, vector<1x32xf32>
      %16 = vector.broadcast %15 : vector<1x32xf32> to vector<16x32xf32>
      %17 = arith.addf %14, %16 : vector<16x32xf32>
      %cst_14 = arith.constant 0.000000e+00 : f32
      %18 = vector.broadcast %cst_14 : f32 to vector<16x32xf32>
      %19 = arith.maximumf %17, %18 : vector<16x32xf32>
      %c0_15 = arith.constant 0 : index
      %c0_16 = arith.constant 0 : index
      %20 = vector.load %arg6[%c0_15, %c0_16] : memref<16x32xf32, #tpu.memory_space<vmem>>, vector<16x32xf32>
      tpu.vector_store %arg6[%c0_15, %c0_16], %19 {strides = array<i32>} : memref<16x32xf32, #tpu.memory_space<vmem>>, vector<16x32xf32>,
    } else {
    }
    return
  }
  func.func @transform_0(%arg0: i32, %arg1: i32, %arg2: i32) -> (i32, i32) {
    %c0_i32 = arith.constant 0 : i32
    return %arg0, %arg2 : i32, i32
  }
  func.func @transform_1(%arg0: i32, %arg1: i32, %arg2: i32) -> (i32, i32) {
    %c0_i32 = arith.constant 0 : i32
    return %arg2, %arg1 : i32, i32
  }
  func.func @transform_2(%arg0: i32, %arg1: i32, %arg2: i32) -> (i32, i32) {
    %c0_i32 = arith.constant 0 : i32
    %c0_i32_0 = arith.constant 0 : i32
    return %c0_i32, %arg1 : i32, i32
  }
  func.func @transform_3(%arg0: i32, %arg1: i32, %arg2: i32) -> (i32, i32) {
    %c0_i32 = arith.constant 0 : i32
    return %arg0, %arg1 : i32, i32
  }
}

module attributes {stable_mosaic.version = 11 : i64} {
  func.func @_matmul_kernel(%arg0: i32, %arg1: i32, %arg2: i32, %arg3: memref<16x32xf32, #tpu.memory_space<vmem>>, %arg4: memref<32x25xf32, #tpu.memory_space<vmem>>, %arg5: memref<1x25xf32, #tpu.memory_space<vmem>>, %arg6: memref<16x25xf32, #tpu.memory_space<vmem>>, %arg7: memref<16x25xf32, #tpu.memory_space<vmem>>) attributes {dimension_semantics = [#tpu.dimension_semantics<parallel>, #tpu.dimension_semantics<parallel>, #tpu.dimension_semantics<arbitrary>], iteration_bounds = array<i64: 1, 1, 1>, scalar_prefetch = 0 : i64, scratch_operands = 1 : i64, tpu.core_type = #tpu.core_type<tc>, window_params = [{transform_indices = @transform_0, window_bounds = array<i64: 16, 32>}, {transform_indices = @transform_1, window_bounds = array<i64: 32, 25>}, {transform_indices = @transform_2, window_bounds = array<i64: 1, 25>}, {transform_indices = @transform_3, window_bounds = array<i64: 16, 25>}]} {
    %c0_i32 = arith.constant 0 : i32
    %0 = arith.cmpi eq, %arg2, %c0_i32 : i32
    %1 = arith.extui %0 : i1 to i32
    %c0_i32_0 = arith.constant 0 : i32
    %2 = arith.cmpi ne, %1, %c0_i32_0 : i32
    scf.if %2 {
      %cst_10 = arith.constant 0.000000e+00 : f32
      %14 = vector.broadcast %cst_10 : f32 to vector<16x25xf32>
      %c0_11 = arith.constant 0 : index
      %c0_12 = arith.constant 0 : index
      %15 = vector.load %arg7[%c0_11, %c0_12] : memref<16x25xf32, #tpu.memory_space<vmem>>, vector<16x25xf32>
      tpu.vector_store %arg7[%c0_11, %c0_12], %14 {strides = array<i32>} : memref<16x25xf32, #tpu.memory_space<vmem>>, vector<16x25xf32>,
    } else {
    }
    %c0 = arith.constant 0 : index
    %c0_1 = arith.constant 0 : index
    %3 = vector.load %arg7[%c0, %c0_1] : memref<16x25xf32, #tpu.memory_space<vmem>>, vector<16x25xf32>
    %c0_2 = arith.constant 0 : index
    %c0_3 = arith.constant 0 : index
    %4 = vector.load %arg3[%c0_2, %c0_3] : memref<16x32xf32, #tpu.memory_space<vmem>>, vector<16x32xf32>
    %5 = arith.truncf %4 : vector<16x32xf32> to vector<16x32xbf16>
    %c0_4 = arith.constant 0 : index
    %c0_5 = arith.constant 0 : index
    %6 = vector.load %arg4[%c0_4, %c0_5] : memref<32x25xf32, #tpu.memory_space<vmem>>, vector<32x25xf32>
    %7 = arith.truncf %6 : vector<32x25xf32> to vector<32x25xbf16>
    %cst = arith.constant dense<0.000000e+00> : vector<16x25xf32>
    %8 = tpu.matmul %5, %7, %cst {dimension_numbers = #tpu.dot_dimension_numbers<[1], [0], [0], [1], [0, 0, 1, 1], [], []>} : vector<16x32xbf16>, vector<32x25xbf16>, vector<16x25xf32> -> vector<16x25xf32>
    %9 = arith.addf %3, %8 : vector<16x25xf32>
    %c0_6 = arith.constant 0 : index
    %c0_7 = arith.constant 0 : index
    %10 = vector.load %arg7[%c0_6, %c0_7] : memref<16x25xf32, #tpu.memory_space<vmem>>, vector<16x25xf32>
    tpu.vector_store %arg7[%c0_6, %c0_7], %9 {strides = array<i32>} : memref<16x25xf32, #tpu.memory_space<vmem>>, vector<16x25xf32>,
    %c0_i32_8 = arith.constant 0 : i32
    %11 = arith.cmpi eq, %arg2, %c0_i32_8 : i32
    %12 = arith.extui %11 : i1 to i32
    %c0_i32_9 = arith.constant 0 : i32
    %13 = arith.cmpi ne, %12, %c0_i32_9 : i32
    scf.if %13 {
      %c0_10 = arith.constant 0 : index
      %c0_11 = arith.constant 0 : index
      %14 = vector.load %arg7[%c0_10, %c0_11] : memref<16x25xf32, #tpu.memory_space<vmem>>, vector<16x25xf32>
      %c0_12 = arith.constant 0 : index
      %c0_13 = arith.constant 0 : index
      %15 = vector.load %arg5[%c0_12, %c0_13] : memref<1x25xf32, #tpu.memory_space<vmem>>, vector<1x25xf32>
      %16 = vector.broadcast %15 : vector<1x25xf32> to vector<16x25xf32>
      %17 = arith.addf %14, %16 : vector<16x25xf32>
      %c0_14 = arith.constant 0 : index
      %c0_15 = arith.constant 0 : index
      %18 = vector.load %arg6[%c0_14, %c0_15] : memref<16x25xf32, #tpu.memory_space<vmem>>, vector<16x25xf32>
      tpu.vector_store %arg6[%c0_14, %c0_15], %17 {strides = array<i32>} : memref<16x25xf32, #tpu.memory_space<vmem>>, vector<16x25xf32>,
    } else {
    }
    return
  }
  func.func @transform_0(%arg0: i32, %arg1: i32, %arg2: i32) -> (i32, i32) {
    %c0_i32 = arith.constant 0 : i32
    return %arg0, %arg2 : i32, i32
  }
  func.func @transform_1(%arg0: i32, %arg1: i32, %arg2: i32) -> (i32, i32) {
    %c0_i32 = arith.constant 0 : i32
    return %arg2, %arg1 : i32, i32
  }
  func.func @transform_2(%arg0: i32, %arg1: i32, %arg2: i32) -> (i32, i32) {
    %c0_i32 = arith.constant 0 : i32
    %c0_i32_0 = arith.constant 0 : i32
    return %c0_i32, %arg1 : i32, i32
  }
  func.func @transform_3(%arg0: i32, %arg1: i32, %arg2: i32) -> (i32, i32) {
    %c0_i32 = arith.constant 0 : i32
    return %arg0, %arg1 : i32, i32
  }
}

</mosaic_0001>

<bundles_post_ra>
// kernel: tile.18
= control target key start
LH: loop header
LB: loop body
LE: loop exit
PB: predicated region body
PF: predicated region fallthrough
CT: control target
= control target key end

     0   :  { %s22_s0 = inlined_call_operand.vmem [shape: f32[3], index: 0, kind: input, shape index: {}]   ;;  %s23_s1 = inlined_call_operand.vmem [shape: f32[2,3], index: 1, kind: output, shape index: {}]  }
   0x1   :  { %v4_v0 = vld [vmem:[%s22_s0] ss:$0 sm:$0xff] }
   0x2   :  { %5 = vst [vmem:[%s23_s1] sm:$0x3] %v4_v0 }

// kernel: tile.0
= control target key start
LH: loop header
LB: loop body
LE: loop exit
PB: predicated region body
PF: predicated region fallthrough
CT: control target
= control target key end

     0   :  { %vm7_vm0 = vcmask 7168   ;;  %s26_s10 = smov 126   ;;  %s49_s0 = inlined_call_operand.vmem [shape: f32[2,3], index: 0, kind: input, shape index: {}]   ;;  %s50_s1 = inlined_call_operand.vmem [shape: f32[6,1], index: 1, kind: output, shape index: {}]  }
   0x1   :  { %v4_v0 = vld [vmem:[%s49_s0] sm:$0x3]  ;;  %s25_s0 = smov 127  }
   0x2   :  { %5 = vst [vmem:[#allocation0] sm:$0x3] %v4_v0 }
   0x9   :  { %v9_v1 = vld [vmem:[#allocation0] sm:$0x3]  }
   0xa   :  { %v6_v2 = vld [vmem:[#allocation0] sm:$0x3]   ;;  %10 = vrot.lane.b32.xlu0 %v9_v1, %s25_s0 }
   0xb   :  { %8 = vst.msk [vmem:[%s50_s1] ss:$3 sm:$0x3] %vm7_vm0, %v6_v2   ;;  %v15_v3 = vld [vmem:[#allocation0] sm:$0x3]  }
   0xe   :  { %16 = vrot.lane.b32.xlu0 %v15_v3, %s26_s10 }
  0x7c   :  { %v11_v4 = vpop.permute.xlu0 %10  }
  0x7d   :  { %21 = vst.msk [vmem:[%s50_s1 + $0x1] ss:$3 sm:$0x3] %vm7_vm0, %v11_v4  }
  0x80   :  { %v17_v5 = vpop.permute.xlu0 %16  }
  0x81   :  { %22 = vst.msk [vmem:[%s50_s1 + $0x2] ss:$3 sm:$0x3] %vm7_vm0, %v17_v5  }

// kernel: faster_rcnn_forward.7
= control target key start
LH: loop header
LB: loop body
LE: loop exit
PB: predicated region body
PF: predicated region fallthrough
CT: control target
= control target key end

     0   :  { %v40_v0 = vmov 0   ;;  %s79_s1 = inlined_call_operand.vmem [shape: f32[6,1], index: 1, kind: input, shape index: {}]   ;;  %s80_s2 = inlined_call_operand.vmem [shape: f32[6,1], index: 2, kind: input, shape index: {}]   ;;  %s81_s0 = inlined_call_operand.vmem [shape: f32[6,256], index: 0, kind: input, shape index: {}]   ;;  %s82_s3 = inlined_call_operand.vmem [shape: f32[6,256], index: 3, kind: output, shape index: {}]  }
   0x1   :  { %39 = vset.pattern.permute.xlu0 %v40_v0  ;;  %v16_v1 = vld [vmem:[%s79_s1] sm:$0x3f]  ;;  %v15_v5 = vld [vmem:[%s81_s0 + $0x8] sm:$0x3f] }
   0x2   :  { %19 = vperm.xlu0 %39, %v16_v1   ;;  %v24_v2 = vld [vmem:[%s80_s2] sm:$0x3f] }
   0x3   :  { %v14_v4 = vld [vmem:[%s81_s0] sm:$0x3f] }
   0x6   :  { %27 = vperm.xlu0 %39, %v24_v2  }
  0x81   :  { %v20_v3 = vpop.permute.xlu0 %19 }
  0x82   :  { %v22_v6 = vsub.f32 %v14_v4, %v20_v3  ;;  %v23_v7 = vsub.f32 %v15_v5, %v20_v3 }
  0x85   :  { %v28_v8 = vpop.permute.xlu0 %27 }
  0x86   :  { %v30_v9 = vmul.f32 %v28_v8, %v22_v6  ;;  %v31_v10 = vmul.f32 %v28_v8, %v23_v7 }
  0x88   :  { %32 = vst [vmem:[%s82_s3] sm:$0x3f] %v30_v9  ;;  %33 = vst [vmem:[%s82_s3 + $0x8] sm:$0x3f] %v31_v10 }

// kernel: faster_rcnn_forward.10
= control target key start
LH: loop header
LB: loop body
LE: loop exit
PB: predicated region body
PF: predicated region fallthrough
CT: control target
= control target key end

     0   :  { %s1025_s12 = smov 0   ;;  %s1027_s13 = smov 0   ;;  %s1301_s0 = inlined_call_operand.vmem [shape: f32[512,16], index: 0, kind: input, shape index: {}]   ;;  %s1302_s1 = inlined_call_operand.vmem [shape: f32[16,15], index: 1, kind: input, shape index: {}]   ;;  %s1303_s2 = inlined_call_operand.vmem [shape: f32[1,15], index: 2, kind: input, shape index: {}]   ;;  %s1304_s3 = inlined_call_operand.vmem [shape: f32[512,15], index: 3, kind: output, shape index: {}]  }
   0x1   :  { %s1029_s14 = smov 0  }
   0x2 LB: > { %s32_s15 = sadd.s32 1, %s998_s13  ;;  %p878_p0 = scmp.ge.s32.totalorder %s1002_s14, 1  ;;  %s1002_s14 = sphi %s1029_s14, %s13_s14   ;;  %s998_s13 = sphi %s1027_s13, %s1307_s13   ;;  %s994_s12 = sphi %s1025_s12, %s1306_s12  }
   0x3   : > { %p34_p1 = scmp.ge.s32.totalorder %s32_s15, 2  ;;  %p188_p2 = scmp.lt.s32.totalorder %s1002_s14, 3 }
   0x5   : > { %s1309_s15 = smov (%p34_p1, %s32_s15), 0  ;;  %p189_p3 = pnand %p878_p0, %p188_p2 }
   0x6   : > { %v377_v0 = vld [vmem:[%s1302_s1] sm:$0xff] (!%p189_p3)  ;;  %v378_v1 = vld [vmem:[%s1302_s1 + $0x8] sm:$0xff] (!%p189_p3)  ;;  %s879_s20 = sshll.u32 (!%p189_p3), %s994_s12, 5  ;;  %vm264_vm0 = vcmask (!%p189_p3), 121856   ;;  %v1004_v3 = vmov (!%p189_p3), 0.0   ;;  %vm380_vm1 = vcmask (!%p189_p3), 130048  }
   0x7   : > { %192 = sbr.rel (%p189_p3) target bundleno = 277 (0x115), region = 32  ;;  %v379_v2 = vpack.c.bf16 (!%p189_p3), %v378_v1, %v377_v0  ;;  %p1054_p4 = scmp.lt.s32.totalorder (!%p189_p3), %s879_s20, 63  ;;  %267 = vst.msk [vmem:[#allocation2 + $0x10] sm:$0xff] (!%p189_p3), %vm264_vm0, %v1004_v3  ;;  %265 = vst.msk [vmem:[#allocation2] sm:$0xff] (!%p189_p3), %vm264_vm0, %v1004_v3 }
   0x8   : > { %266 = vst.msk [vmem:[#allocation2 + $0x8] sm:$0xff] (!%p189_p3), %vm264_vm0, %v1004_v3  ;;  %268 = vst.msk [vmem:[#allocation2 + $0x18] sm:$0xff] (!%p189_p3), %vm264_vm0, %v1004_v3 }
   0x9   : > { %269 = vst.msk [vmem:[#allocation2 + $0x20] sm:$0xff] (!%p189_p3), %vm264_vm0, %v1004_v3  ;;  %270 = vst.msk [vmem:[#allocation2 + $0x28] sm:$0xff] (!%p189_p3), %vm264_vm0, %v1004_v3  ;;  %919 = vmatprep.subr.bf16.mxu0 (!%p189_p3), %v379_v2  ;;  %953 = vmatprep.subr.bf16.mxu1 (!%p189_p3), %v379_v2 }
   0xa   : > { %271 = vst.msk [vmem:[#allocation2 + $0x30] sm:$0xff] (!%p189_p3), %vm264_vm0, %v1004_v3  ;;  %272 = vst.msk [vmem:[#allocation2 + $0x38] sm:$0xff] (!%p189_p3), %vm264_vm0, %v1004_v3  ;;  %920 = vmatpush3.bf16.msra.mxu0 (!%p189_p3), %v379_v2  ;;  %954 = vmatpush3.bf16.msra.mxu1 (!%p189_p3), %v379_v2 }
   0xb   : > { %273 = vst.msk [vmem:[#allocation2 + $0x40] sm:$0xff] (!%p189_p3), %vm264_vm0, %v1004_v3  ;;  %274 = vst.msk [vmem:[#allocation2 + $0x48] sm:$0xff] (!%p189_p3), %vm264_vm0, %v1004_v3 }
   0xc   : > { %275 = vst.msk [vmem:[#allocation2 + $0x50] sm:$0xff] (!%p189_p3), %vm264_vm0, %v1004_v3  ;;  %276 = vst.msk [vmem:[#allocation2 + $0x58] sm:$0xff] (!%p189_p3), %vm264_vm0, %v1004_v3 }
   0xd   : > { %277 = vst.msk [vmem:[#allocation2 + $0x60] sm:$0xff] (!%p189_p3), %vm264_vm0, %v1004_v3  ;;  %278 = vst.msk [vmem:[#allocation2 + $0x68] sm:$0xff] (!%p189_p3), %vm264_vm0, %v1004_v3 }
   0xe   : > { %279 = vst.msk [vmem:[#allocation2 + $0x70] sm:$0xff] %vm264_vm0, %v1004_v3  ;;  %280 = vst.msk [vmem:[#allocation2 + $0x78] sm:$0xff] %vm264_vm0, %v1004_v3  ;;  %s1311_s20 = smov (!%p1054_p4, %s879_s20), 63  ;;  %v299_v52 = vld [vmem:[#allocation2 + $0x10] sm:$0xff]  ;;  %v297_v54 = vld [vmem:[#allocation2] sm:$0xff] }
   0xf   : > { %281 = vst.msk [vmem:[#allocation2 + $0x80] sm:$0xff] %vm264_vm0, %v1004_v3  ;;  %282 = vst.msk [vmem:[#allocation2 + $0x88] sm:$0xff] %vm264_vm0, %v1004_v3  ;;  %s880_s22 = sshll.u32 %s1311_s20, 3  ;;  %v300_v57 = vld [vmem:[#allocation2 + $0x18] sm:$0xff]  ;;  %v298_v62 = vld [vmem:[#allocation2 + $0x8] sm:$0xff] }
  0x10   : > { %283 = vst.msk [vmem:[#allocation2 + $0x90] sm:$0xff] %vm264_vm0, %v1004_v3  ;;  %284 = vst.msk [vmem:[#allocation2 + $0x98] sm:$0xff] %vm264_vm0, %v1004_v3  ;;  %s1102_s25 = scalar_lea.vmem %s1301_s0, %s880_s22  ;;  %s1170_s30 = scalar_lea.vmem %s1304_s3, %s880_s22 }
  0x11   : > { %285 = vst.msk [vmem:[#allocation2 + $0xa0] sm:$0xff] %vm264_vm0, %v1004_v3  ;;  %286 = vst.msk [vmem:[#allocation2 + $0xa8] sm:$0xff] %vm264_vm0, %v1004_v3  ;;  %v329_v4 = vld [vmem:[%s1102_s25] sm:$0xff]  ;;  %v330_v5 = vld [vmem:[%s1102_s25 + $0x8] sm:$0xff] }
  0x12   : > { %287 = vst.msk [vmem:[#allocation2 + $0xb0] sm:$0xff] %vm264_vm0, %v1004_v3  ;;  %288 = vst.msk [vmem:[#allocation2 + $0xb8] sm:$0xff] %vm264_vm0, %v1004_v3  ;;  %v345_v6 = vld [vmem:[%s1102_s25 + $0x80] sm:$0xff]  ;;  %v361_v7 = vpack.c.bf16 %v330_v5, %v329_v4  ;;  %v346_v8 = vld [vmem:[%s1102_s25 + $0x88] sm:$0xff] }
  0x13   : > { %289 = vst.msk [vmem:[#allocation2 + $0xc0] sm:$0xff] %vm264_vm0, %v1004_v3  ;;  %290 = vst.msk [vmem:[#allocation2 + $0xc8] sm:$0xff] %vm264_vm0, %v1004_v3  ;;  %v331_v9 = vld [vmem:[%s1102_s25 + $0x10] sm:$0xff]  ;;  %v332_v10 = vld [vmem:[%s1102_s25 + $0x18] sm:$0xff]  ;;  %v369_v11 = vpack.c.bf16 %v346_v8, %v345_v6 }
  0x14   : > { %291 = vst.msk [vmem:[#allocation2 + $0xd0] sm:$0xff] %vm264_vm0, %v1004_v3  ;;  %292 = vst.msk [vmem:[#allocation2 + $0xd8] sm:$0xff] %vm264_vm0, %v1004_v3  ;;  %v362_v12 = vpack.c.bf16 %v332_v10, %v331_v9  ;;  %v347_v13 = vld [vmem:[%s1102_s25 + $0x90] sm:$0xff]  ;;  %v348_v14 = vld [vmem:[%s1102_s25 + $0x98] sm:$0xff]  ;;  %921 = vmatprep.mubr.msk.bf16.mxu0 %vm380_vm1, %v361_v7 }
  0x15   : > { %293 = vst.msk [vmem:[#allocation2 + $0xe0] sm:$0xff] %vm264_vm0, %v1004_v3  ;;  %294 = vst.msk [vmem:[#allocation2 + $0xe8] sm:$0xff] %vm264_vm0, %v1004_v3  ;;  %v333_v15 = vld [vmem:[%s1102_s25 + $0x20] sm:$0xff]  ;;  %v370_v16 = vpack.c.bf16 %v348_v14, %v347_v13  ;;  %v334_v17 = vld [vmem:[%s1102_s25 + $0x28] sm:$0xff]  ;;  %937 = vmatprep.mubr.msk.bf16.mxu1 %vm380_vm1, %v369_v11 }
  0x16   : > { %295 = vst.msk [vmem:[#allocation2 + $0xf0] sm:$0xff] %vm264_vm0, %v1004_v3  ;;  %296 = vst.msk [vmem:[#allocation2 + $0xf8] sm:$0xff] %vm264_vm0, %v1004_v3  ;;  %v349_v18 = vld [vmem:[%s1102_s25 + $0xa0] sm:$0xff]  ;;  %v350_v19 = vld [vmem:[%s1102_s25 + $0xa8] sm:$0xff]  ;;  %922 = vmatmul.mubr.msk.bf16.vlgmr.msra.gmra.mrb[0].mxu0 %vm380_vm1, %v362_v12  ;;  %v363_v20 = vpack.c.bf16 %v334_v17, %v333_v15 }
  0x17   : > { %v371_v21 = vpack.c.bf16 %v350_v19, %v349_v18  ;;  %938 = vmatmul.mubr.msk.bf16.vlgmr.msra.gmra.mrb[0].mxu1 %vm380_vm1, %v370_v16  ;;  %v335_v22 = vld [vmem:[%s1102_s25 + $0x30] sm:$0xff]  ;;  %v336_v23 = vld [vmem:[%s1102_s25 + $0x38] sm:$0xff]  ;;  %v337_v26 = vld [vmem:[%s1102_s25 + $0x40] sm:$0xff] }
  0x18   : > { %v351_v24 = vld [vmem:[%s1102_s25 + $0xb0] sm:$0xff]  ;;  %925 = vmatprep.mubr.msk.bf16.mxu0 %vm380_vm1, %v363_v20  ;;  %v352_v25 = vld [vmem:[%s1102_s25 + $0xb8] sm:$0xff]  ;;  %v338_v27 = vld [vmem:[%s1102_s25 + $0x48] sm:$0xff]  ;;  %v364_v30 = vpack.c.bf16 %v336_v23, %v335_v22 }
  0x19   : > { %941 = vmatprep.mubr.msk.bf16.mxu1 %vm380_vm1, %v371_v21  ;;  %v353_v28 = vld [vmem:[%s1102_s25 + $0xc0] sm:$0xff]  ;;  %v354_v29 = vld [vmem:[%s1102_s25 + $0xc8] sm:$0xff]  ;;  %v372_v31 = vpack.c.bf16 %v352_v25, %v351_v24  ;;  %v365_v32 = vpack.c.bf16 %v338_v27, %v337_v26  ;;  %v339_v34 = vld [vmem:[%s1102_s25 + $0x50] sm:$0xff] }
  0x1a   : > { %v373_v33 = vpack.c.bf16 %v354_v29, %v353_v28  ;;  %v340_v35 = vld [vmem:[%s1102_s25 + $0x58] sm:$0xff]  ;;  %v355_v36 = vld [vmem:[%s1102_s25 + $0xd0] sm:$0xff]  ;;  %v341_v38 = vld [vmem:[%s1102_s25 + $0x60] sm:$0xff] }
  0x1b   : > { %v356_v37 = vld [vmem:[%s1102_s25 + $0xd8] sm:$0xff]  ;;  %v342_v39 = vld [vmem:[%s1102_s25 + $0x68] sm:$0xff]  ;;  %v357_v40 = vld [vmem:[%s1102_s25 + $0xe0] sm:$0xff]  ;;  %v366_v42 = vpack.c.bf16 %v340_v35, %v339_v34 }
  0x1c   : > { %v358_v41 = vld [vmem:[%s1102_s25 + $0xe8] sm:$0xff]  ;;  %v374_v43 = vpack.c.bf16 %v356_v37, %v355_v36  ;;  %v367_v44 = vpack.c.bf16 %v342_v39, %v341_v38  ;;  %v343_v46 = vld [vmem:[%s1102_s25 + $0x70] sm:$0xff]  ;;  %v344_v47 = vld [vmem:[%s1102_s25 + $0x78] sm:$0xff] }
  0x1d   : > { %v375_v45 = vpack.c.bf16 %v358_v41, %v357_v40  ;;  %v359_v48 = vld [vmem:[%s1102_s25 + $0xf0] sm:$0xff]  ;;  %v360_v49 = vld [vmem:[%s1102_s25 + $0xf8] sm:$0xff]  ;;  %v368_v50 = vpack.c.bf16 %v344_v47, %v343_v46  ;;  %v313_v56 = vld [vmem:[#allocation2 + $0x80] sm:$0xff] }
  0x1e   : > { %926 = vmatmul.mubr.msk.bf16.gmra.mrb[4].mxu0 %vm380_vm1, %v364_v30  ;;  %v376_v51 = vpack.c.bf16 %v360_v49, %v359_v48  ;;  %v315_v53 = vld [vmem:[#allocation2 + $0x90] sm:$0xff]  ;;  %v316_v61 = vld [vmem:[#allocation2 + $0x98] sm:$0xff]  ;;  %v314_v3 = vld [vmem:[#allocation2 + $0x88] sm:$0xff] }
  0x1f   : > { %942 = vmatmul.mubr.msk.bf16.gmra.mrb[4].mxu1 %vm380_vm1, %v372_v31  ;;  %929 = vmatprep.mubr.msk.bf16.mxu0 %vm380_vm1, %v365_v32  ;;  %v303_v12 = vld [vmem:[#allocation2 + $0x30] sm:$0xff]  ;;  %v301_v14 = vld [vmem:[#allocation2 + $0x20] sm:$0xff]  ;;  %v304_v18 = vld [vmem:[#allocation2 + $0x38] sm:$0xff] }
  0x20   : > { %945 = vmatprep.mubr.msk.bf16.mxu1 %vm380_vm1, %v373_v33  ;;  %v319_v13 = vld [vmem:[#allocation2 + $0xb0] sm:$0xff]  ;;  %v1163_v15 = vld [vmem:[%s1303_s2] ss:$0 sm:$0xff]  ;;  %v320_v22 = vld [vmem:[#allocation2 + $0xb8] sm:$0xff] }
  0x21   : > { %v317_v17 = vld [vmem:[#allocation2 + $0xa0] sm:$0xff]  ;;  %v302_v23 = vld [vmem:[#allocation2 + $0x28] sm:$0xff] }
  0x22   : > { %v318_v29 = vld [vmem:[#allocation2 + $0xa8] sm:$0xff] }
  0x26   : > { %930 = vmatmul.mubr.msk.bf16.gmra.mrb[8].mxu0 %vm380_vm1, %v366_v42 }
  0x27   : > { %946 = vmatmul.mubr.msk.bf16.gmra.mrb[8].mxu1 %vm380_vm1, %v374_v43  ;;  %933 = vmatprep.mubr.msk.bf16.mxu0 %vm380_vm1, %v367_v44 }
  0x28   : > { %949 = vmatprep.mubr.msk.bf16.mxu1 %vm380_vm1, %v375_v45 }
  0x2e   : > { %934 = vmatmul.mubr.msk.bf16.gmra.mrb[12].mxu0 %vm380_vm1, %v368_v50 }
  0x2f   : > { %950 = vmatmul.mubr.msk.bf16.gmra.mrb[12].mxu1 %vm380_vm1, %v376_v51 }
  0xe9   : > { %v923_v55 = vpop.f32.mrb[0].mxu0 }
  0xea   : > { %v592_v58 = vadd.f32 %v923_v55, %v299_v52  ;;  %v939_v59 = vpop.f32.mrb[0].mxu1  ;;  %v463_v60 = vpop.f32.mrb[1].mxu0  ;;  %v307_v52 = vld [vmem:[#allocation2 + $0x50] sm:$0xff]  ;;  %v305_v55 = vld [vmem:[#allocation2 + $0x40] sm:$0xff] }
  0xeb   : > { %v608_v63 = vadd.f32 %v939_v59, %v315_v53  ;;  %v590_v0 = vadd.f32 %v463_v60, %v297_v54  ;;  %v527_v1 = vpop.f32.mrb[1].mxu1  ;;  %v924_v2 = vpop.f32.mrb[2].mxu0  ;;  %v323_v54 = vld [vmem:[#allocation2 + $0xd0] sm:$0xff] }
  0xec   : > { %625 = vst.msk [vmem:[#allocation2 + $0x10] sm:$0xff] %vm264_vm0, %v592_v58  ;;  %v606_v4 = vadd.f32 %v527_v1, %v313_v56  ;;  %v593_v5 = vadd.f32 %v924_v2, %v300_v57  ;;  %v940_v6 = vpop.f32.mrb[2].mxu1  ;;  %v466_v7 = vpop.f32.mrb[3].mxu0  ;;  %v321_v57 = vld [vmem:[#allocation2 + $0xc0] sm:$0xff]  ;;  %v308_v58 = vld [vmem:[#allocation2 + $0x58] sm:$0xff] }
  0xed   : > { %641 = vst.msk [vmem:[#allocation2 + $0x90] sm:$0xff] %vm264_vm0, %v608_v63  ;;  %623 = vst.msk [vmem:[#allocation2] sm:$0xff] %vm264_vm0, %v590_v0  ;;  %v609_v8 = vadd.f32 %v940_v6, %v316_v61  ;;  %v591_v9 = vadd.f32 %v466_v7, %v298_v62  ;;  %v530_v10 = vpop.f32.mrb[3].mxu1  ;;  %v324_v62 = vld [vmem:[#allocation2 + $0xd8] sm:$0xff]  ;;  %v306_v63 = vld [vmem:[#allocation2 + $0x48] sm:$0xff] }
  0xee   : > { %639 = vst.msk [vmem:[#allocation2 + $0x80] sm:$0xff] %vm264_vm0, %v606_v4  ;;  %626 = vst.msk [vmem:[#allocation2 + $0x18] sm:$0xff] %vm264_vm0, %v593_v5  ;;  %v607_v11 = vadd.f32 %v530_v10, %v314_v3  ;;  %v322_v5 = vld [vmem:[#allocation2 + $0xc8] sm:$0xff] }
  0xef   : > { %642 = vst.msk [vmem:[#allocation2 + $0x98] sm:$0xff] %vm264_vm0, %v609_v8  ;;  %624 = vst.msk [vmem:[#allocation2 + $0x8] sm:$0xff] %vm264_vm0, %v591_v9 }
  0xf0   : > { %640 = vst.msk [vmem:[#allocation2 + $0x88] sm:$0xff] %vm264_vm0, %v607_v11 }
  0xf1   : > { %v927_v16 = vpop.f32.mrb[4].mxu0 }
  0xf2   : > { %v596_v19 = vadd.f32 %v927_v16, %v303_v12  ;;  %v943_v20 = vpop.f32.mrb[4].mxu1  ;;  %v479_v21 = vpop.f32.mrb[5].mxu0 }
  0xf3   : > { %v660_v24 = vld [vmem:[#allocation2 + $0x10] sm:$0xff]  ;;  %v612_v25 = vadd.f32 %v943_v20, %v319_v13  ;;  %v594_v26 = vadd.f32 %v479_v21, %v301_v14  ;;  %v543_v27 = vpop.f32.mrb[5].mxu1  ;;  %v928_v28 = vpop.f32.mrb[6].mxu0 }
  0xf4   : > { %v699_v30 = vadd.f32 %v1163_v15, %v660_v24  ;;  %v676_v31 = vld [vmem:[#allocation2 + $0x90] sm:$0xff]  ;;  %v658_v32 = vld [vmem:[#allocation2] sm:$0xff]  ;;  %629 = vst.msk [vmem:[#allocation2 + $0x30] sm:$0xff] %vm264_vm0, %v596_v19  ;;  %v610_v33 = vadd.f32 %v543_v27, %v317_v17  ;;  %v597_v34 = vadd.f32 %v928_v28, %v304_v18  ;;  %v944_v35 = vpop.f32.mrb[6].mxu1  ;;  %v482_v36 = vpop.f32.mrb[7].mxu0 }
  0xf5   : > { %v715_v37 = vadd.f32 %v1163_v15, %v676_v31  ;;  %v697_v38 = vadd.f32 %v1163_v15, %v658_v32  ;;  %v674_v39 = vld [vmem:[#allocation2 + $0x80] sm:$0xff]  ;;  %v661_v40 = vld [vmem:[#allocation2 + $0x18] sm:$0xff]  ;;  %645 = vst.msk [vmem:[#allocation2 + $0xb0] sm:$0xff] %vm264_vm0, %v612_v25  ;;  %627 = vst.msk [vmem:[#allocation2 + $0x20] sm:$0xff] %vm264_vm0, %v594_v26  ;;  %v613_v41 = vadd.f32 %v944_v35, %v320_v22  ;;  %v546_v43 = vpop.f32.mrb[7].mxu1 }
  0xf6   : > { %v595_v42 = vadd.f32 %v482_v36, %v302_v23  ;;  %731 = vst.msk [vmem:[%s1170_s30 + $0x10] sm:$0xff] %vm264_vm0, %v699_v30  ;;  %v713_v44 = vadd.f32 %v1163_v15, %v674_v39  ;;  %v700_v45 = vadd.f32 %v1163_v15, %v661_v40  ;;  %v677_v46 = vld [vmem:[#allocation2 + $0x98] sm:$0xff]  ;;  %v659_v47 = vld [vmem:[#allocation2 + $0x8] sm:$0xff]  ;;  %643 = vst.msk [vmem:[#allocation2 + $0xa0] sm:$0xff] %vm264_vm0, %v610_v33 }
  0xf7   : > { %630 = vst.msk [vmem:[#allocation2 + $0x38] sm:$0xff] %vm264_vm0, %v597_v34  ;;  %v611_v48 = vadd.f32 %v546_v43, %v318_v29  ;;  %747 = vst.msk [vmem:[%s1170_s30 + $0x90] sm:$0xff] %vm264_vm0, %v715_v37  ;;  %v716_v49 = vadd.f32 %v1163_v15, %v677_v46  ;;  %v698_v50 = vadd.f32 %v1163_v15, %v659_v47  ;;  %v675_v51 = vld [vmem:[#allocation2 + $0x88] sm:$0xff]  ;;  %v311_v29 = vld [vmem:[#allocation2 + $0x70] sm:$0xff] }
  0xf8   : > { %729 = vst.msk [vmem:[%s1170_s30] sm:$0xff] %vm264_vm0, %v697_v38  ;;  %646 = vst.msk [vmem:[#allocation2 + $0xb8] sm:$0xff] %vm264_vm0, %v613_v41  ;;  %v714_v53 = vadd.f32 %v1163_v15, %v675_v51  ;;  %v327_v31 = vld [vmem:[#allocation2 + $0xf0] sm:$0xff]  ;;  %v309_v32 = vld [vmem:[#allocation2 + $0x60] sm:$0xff] }
  0xf9   : > { %628 = vst.msk [vmem:[#allocation2 + $0x28] sm:$0xff] %vm264_vm0, %v595_v42  ;;  %745 = vst.msk [vmem:[%s1170_s30 + $0x80] sm:$0xff] %vm264_vm0, %v713_v44  ;;  %v931_v56 = vpop.f32.mrb[8].mxu0  ;;  %v325_v34 = vld [vmem:[#allocation2 + $0xe0] sm:$0xff]  ;;  %v312_v35 = vld [vmem:[#allocation2 + $0x78] sm:$0xff] }
  0xfa   : > { %732 = vst.msk [vmem:[%s1170_s30 + $0x18] sm:$0xff] %vm264_vm0, %v700_v45  ;;  %644 = vst.msk [vmem:[#allocation2 + $0xa8] sm:$0xff] %vm264_vm0, %v611_v48  ;;  %v600_v59 = vadd.f32 %v931_v56, %v307_v52  ;;  %v947_v60 = vpop.f32.mrb[8].mxu1  ;;  %v495_v61 = vpop.f32.mrb[9].mxu0  ;;  %v328_v39 = vld [vmem:[#allocation2 + $0xf8] sm:$0xff]  ;;  %v310_v40 = vld [vmem:[#allocation2 + $0x68] sm:$0xff] }
  0xfb   : > { %748 = vst.msk [vmem:[%s1170_s30 + $0x98] sm:$0xff] %vm264_vm0, %v716_v49  ;;  %730 = vst.msk [vmem:[%s1170_s30 + $0x8] sm:$0xff] %vm264_vm0, %v698_v50  ;;  %v664_v0 = vld [vmem:[#allocation2 + $0x30] sm:$0xff]  ;;  %v616_v1 = vadd.f32 %v947_v60, %v323_v54  ;;  %v598_v2 = vadd.f32 %v495_v61, %v305_v55  ;;  %v559_v3 = vpop.f32.mrb[9].mxu1  ;;  %v932_v4 = vpop.f32.mrb[10].mxu0  ;;  %v326_v46 = vld [vmem:[#allocation2 + $0xe8] sm:$0xff] }
  0xfc   : > { %746 = vst.msk [vmem:[%s1170_s30 + $0x88] sm:$0xff] %vm264_vm0, %v714_v53  ;;  %v703_v6 = vadd.f32 %v1163_v15, %v664_v0  ;;  %v680_v7 = vld [vmem:[#allocation2 + $0xb0] sm:$0xff]  ;;  %v662_v8 = vld [vmem:[#allocation2 + $0x20] sm:$0xff]  ;;  %633 = vst.msk [vmem:[#allocation2 + $0x50] sm:$0xff] %vm264_vm0, %v600_v59  ;;  %v614_v9 = vadd.f32 %v559_v3, %v321_v57  ;;  %v601_v10 = vadd.f32 %v932_v4, %v308_v58  ;;  %v948_v11 = vpop.f32.mrb[10].mxu1  ;;  %v498_v12 = vpop.f32.mrb[11].mxu0 }
  0xfd   : > { %v719_v13 = vadd.f32 %v1163_v15, %v680_v7  ;;  %v701_v14 = vadd.f32 %v1163_v15, %v662_v8  ;;  %v678_v16 = vld [vmem:[#allocation2 + $0xa0] sm:$0xff]  ;;  %649 = vst.msk [vmem:[#allocation2 + $0xd0] sm:$0xff] %vm264_vm0, %v616_v1  ;;  %631 = vst.msk [vmem:[#allocation2 + $0x40] sm:$0xff] %vm264_vm0, %v598_v2  ;;  %v617_v18 = vadd.f32 %v948_v11, %v324_v62  ;;  %v562_v20 = vpop.f32.mrb[11].mxu1 }
  0xfe   : > { %v665_v17 = vld [vmem:[#allocation2 + $0x38] sm:$0xff]  ;;  %v599_v19 = vadd.f32 %v498_v12, %v306_v63  ;;  %735 = vst.msk [vmem:[%s1170_s30 + $0x30] sm:$0xff] %vm264_vm0, %v703_v6  ;;  %v717_v21 = vadd.f32 %v1163_v15, %v678_v16  ;;  %647 = vst.msk [vmem:[#allocation2 + $0xc0] sm:$0xff] %vm264_vm0, %v614_v9  ;;  %v615_v25 = vadd.f32 %v562_v20, %v322_v5 }
  0xff   : > { %v704_v22 = vadd.f32 %v1163_v15, %v665_v17  ;;  %v681_v23 = vld [vmem:[#allocation2 + $0xb8] sm:$0xff]  ;;  %634 = vst.msk [vmem:[#allocation2 + $0x58] sm:$0xff] %vm264_vm0, %v601_v10  ;;  %751 = vst.msk [vmem:[%s1170_s30 + $0xb0] sm:$0xff] %vm264_vm0, %v719_v13 }
 0x100   : > { %v663_v24 = vld [vmem:[#allocation2 + $0x28] sm:$0xff]  ;;  %733 = vst.msk [vmem:[%s1170_s30 + $0x20] sm:$0xff] %vm264_vm0, %v701_v14  ;;  %v720_v26 = vadd.f32 %v1163_v15, %v681_v23  ;;  %650 = vst.msk [vmem:[#allocation2 + $0xd8] sm:$0xff] %vm264_vm0, %v617_v18 }
 0x101   : > { %v702_v27 = vadd.f32 %v1163_v15, %v663_v24  ;;  %v679_v28 = vld [vmem:[#allocation2 + $0xa8] sm:$0xff]  ;;  %632 = vst.msk [vmem:[#allocation2 + $0x48] sm:$0xff] %vm264_vm0, %v599_v19  ;;  %749 = vst.msk [vmem:[%s1170_s30 + $0xa0] sm:$0xff] %vm264_vm0, %v717_v21  ;;  %v935_v33 = vpop.f32.mrb[12].mxu0 }
 0x102   : > { %736 = vst.msk [vmem:[%s1170_s30 + $0x38] sm:$0xff] %vm264_vm0, %v704_v22  ;;  %v718_v30 = vadd.f32 %v1163_v15, %v679_v28  ;;  %648 = vst.msk [vmem:[#allocation2 + $0xc8] sm:$0xff] %vm264_vm0, %v615_v25  ;;  %v604_v36 = vadd.f32 %v935_v33, %v311_v29  ;;  %v951_v37 = vpop.f32.mrb[12].mxu1  ;;  %v511_v38 = vpop.f32.mrb[13].mxu0 }
 0x103   : > { %752 = vst.msk [vmem:[%s1170_s30 + $0xb8] sm:$0xff] %vm264_vm0, %v720_v26  ;;  %734 = vst.msk [vmem:[%s1170_s30 + $0x28] sm:$0xff] %vm264_vm0, %v702_v27  ;;  %v668_v41 = vld [vmem:[#allocation2 + $0x50] sm:$0xff]  ;;  %v620_v42 = vadd.f32 %v951_v37, %v327_v31  ;;  %v602_v43 = vadd.f32 %v511_v38, %v309_v32  ;;  %v575_v44 = vpop.f32.mrb[13].mxu1  ;;  %v936_v45 = vpop.f32.mrb[14].mxu0 }
 0x104   : > { %750 = vst.msk [vmem:[%s1170_s30 + $0xa8] sm:$0xff] %vm264_vm0, %v718_v30  ;;  %v707_v47 = vadd.f32 %v1163_v15, %v668_v41  ;;  %v684_v48 = vld [vmem:[#allocation2 + $0xd0] sm:$0xff]  ;;  %v666_v49 = vld [vmem:[#allocation2 + $0x40] sm:$0xff]  ;;  %637 = vst.msk [vmem:[#allocation2 + $0x70] sm:$0xff] %vm264_vm0, %v604_v36  ;;  %v618_v50 = vadd.f32 %v575_v44, %v325_v34  ;;  %v605_v51 = vadd.f32 %v936_v45, %v312_v35  ;;  %v952_v52 = vpop.f32.mrb[14].mxu1  ;;  %v514_v53 = vpop.f32.mrb[15].mxu0 }
 0x105   : > { %v723_v54 = vadd.f32 %v1163_v15, %v684_v48  ;;  %v705_v55 = vadd.f32 %v1163_v15, %v666_v49  ;;  %v682_v56 = vld [vmem:[#allocation2 + $0xc0] sm:$0xff]  ;;  %653 = vst.msk [vmem:[#allocation2 + $0xf0] sm:$0xff] %vm264_vm0, %v620_v42  ;;  %635 = vst.msk [vmem:[#allocation2 + $0x60] sm:$0xff] %vm264_vm0, %v602_v43  ;;  %v621_v58 = vadd.f32 %v952_v52, %v328_v39  ;;  %v578_v60 = vpop.f32.mrb[15].mxu1 }
 0x106   : > { %v669_v57 = vld [vmem:[#allocation2 + $0x58] sm:$0xff]  ;;  %v603_v59 = vadd.f32 %v514_v53, %v310_v40  ;;  %739 = vst.msk [vmem:[%s1170_s30 + $0x50] sm:$0xff] %vm264_vm0, %v707_v47  ;;  %v721_v61 = vadd.f32 %v1163_v15, %v682_v56  ;;  %651 = vst.msk [vmem:[#allocation2 + $0xe0] sm:$0xff] %vm264_vm0, %v618_v50  ;;  %v619_v1 = vadd.f32 %v578_v60, %v326_v46 }
 0x107   : > { %v708_v62 = vadd.f32 %v1163_v15, %v669_v57  ;;  %v685_v63 = vld [vmem:[#allocation2 + $0xd8] sm:$0xff]  ;;  %638 = vst.msk [vmem:[#allocation2 + $0x78] sm:$0xff] %vm264_vm0, %v605_v51  ;;  %755 = vst.msk [vmem:[%s1170_s30 + $0xd0] sm:$0xff] %vm264_vm0, %v723_v54 }
 0x108   : > { %v667_v0 = vld [vmem:[#allocation2 + $0x48] sm:$0xff]  ;;  %737 = vst.msk [vmem:[%s1170_s30 + $0x40] sm:$0xff] %vm264_vm0, %v705_v55  ;;  %v724_v2 = vadd.f32 %v1163_v15, %v685_v63  ;;  %654 = vst.msk [vmem:[#allocation2 + $0xf8] sm:$0xff] %vm264_vm0, %v621_v58 }
 0x109   : > { %v706_v3 = vadd.f32 %v1163_v15, %v667_v0  ;;  %v683_v4 = vld [vmem:[#allocation2 + $0xc8] sm:$0xff]  ;;  %636 = vst.msk [vmem:[#allocation2 + $0x68] sm:$0xff] %vm264_vm0, %v603_v59  ;;  %753 = vst.msk [vmem:[%s1170_s30 + $0xc0] sm:$0xff] %vm264_vm0, %v721_v61 }
 0x10a   : > { %740 = vst.msk [vmem:[%s1170_s30 + $0x58] sm:$0xff] %vm264_vm0, %v708_v62  ;;  %v722_v5 = vadd.f32 %v1163_v15, %v683_v4  ;;  %652 = vst.msk [vmem:[#allocation2 + $0xe8] sm:$0xff] %vm264_vm0, %v619_v1 }
 0x10b   : > { %756 = vst.msk [vmem:[%s1170_s30 + $0xd8] sm:$0xff] %vm264_vm0, %v724_v2  ;;  %738 = vst.msk [vmem:[%s1170_s30 + $0x48] sm:$0xff] %vm264_vm0, %v706_v3  ;;  %v672_v6 = vld [vmem:[#allocation2 + $0x70] sm:$0xff] }
 0x10c   : > { %754 = vst.msk [vmem:[%s1170_s30 + $0xc8] sm:$0xff] %vm264_vm0, %v722_v5  ;;  %v711_v7 = vadd.f32 %v1163_v15, %v672_v6  ;;  %v688_v8 = vld [vmem:[#allocation2 + $0xf0] sm:$0xff]  ;;  %v670_v9 = vld [vmem:[#allocation2 + $0x60] sm:$0xff] }
 0x10d   : > { %v727_v10 = vadd.f32 %v1163_v15, %v688_v8  ;;  %v709_v11 = vadd.f32 %v1163_v15, %v670_v9  ;;  %v686_v12 = vld [vmem:[#allocation2 + $0xe0] sm:$0xff] }
 0x10e   : > { %v673_v13 = vld [vmem:[#allocation2 + $0x78] sm:$0xff]  ;;  %743 = vst.msk [vmem:[%s1170_s30 + $0x70] sm:$0xff] %vm264_vm0, %v711_v7  ;;  %v725_v14 = vadd.f32 %v1163_v15, %v686_v12 }
 0x10f   : > { %v712_v16 = vadd.f32 %v1163_v15, %v673_v13  ;;  %v689_v17 = vld [vmem:[#allocation2 + $0xf8] sm:$0xff]  ;;  %759 = vst.msk [vmem:[%s1170_s30 + $0xf0] sm:$0xff] %vm264_vm0, %v727_v10  ;;  %741 = vst.msk [vmem:[%s1170_s30 + $0x60] sm:$0xff] %vm264_vm0, %v709_v11 }
 0x110   : > { %v671_v18 = vld [vmem:[#allocation2 + $0x68] sm:$0xff]  ;;  %v728_v19 = vadd.f32 %v1163_v15, %v689_v17  ;;  %757 = vst.msk [vmem:[%s1170_s30 + $0xe0] sm:$0xff] %vm264_vm0, %v725_v14 }
 0x111   : > { %v710_v20 = vadd.f32 %v1163_v15, %v671_v18  ;;  %v687_v21 = vld [vmem:[#allocation2 + $0xe8] sm:$0xff]  ;;  %744 = vst.msk [vmem:[%s1170_s30 + $0x78] sm:$0xff] %vm264_vm0, %v712_v16 }
 0x112   : > { %v726_v22 = vadd.f32 %v1163_v15, %v687_v21  ;;  %760 = vst.msk [vmem:[%s1170_s30 + $0xf8] sm:$0xff] %vm264_vm0, %v728_v19 }
 0x113   : > { %742 = vst.msk [vmem:[%s1170_s30 + $0x68] sm:$0xff] %vm264_vm0, %v710_v20 }
 0x114   : > { %758 = vst.msk [vmem:[%s1170_s30 + $0xe8] sm:$0xff] %vm264_vm0, %v726_v22 }
 0x115 PF: > { %s13_s14 = sadd.s32 1, %s1002_s14   ;;  %s1306_s12 = smov %s998_s13 }
 0x116   : > { %p10_p5 = scmp.ge.s32.totalorder %s13_s14, 4   ;;  %s1307_s13 = smov %s1309_s15 }
 0x118   :  { %12 = sbr.rel (!%p10_p5) target bundleno = 2 (0x2), region = 76 }

// kernel: faster_rcnn_forward.8
= control target key start
LH: loop header
LB: loop body
LE: loop exit
PB: predicated region body
PF: predicated region fallthrough
CT: control target
= control target key end

     0   :  { %s3561_s12 = smov 0   ;;  %s4506_s0 = inlined_call_operand.vmem [shape: f32[2,18,18,3], index: 0, kind: input, shape index: {}]   ;;  %s4507_s1 = inlined_call_operand.vmem [shape: f32[9,3,16], index: 1, kind: input, shape index: {}]   ;;  %s4508_s2 = inlined_call_operand.vmem [shape: f32[1,16], index: 2, kind: input, shape index: {}]   ;;  %s4509_s3 = inlined_call_operand.vmem [shape: f32[512,16], index: 3, kind: output, shape index: {}]  }
   0x1 LB: > { %s3567_s13 = sadd.s32 4294967295, %s3538_s12   ;;  %p2646_p0 = scmp.ge.s32.totalorder %s3538_s12, 1  ;;  %s3538_s12 = sphi %s3561_s12, %s13_s12  }
   0x2   : > { %p137_p1 = scmp.lt.s32.totalorder %s3538_s12, 3 }
   0x4   : > { %p138_p2 = pnand %p2646_p0, %p137_p1 }
   0x6   : > { %141 = sbr.rel (%p138_p2) target bundleno = 532 (0x214), region = 32 }
   0xd   : > { %v2650_v0 = vld [vmem:[%s4507_s1 + $0x4] sm:$0x7]  ;;  %vm474_vm0 = vcmask 1040384   ;;  %vm475_vm1 = vcmask 1041408   ;;  %p161_p3 = scmp.lt.s32.totalorder %s3567_s13, 1  ;;  %v3540_v2 = vmov 65535  }
   0xe   : > { %v424_v1 = vpack.c.bf16 %v2650_v0, %v2650_v0  ;;  %v476_v3 = vsel %vm474_vm0, 4294967295, %v3540_v2  ;;  %v2717_v4 = vld [vmem:[%s4507_s1 + $0x10] sm:$0x7]  ;;  %v243_v7 = vld [vmem:[%s4507_s1] sm:$0x7]  ;;  %vm293_vm2 = vcmask 1046528  }
   0xf   : > { %v3578_v5 = vsel %vm475_vm1, %v476_v3, 0  ;;  %v1446_v6 = vpack.c.bf16 %v2717_v4, %v2717_v4  ;;  %s162_s18 = scalar_select %p161_p3, %s3567_s13, 1  ;;  %v2734_v8 = vld [vmem:[%s4507_s1 + $0x14] sm:$0x7]  ;;  %v244_v10 = vpack.c.bf16 %v243_v7, %v243_v7  ;;  %v2751_v15 = vld [vmem:[%s4507_s1 + $0x18] sm:$0x7] }
  0x10   : > { %v479_v9 = vand.u32 %v3578_v5, %v424_v1  ;;  %v1656_v11 = vpack.c.bf16 %v2734_v8, %v2734_v8  ;;  %v2683_v16 = vld [vmem:[%s4507_s1 + $0x8] sm:$0x7]  ;;  %vm425_vm3 = vcmask 23552   ;;  %v1859_v29 = vpack.c.bf16 %v2751_v15, %v2751_v15  ;;  %s2648_s10 = sshll.u32 %s3567_s13, 5 }
  0x11   : > { %v3589_v12 = vand.u32 %v1446_v6, %v3578_v5  ;;  %s3522_s23 = smul.u32 432, %s162_s18  ;;  %v691_v13 = vand.u32 %v3578_v5, %v244_v10  ;;  %v985_v30 = vpack.c.bf16 %v2683_v16, %v2683_v16  ;;  %vm854_vm4 = vcmask 1045504   ;;  %p167_p4 = scmp.lt.s32.totalorder %s2648_s10, 63 }
  0x12   : > { %2958 = vmatprep.subr.bf16.mxu1 %v479_v9  ;;  %v3593_v14 = vand.u32 %v1656_v11, %v3578_v5  ;;  %v3688_v57 = vand.u32 %v1859_v29, %v3578_v5  ;;  %vm2553_vm5 = vcmask 130048  }
  0x13   : > { %4536 = vst [vmem:[#allocation2_spill] sm:$0xff] %v3589_v12  ;;  %3094 = vmatprep.subr.bf16.mxu0 %v3589_v12  ;;  %2959 = vmatpush3.bf16.msra.mxu1 %v479_v9  ;;  %s3599_s26 = scalar_lea.vmem %s4506_s0, %s3522_s23  ;;  %v3676_v51 = vand.u32 %v985_v30, %v3578_v5  ;;  %s4571_s10 = smov (!%p167_p4, %s2648_s10), 63 }
  0x14   : > { %3095 = vmatpush3.bf16.msra.mxu0 %v3589_v12  ;;  %v3609_v17 = vld [vmem:[%s3599_s26] sm:$0xff]  ;;  %v3612_v18 = vld [vmem:[%s3599_s26 + $0x8] sm:$0xff]  ;;  %v3615_v19 = vld [vmem:[%s3599_s26 + $0x10] sm:$0x3]  ;;  %2992 = vmatprep.subr.bf16.mxu1 %v691_v13  ;;  %s2649_s15 = sshll.u32 %s4571_s10, 3 }
  0x15   : > { %v294_v20 = vrot.slane %v3609_v17, 1  ;;  %v295_v21 = vrot.slane %v3612_v18, 1  ;;  %v297_v22 = vrot.slane %v3615_v19, 1  ;;  %v3621_v23 = vld [vmem:[%s3599_s26 + $0x18] sm:$0xff]  ;;  %v3624_v24 = vld [vmem:[%s3599_s26 + $0x20] sm:$0xff]  ;;  %3128 = vmatprep.subr.bf16.mxu0 %v3593_v14  ;;  %v3636_v28 = vld [vmem:[%s3599_s26 + $0x30] sm:$0xff]  ;;  %s4402_s17 = scalar_lea.vmem %s4509_s3, %s2649_s15 }
  0x16   : > { %v3628_v25 = vld [vmem:[%s3599_s26 + $0x28] sm:$0x3]  ;;  %v3632_v26 = vpack.c.bf16 %v3624_v24, %v3621_v23  ;;  %v299_v27 = vrot.slane %v3621_v23, 1  ;;  %v300_v33 = vrot.slane %v3624_v24, 1  ;;  %v3643_v35 = vld [vmem:[%s3599_s26 + $0x38] sm:$0xff]  ;;  %v3652_v39 = vld [vmem:[%s3599_s26 + $0x50] sm:$0xff] }
  0x17   : > { %v296_v31 = vsel %vm293_vm2, %v294_v20, %v295_v21  ;;  %v298_v32 = vsel %vm293_vm2, %v295_v21, %v297_v22  ;;  %v302_v34 = vrot.slane %v3628_v25, 1  ;;  %v3646_v36 = vld [vmem:[%s3599_s26 + $0x40] sm:$0x3]  ;;  %v3649_v38 = vld [vmem:[%s3599_s26 + $0x48] sm:$0xff]  ;;  %v304_v42 = vrot.slane %v3636_v28, 1  ;;  %v3673_v50 = vld [vmem:[%s3599_s26 + $0x78] sm:$0xff] }
  0x18   : > { %v406_v37 = vpack.c.bf16 %v298_v32, %v296_v31  ;;  %v301_v40 = vsel %vm293_vm2, %v299_v27, %v300_v33  ;;  %v305_v43 = vrot.slane %v3643_v35, 1  ;;  %v3659_v44 = vld [vmem:[%s3599_s26 + $0x58] sm:$0x3]  ;;  %v3662_v45 = vld [vmem:[%s3599_s26 + $0x60] sm:$0xff]  ;;  %v3665_v46 = vld [vmem:[%s3599_s26 + $0x68] sm:$0xff]  ;;  %v307_v48 = vrot.slane %v3646_v36, 1 }
  0x19   : > { %v303_v41 = vsel %vm293_vm2, %v300_v33, %v302_v34  ;;  %v3670_v49 = vld [vmem:[%s3599_s26 + $0x70] sm:$0x3]  ;;  %v309_v53 = vrot.slane %v3649_v38, 1  ;;  %v310_v54 = vrot.slane %v3652_v39, 1  ;;  %v3682_v55 = vld [vmem:[%s3599_s26 + $0x80] sm:$0xff]  ;;  %v312_v59 = vrot.slane %v3659_v44, 1 }
  0x1a   : > { %2960 = vmatprep.mubr.msk.bf16.mxu1 %vm425_vm3, %v406_v37  ;;  %v407_v47 = vpack.c.bf16 %v303_v41, %v301_v40  ;;  %v306_v52 = vsel %vm293_vm2, %v304_v42, %v305_v43  ;;  %v3685_v56 = vld [vmem:[%s3599_s26 + $0x88] sm:$0x3]  ;;  %v308_v58 = vsel %vm293_vm2, %v305_v43, %v307_v48  ;;  %v314_v60 = vrot.slane %v3662_v45, 1  ;;  %v3719_v11 = vld [vmem:[%s3599_s26 + $0x90] sm:$0xff]  ;;  %v3725_v15 = vld [vmem:[%s3599_s26 + $0xa0] sm:$0x3] }
  0x1b   : > { %v315_v61 = vrot.slane %v3665_v46, 1  ;;  %v3696_v62 = vpack.c.bf16 %v308_v58, %v306_v52  ;;  %v311_v63 = vsel %vm293_vm2, %v309_v53, %v310_v54  ;;  %v317_v0 = vrot.slane %v3670_v49, 1  ;;  %v3732_v16 = vld [vmem:[%s3599_s26 + $0xb0] sm:$0xff]  ;;  %v3735_v20 = vld [vmem:[%s3599_s26 + $0xb8] sm:$0x3]  ;;  %v3758_v40 = vld [vmem:[%s3599_s26 + $0xc0] sm:$0xff] }
  0x1c   : > { %3096 = vmatprep.mubr.msk.bf16.mxu0 %vm425_vm3, %v407_v47  ;;  %2961 = vmatmul.mubr.msk.bf16.vlgmr.msra.gmra.mrb[0].mxu1 %vm425_vm3, %v407_v47  ;;  %v319_v1 = vrot.slane %v3673_v50, 1  ;;  %v313_v2 = vsel %vm293_vm2, %v310_v54, %v312_v59  ;;  %v320_v3 = vrot.slane %v3682_v55, 1  ;;  %v322_v4 = vrot.slane %v3685_v56, 1  ;;  %v3761_v41 = vld [vmem:[%s3599_s26 + $0xc8] sm:$0xff]  ;;  %v3766_v47 = vld [vmem:[%s3599_s26 + $0xd0] sm:$0x3] }
  0x1d   : > { %2993 = vmatpush3.bf16.msra.mxu1 %v691_v13  ;;  %4537 = vst [vmem:[#allocation3_spill] sm:$0xff] %v3696_v62  ;;  %3097 = vmatmul.mubr.msk.bf16.vlgmr.msra.gmra.mrb[0].mxu0 %vm425_vm3, %v3696_v62  ;;  %v3709_v6 = vpack.c.bf16 %v313_v2, %v311_v63  ;;  %v316_v7 = vsel %vm293_vm2, %v314_v60, %v315_v61  ;;  %v3722_v13 = vld [vmem:[%s3599_s26 + $0x98] sm:$0xff]  ;;  %v324_v27 = vrot.slane %v3719_v11, 1  ;;  %v327_v30 = vrot.slane %v3725_v15, 1 }
  0x1e   : > { %3026 = vmatprep.subr.bf16.mxu1 %v3676_v51  ;;  %2964 = vmatprep.mubr.msk.bf16.mxu1 %vm425_vm3, %v3696_v62  ;;  %v318_v8 = vsel %vm293_vm2, %v315_v61, %v317_v0  ;;  %v321_v9 = vsel %vm293_vm2, %v319_v1, %v320_v3  ;;  %v323_v10 = vsel %vm293_vm2, %v320_v3, %v322_v4  ;;  %v325_v29 = vrot.slane %v3722_v13, 1  ;;  %v3789_v61 = vld [vmem:[%s3599_s26 + $0xe8] sm:$0x3]  ;;  %v3794_v1 = vld [vmem:[%s3599_s26 + $0xf0] sm:$0xff]  ;;  %v3797_v2 = vld [vmem:[%s3599_s26 + $0xf8] sm:$0xff] }
  0x1f   : > { %4538 = vst [vmem:[#allocation4_spill] sm:$0xff] %v3709_v6  ;;  %3129 = vmatpush3.bf16.msra.mxu0 %v3593_v14  ;;  %3100 = vmatprep.mubr.msk.bf16.mxu0 %vm425_vm3, %v3709_v6  ;;  %v3729_v14 = vld [vmem:[%s3599_s26 + $0xa8] sm:$0xff]  ;;  %v3737_v21 = vpack.c.bf16 %v318_v8, %v316_v7  ;;  %v3741_v22 = vpack.c.bf16 %v323_v10, %v321_v9  ;;  %v330_v32 = vrot.slane %v3732_v16, 1  ;;  %v332_v33 = vrot.slane %v3735_v20, 1  ;;  %v3806_v9 = vld [vmem:[%s3599_s26 + $0x100] sm:$0x3] }
  0x20   : > { %3162 = vmatprep.subr.bf16.mxu0 %v3688_v57  ;;  %v329_v31 = vrot.slane %v3729_v14, 1  ;;  %v326_v34 = vsel %vm293_vm2, %v324_v27, %v325_v29  ;;  %v328_v37 = vsel %vm293_vm2, %v325_v29, %v327_v30  ;;  %v860_v48 = vrot.slane %v3621_v23, 2  ;;  %v3878_v62 = vld [vmem:[%s3599_s26 + $0x138] sm:$0xff] }
  0x21   : > { %4539 = vst [vmem:[#allocation5_spill] sm:$0xff] %v3737_v21  ;;  %4540 = vst [vmem:[#allocation6_spill] sm:$0xff] %v3741_v22  ;;  %v333_v43 = vsel %vm293_vm2, %v330_v32, %v332_v33  ;;  %v861_v52 = vrot.slane %v3624_v24, 2  ;;  %v863_v53 = vrot.slane %v3628_v25, 2  ;;  %v3771_v54 = vpack.c.bf16 %v328_v37, %v326_v34  ;;  %v3783_v24 = vld [vmem:[%s3599_s26 + $0xd8] sm:$0xff]  ;;  %v3786_v25 = vld [vmem:[%s3599_s26 + $0xe0] sm:$0xff] }
  0x22   : > { %v331_v42 = vsel %vm293_vm2, %v329_v31, %v330_v32  ;;  %v334_v58 = vrot.slane %v3758_v40, 1  ;;  %v335_v59 = vrot.slane %v3761_v41, 1  ;;  %v337_v23 = vrot.slane %v3766_v47, 1  ;;  %v3822_v37 = vld [vmem:[%s3599_s26 + $0x108] sm:$0xff] }
  0x23   : > { %4541 = vst [vmem:[#allocation7_spill] sm:$0xff] %v3771_v54  ;;  %v3777_v60 = vpack.c.bf16 %v333_v43, %v331_v42  ;;  %v865_v63 = vrot.slane %v3636_v28, 2  ;;  %v866_v0 = vrot.slane %v3643_v35, 2  ;;  %v868_v3 = vrot.slane %v3646_v36, 2  ;;  %v3825_v42 = vld [vmem:[%s3599_s26 + $0x110] sm:$0xff] }
  0x24   : > { %2965 = vmatmul.mubr.msk.bf16.gmra.mrb[4].mxu1 %vm425_vm3, %v3709_v6  ;;  %v336_v4 = vsel %vm293_vm2, %v334_v58, %v335_v59  ;;  %v862_v7 = vsel %vm854_vm4, %v860_v48, %v861_v52  ;;  %v864_v8 = vsel %vm854_vm4, %v861_v52, %v863_v53  ;;  %v338_v10 = vsel %vm293_vm2, %v335_v59, %v337_v23  ;;  %v3828_v43 = vld [vmem:[%s3599_s26 + $0x118] sm:$0x3]  ;;  %v3837_v59 = vld [vmem:[%s3599_s26 + $0x120] sm:$0xff]  ;;  %v2768_v23 = vld [vmem:[%s4507_s1 + $0x1c] sm:$0x7] }
  0x25   : > { %2968 = vmatprep.mubr.msk.bf16.mxu1 %vm425_vm3, %v3737_v21  ;;  %3101 = vmatmul.mubr.msk.bf16.gmra.mrb[4].mxu0 %vm425_vm3, %v3737_v21  ;;  %4542 = vst [vmem:[#allocation8_spill] sm:$0xff] %v3777_v60  ;;  %v339_v36 = vrot.slane %v3783_v24, 1  ;;  %v340_v27 = vrot.slane %v3786_v25, 1  ;;  %v342_v29 = vrot.slane %v3789_v61, 1  ;;  %v344_v30 = vrot.slane %v3794_v1, 1 }
  0x26   : > { %3104 = vmatprep.mubr.msk.bf16.mxu0 %vm425_vm3, %v3741_v22  ;;  %v345_v31 = vrot.slane %v3797_v2, 1  ;;  %v347_v32 = vrot.slane %v3806_v9, 1  ;;  %v3817_v33 = vpack.c.bf16 %v338_v10, %v336_v4  ;;  %v3819_v34 = vpack.c.bf16 %v864_v8, %v862_v7 }
  0x27   : > { %v341_v48 = vsel %vm293_vm2, %v339_v36, %v340_v27  ;;  %v343_v52 = vsel %vm293_vm2, %v340_v27, %v342_v29  ;;  %v867_v53 = vsel %vm854_vm4, %v865_v63, %v866_v0  ;;  %v869_v58 = vsel %vm854_vm4, %v866_v0, %v868_v3  ;;  %v3849_v63 = vld [vmem:[%s3599_s26 + $0x128] sm:$0xff]  ;;  %v3852_v0 = vld [vmem:[%s3599_s26 + $0x130] sm:$0x3] }
  0x28   : > { %4543 = vst [vmem:[#allocation9_spill] sm:$0xff] %v3817_v33  ;;  %4544 = vst [vmem:[#allocation10_spill] sm:$0xff] %v3819_v34  ;;  %v346_v4 = vsel %vm293_vm2, %v344_v30, %v345_v31  ;;  %v870_v7 = vrot.slane %v3649_v38, 2  ;;  %v871_v8 = vrot.slane %v3652_v39, 2  ;;  %v873_v10 = vrot.slane %v3659_v44, 2 }
  0x29   : > { %v348_v3 = vsel %vm293_vm2, %v345_v31, %v347_v32  ;;  %v349_v36 = vrot.slane %v3822_v37, 1  ;;  %v350_v27 = vrot.slane %v3825_v42, 1  ;;  %v352_v29 = vrot.slane %v3828_v43, 1 }
  0x2a   : > { %v2072_v30 = vpack.c.bf16 %v2768_v23, %v2768_v23  ;;  %v3862_v44 = vpack.c.bf16 %v343_v52, %v341_v48  ;;  %v355_v31 = vrot.slane %v3849_v63, 1  ;;  %v357_v32 = vrot.slane %v3852_v0, 1 }
  0x2b   : > { %v874_v23 = vsel %vm854_vm4, %v871_v8, %v873_v10  ;;  %v351_v21 = vsel %vm293_vm2, %v349_v36, %v350_v27  ;;  %v353_v48 = vsel %vm293_vm2, %v350_v27, %v352_v29  ;;  %v875_v52 = vrot.slane %v3662_v45, 2 }
  0x2c   : > { %2969 = vmatmul.mubr.msk.bf16.gmra.mrb[8].mxu1 %vm425_vm3, %v3741_v22  ;;  %4545 = vst [vmem:[#allocation11_spill] sm:$0xff] %v3862_v44  ;;  %v3869_v22 = vpack.c.bf16 %v348_v3, %v346_v4  ;;  %v876_v6 = vrot.slane %v3665_v46, 2  ;;  %v880_v4 = vrot.slane %v3673_v50, 2  ;;  %v3891_v10 = vpack.c.bf16 %v3643_v35, %v3636_v28  ;;  %v3905_v28 = vld [vmem:[%s3599_s26 + $0x150] sm:$0xff]  ;;  %v3908_v35 = vld [vmem:[%s3599_s26 + $0x158] sm:$0xff] }
  0x2d   : > { %2972 = vmatprep.mubr.msk.bf16.mxu1 %vm425_vm3, %v3771_v54  ;;  %3105 = vmatmul.mubr.msk.bf16.gmra.mrb[8].mxu0 %vm425_vm3, %v3771_v54  ;;  %v3867_v54 = vpack.c.bf16 %v869_v58, %v867_v53  ;;  %v3881_v53 = vld [vmem:[%s3599_s26 + $0x140] sm:$0xff]  ;;  %v878_v58 = vrot.slane %v3670_v49, 2  ;;  %v358_v27 = vsel %vm293_vm2, %v355_v31, %v357_v32  ;;  %v883_v49 = vrot.slane %v3685_v56, 2 }
  0x2e   : > { %3108 = vmatprep.mubr.msk.bf16.mxu0 %vm425_vm3, %v3777_v60  ;;  %4547 = vst [vmem:[#allocation13_spill] sm:$0xff] %v3869_v22  ;;  %v359_v29 = vrot.slane %v3878_v62, 1  ;;  %v360_v12 = vrot.slane %v3881_v53, 1  ;;  %v877_v56 = vsel %vm854_vm4, %v875_v52, %v876_v6  ;;  %v3922_v32 = vpack.c.bf16 %v3652_v39, %v3649_v38 }
  0x2f   : > { %4546 = vst [vmem:[#allocation12_spill] sm:$0xff] %v3867_v54  ;;  %v364_v39 = vrot.slane %v3905_v28, 1 }
  0x30   : > { %v361_v52 = vsel %vm293_vm2, %v359_v29, %v360_v12 }
  0x34   : > { %2973 = vmatmul.mubr.msk.bf16.gmra.mrb[12].mxu1 %vm425_vm3, %v3777_v60  ;;  %v354_v60 = vrot.slane %v3837_v59, 1 }
  0x35   : > { %2976 = vmatprep.mubr.msk.bf16.mxu1 %vm425_vm3, %v3817_v33  ;;  %3109 = vmatmul.mubr.msk.bf16.gmra.mrb[12].mxu0 %vm425_vm3, %v3817_v33  ;;  %v872_v33 = vsel %vm854_vm4, %v870_v7, %v871_v8  ;;  %v881_v7 = vrot.slane %v3682_v55, 2  ;;  %v3887_v8 = vld [vmem:[%s3599_s26 + $0x148] sm:$0x3] }
  0x36   : > { %3130 = vmatprep.mubr.msk.bf16.mxu0 %vm425_vm3, %v3819_v34  ;;  %v3895_v3 = vpack.c.bf16 %v874_v23, %v872_v33  ;;  %v356_v36 = vsel %vm293_vm2, %v354_v60, %v355_v31  ;;  %v3914_v33 = vand.u32 %v2072_v30, %v3578_v5  ;;  %v3916_v60 = vpack.c.bf16 %v353_v48, %v351_v21 }
  0x37   : > { %v362_v31 = vrot.slane %v3887_v8, 1  ;;  %v879_v23 = vsel %vm854_vm4, %v876_v6, %v878_v58  ;;  %v882_v30 = vsel %vm854_vm4, %v880_v4, %v881_v7  ;;  %v3932_v21 = vpack.c.bf16 %v3665_v46, %v3662_v45 }
  0x38   : > { %4548 = vst [vmem:[#allocation14_spill] sm:$0xff] %v3895_v3  ;;  %4549 = vst [vmem:[#allocation15_spill] sm:$0xff] %v3916_v60  ;;  %v884_v38 = vsel %vm854_vm4, %v881_v7, %v883_v49  ;;  %v365_v6 = vrot.slane %v3908_v35, 1  ;;  %v885_v58 = vrot.slane %v3719_v11, 2  ;;  %v886_v45 = vrot.slane %v3722_v13, 2 }
  0x39   : > { %v3946_v46 = vpack.c.bf16 %v3682_v55, %v3673_v50  ;;  %v888_v4 = vrot.slane %v3725_v15, 2  ;;  %v890_v7 = vrot.slane %v3729_v14, 2  ;;  %v3954_v49 = vpack.c.bf16 %v879_v23, %v877_v56  ;;  %v3974_v56 = vld [vmem:[%s3599_s26 + $0x178] sm:$0x3] }
  0x3a   : > { %v3956_v29 = vpack.c.bf16 %v884_v38, %v882_v30  ;;  %v3963_v50 = vpack.c.bf16 %v3722_v13, %v3719_v11  ;;  %v893_v15 = vrot.slane %v3735_v20, 2  ;;  %v3978_v23 = vpack.c.bf16 %v3732_v16, %v3729_v14 }
  0x3b   : > { %4551 = vst [vmem:[#allocation17_spill] sm:$0xff] %v3954_v49  ;;  %v856_v11 = vrot.slane %v3612_v18, 2  ;;  %v858_v13 = vrot.slane %v3615_v19, 2  ;;  %v887_v38 = vsel %vm854_vm4, %v885_v58, %v886_v45  ;;  %v889_v20 = vsel %vm854_vm4, %v886_v45, %v888_v4 }
  0x3c   : > { %2977 = vmatmul.mubr.msk.bf16.gmra.mrb[16].mxu1 %vm425_vm3, %v3862_v44  ;;  %v3911_v44 = vld [vmem:[%s3599_s26 + $0x160] sm:$0x3]  ;;  %4552 = vst [vmem:[#allocation18_spill] sm:$0xff] %v3956_v29  ;;  %v3992_v14 = vpack.c.bf16 %v3761_v41, %v3758_v40  ;;  %v4009_v45 = vpack.c.bf16 %v3797_v2, %v3794_v1  ;;  %v4017_v4 = vpack.c.bf16 %v3849_v63, %v3837_v59  ;;  %v898_v34 = vrot.slane %v3766_v47, 2 }
  0x3d   : > { %2980 = vmatprep.mubr.msk.bf16.mxu1 %vm425_vm3, %v3869_v22  ;;  %3131 = vmatmul.mubr.msk.bf16.vlgmr.msra.gmra.mrb[0].mxu0 %vm425_vm3, %v3867_v54  ;;  %v3927_v22 = vpack.c.bf16 %v358_v27, %v356_v36  ;;  %v367_v48 = vrot.slane %v3911_v44, 1  ;;  %v891_v36 = vrot.slane %v3732_v16, 2  ;;  %v855_v27 = vrot.slane %v3609_v17, 2 }
  0x3e   : > { %3163 = vmatpush3.bf16.msra.mxu0 %v3688_v57  ;;  %3134 = vmatprep.mubr.msk.bf16.mxu0 %vm425_vm3, %v3895_v3  ;;  %v363_v57 = vsel %vm293_vm2, %v360_v12, %v362_v31  ;;  %v3959_v3 = vld [vmem:[%s3599_s26 + $0x168] sm:$0xff]  ;;  %v366_v12 = vsel %vm293_vm2, %v364_v39, %v365_v6  ;;  %v3971_v31 = vld [vmem:[%s3599_s26 + $0x170] sm:$0xff] }
  0x3f   : > { %4550 = vst [vmem:[#allocation16_spill] sm:$0xff] %v3927_v22  ;;  %3196 = vmatprep.subr.bf16.mxu0 %v3914_v33  ;;  %v368_v55 = vsel %vm293_vm2, %v365_v6, %v367_v48  ;;  %v3984_v30 = vpack.c.bf16 %v363_v57, %v361_v52  ;;  %v892_v39 = vsel %vm854_vm4, %v890_v7, %v891_v36  ;;  %v369_v6 = vrot.slane %v3959_v3, 1 }
  0x40   : > { %v3996_v19 = vpack.c.bf16 %v368_v55, %v366_v12  ;;  %v370_v16 = vrot.slane %v3971_v31, 1  ;;  %v372_v48 = vrot.slane %v3974_v56, 1  ;;  %v4002_v52 = vpack.c.bf16 %v3786_v25, %v3783_v24 }
  0x41   : > { %v894_v58 = vsel %vm854_vm4, %v891_v36, %v893_v15  ;;  %v4013_v57 = vpack.c.bf16 %v3825_v42, %v3822_v37  ;;  %v4021_v7 = vpack.c.bf16 %v3881_v53, %v3878_v62  ;;  %v4025_v12 = vpack.c.bf16 %v3908_v35, %v3905_v28 }
  0x42   : > { %v4029_v36 = vpack.c.bf16 %v3971_v31, %v3959_v3  ;;  %v4032_v55 = vsel %vm854_vm4, %v855_v27, %v856_v11  ;;  %v4035_v15 = vsel %vm854_vm4, %v856_v11, %v858_v13  ;;  %v371_v54 = vsel %vm293_vm2, %v369_v6, %v370_v16  ;;  %v2700_v6 = vld [vmem:[%s4507_s1 + $0xc] sm:$0x7] }
  0x43   : > { %v896_v27 = vrot.slane %v3761_v41, 2  ;;  %v373_v11 = vsel %vm293_vm2, %v370_v16, %v372_v48  ;;  %v901_v13 = vrot.slane %v3786_v25, 2  ;;  %v911_v16 = vrot.slane %v3825_v42, 2 }
  0x44   : > { %2981 = vmatmul.mubr.msk.bf16.gmra.mrb[20].mxu1 %vm425_vm3, %v3916_v60  ;;  %v895_v60 = vrot.slane %v3758_v40, 2  ;;  %v900_v40 = vrot.slane %v3783_v24, 2  ;;  %v4059_v41 = vpack.c.bf16 %v373_v11, %v371_v54  ;;  %v913_v48 = vrot.slane %v3828_v43, 2 }
  0x45   : > { %2984 = vmatprep.mubr.msk.bf16.mxu1 %vm425_vm3, %v3927_v22  ;;  %3135 = vmatmul.mubr.msk.bf16.gmra.mrb[4].mxu0 %vm425_vm3, %v3954_v49  ;;  %v4037_v22 = vpack.c.bf16 %v889_v20, %v887_v38  ;;  %v4044_v49 = vpack.c.bf16 %v894_v58, %v892_v39  ;;  %v903_v38 = vrot.slane %v3789_v61, 2  ;;  %v899_v20 = vsel %vm854_vm4, %v896_v27, %v898_v34 }
  0x46   : > { %3138 = vmatprep.mubr.msk.bf16.mxu0 %vm425_vm3, %v3956_v29  ;;  %v967_v29 = vpack.c.bf16 %v4035_v15, %v4032_v55  ;;  %v897_v47 = vsel %vm854_vm4, %v895_v60, %v896_v27  ;;  %v227_v39 = vpack.c.bf16 %v3612_v18, %v3609_v17  ;;  %v902_v24 = vsel %vm854_vm4, %v900_v40, %v901_v13  ;;  %v4557_v55 = vld [vmem:[#allocation17_spill] sm:$0xff]  ;;  %v4558_v15 = vld [vmem:[#allocation18_spill] sm:$0xff] }
  0x47   : > { %v904_v25 = vsel %vm854_vm4, %v901_v13, %v903_v38  ;;  %v4067_v61 = vpack.c.bf16 %v899_v20, %v897_v47  ;;  %v905_v34 = vrot.slane %v3794_v1, 2  ;;  %v906_v60 = vrot.slane %v3797_v2, 2 }
  0x48   : > { %v4074_v54 = vpack.c.bf16 %v904_v25, %v902_v24  ;;  %v908_v17 = vrot.slane %v3806_v9, 2  ;;  %v910_v18 = vrot.slane %v3822_v37, 2  ;;  %v1233_v58 = vpack.c.bf16 %v2700_v6, %v2700_v6 }
  0x49   : > { %v907_v1 = vsel %vm854_vm4, %v905_v34, %v906_v60  ;;  %v914_v27 = vsel %vm854_vm4, %v911_v16, %v913_v48  ;;  %v915_v11 = vrot.slane %v3837_v59, 2  ;;  %v916_v40 = vrot.slane %v3849_v63, 2 }
  0x4a   : > { %v909_v2 = vsel %vm854_vm4, %v906_v60, %v908_v17  ;;  %v912_v9 = vsel %vm854_vm4, %v910_v18, %v911_v16  ;;  %v4092_v37 = vand.u32 %v1233_v58, %v3578_v5  ;;  %v918_v13 = vrot.slane %v3852_v0, 2  ;;  %v221_v17 = vld [vmem:[%s3599_s26 + $0x180] sm:$0xff]  ;;  %v223_v18 = vld [vmem:[%s3599_s26 + $0x190] sm:$0x3] }
  0x4b   : > { %v4094_v42 = vpack.c.bf16 %v909_v2, %v907_v1  ;;  %v4098_v43 = vpack.c.bf16 %v914_v27, %v912_v9  ;;  %v920_v38 = vrot.slane %v3878_v62, 2  ;;  %v921_v47 = vrot.slane %v3881_v53, 2 }
  0x4c   : > { %2985 = vmatmul.mubr.msk.bf16.gmra.mrb[24].mxu1 %vm425_vm3, %v3984_v30  ;;  %v923_v20 = vrot.slane %v3887_v8, 2  ;;  %v917_v59 = vsel %vm854_vm4, %v915_v11, %v916_v40  ;;  %v925_v8 = vrot.slane %v3905_v28, 2  ;;  %v928_v24 = vrot.slane %v3911_v44, 2 }
  0x4d   : > { %2988 = vmatprep.mubr.msk.bf16.mxu1 %vm425_vm3, %v3996_v19  ;;  %3139 = vmatmul.mubr.msk.bf16.gmra.mrb[8].mxu0 %vm425_vm3, %v4037_v22  ;;  %v922_v63 = vsel %vm854_vm4, %v920_v38, %v921_v47  ;;  %v930_v25 = vrot.slane %v3959_v3, 2  ;;  %v931_v6 = vrot.slane %v3971_v31, 2  ;;  %v933_v34 = vrot.slane %v3974_v56, 2  ;;  %v222_v3 = vld [vmem:[%s3599_s26 + $0x188] sm:$0xff] }
  0x4e   : > { %3142 = vmatprep.mubr.msk.bf16.mxu0 %vm425_vm3, %v4044_v49  ;;  %v924_v62 = vsel %vm854_vm4, %v921_v47, %v923_v20  ;;  %v1646_v16 = vrot.slane %v221_v17, 2  ;;  %v1647_v48 = vrot.slane %v222_v3, 2  ;;  %v1649_v58 = vrot.slane %v223_v18, 2  ;;  %v2785_v20 = vld [vmem:[%s4507_s1 + $0x20] sm:$0x7] }
  0x4f   : > { %v4122_v53 = vpack.c.bf16 %v924_v62, %v922_v63  ;;  %v932_v44 = vsel %vm854_vm4, %v930_v25, %v931_v6  ;;  %v934_v60 = vsel %vm854_vm4, %v931_v6, %v933_v34  ;;  %v1436_v1 = vrot.slane %v221_v17, 1  ;;  %v4555_v63 = vld [vmem:[#allocation2_spill] sm:$0xff]  ;;  %v224_v62 = vld [vmem:[%s3599_s26 + $0x198] sm:$0xff]  ;;  %v226_v25 = vld [vmem:[%s3599_s26 + $0x1a8] sm:$0x3] }
  0x50   : > { %v4147_v56 = vpack.c.bf16 %v934_v60, %v932_v44  ;;  %v1437_v2 = vrot.slane %v222_v3, 1  ;;  %v1439_v9 = vrot.slane %v223_v18, 1  ;;  %v1648_v27 = vsel %vm854_vm4, %v1646_v16, %v1647_v48  ;;  %v4559_v60 = vld [vmem:[#allocation3_spill] sm:$0xff]  ;;  %v4562_v18 = vld [vmem:[#allocation6_spill] sm:$0xff] }
  0x51   : > { %v1650_v11 = vsel %vm854_vm4, %v1647_v48, %v1649_v58  ;;  %v2275_v6 = vrot.slane %v226_v25, 2  ;;  %v4563_v16 = vld [vmem:[#allocation7_spill] sm:$0xff]  ;;  %v4564_v48 = vld [vmem:[#allocation8_spill] sm:$0xff]  ;;  %v4565_v58 = vld [vmem:[#allocation9_spill] sm:$0xff] }
  0x52   : > { %v4161_v47 = vpack.c.bf16 %v1650_v11, %v1648_v27  ;;  %v4569_v27 = vld [vmem:[#allocation16_spill] sm:$0xff] }
  0x54   : > { %2989 = vmatmul.mubr.msk.bf16.gmra.mrb[28].mxu1 %vm425_vm3, %v4059_v41 }
  0x55   : > { %2994 = vmatprep.mubr.msk.bf16.mxu1 %vm425_vm3, %v227_v39  ;;  %3143 = vmatmul.mubr.msk.bf16.gmra.mrb[12].mxu0 %vm425_vm3, %v4067_v61  ;;  %v926_v39 = vrot.slane %v3908_v35, 2 }
  0x56   : > { %3146 = vmatprep.mubr.msk.bf16.mxu0 %vm425_vm3, %v4074_v54 }
  0x57   : > { %v927_v28 = vsel %vm854_vm4, %v925_v8, %v926_v39  ;;  %v929_v35 = vsel %vm854_vm4, %v926_v39, %v928_v24  ;;  %v225_v8 = vld [vmem:[%s3599_s26 + $0x1a0] sm:$0xff]  ;;  %v2272_v39 = vrot.slane %v224_v62, 2 }
  0x58   : > { %v4143_v31 = vpack.c.bf16 %v929_v35, %v927_v28  ;;  %v2273_v24 = vrot.slane %v225_v8, 2  ;;  %v1856_v34 = vpack.c.bf16 %v225_v8, %v224_v62 }
  0x5a   : > { %v4244_v28 = vsel %vm854_vm4, %v2272_v39, %v2273_v24  ;;  %v4247_v35 = vsel %vm854_vm4, %v2273_v24, %v2275_v6 }
  0x5b   : > { %v2279_v44 = vpack.c.bf16 %v4247_v35, %v4244_v28 }
  0x5c   : > { %2995 = vmatmul.mubr.msk.bf16.vlgmr.msra.gmra.mrb[0].mxu1 %vm425_vm3, %v3632_v26 }
  0x5d   : > { %3027 = vmatpush3.bf16.msra.mxu1 %v3676_v51  ;;  %2998 = vmatprep.mubr.msk.bf16.mxu1 %vm425_vm3, %v3891_v10  ;;  %v919_v51 = vsel %vm854_vm4, %v916_v40, %v918_v13  ;;  %v1438_v40 = vsel %vm293_vm2, %v1436_v1, %v1437_v2  ;;  %v1440_v13 = vsel %vm293_vm2, %v1437_v2, %v1439_v9  ;;  %v4566_v1 = vld [vmem:[#allocation11_spill] sm:$0xff]  ;;  %v4567_v2 = vld [vmem:[#allocation13_spill] sm:$0xff] }
  0x5e   : > { %3060 = vmatprep.subr.bf16.mxu1 %v4092_v37  ;;  %3147 = vmatmul.mubr.msk.bf16.gmra.mrb[16].mxu0 %vm425_vm3, %v4094_v42  ;;  %v4118_v0 = vpack.c.bf16 %v919_v51, %v917_v59  ;;  %v4159_v38 = vpack.c.bf16 %v1440_v13, %v1438_v40  ;;  %v2282_v59 = vpack.c.bf16 %v2785_v20, %v2785_v20  ;;  %v4568_v9 = vld [vmem:[#allocation15_spill] sm:$0xff] }
  0x5f   : > { %3150 = vmatprep.mubr.msk.bf16.mxu0 %vm425_vm3, %v4098_v43 }
  0x60   : > { %v2287_v51 = vand.u32 %v2282_v59, %v3578_v5  ;;  %v4553_v5 = vld [vmem:[#allocation10_spill] sm:$0xff] }
  0x64   : > { %2999 = vmatmul.mubr.msk.bf16.gmra.mrb[4].mxu1 %vm425_vm3, %v3922_v32 }
  0x65   : > { %3002 = vmatprep.mubr.msk.bf16.mxu1 %vm425_vm3, %v3932_v21 }
  0x66   : > { %3151 = vmatmul.mubr.msk.bf16.gmra.mrb[20].mxu0 %vm425_vm3, %v4118_v0 }
  0x67   : > { %3154 = vmatprep.mubr.msk.bf16.mxu0 %vm425_vm3, %v4122_v53 }
  0x6c   : > { %3003 = vmatmul.mubr.msk.bf16.gmra.mrb[8].mxu1 %vm425_vm3, %v3946_v46 }
  0x6d   : > { %3006 = vmatprep.mubr.msk.bf16.mxu1 %vm425_vm3, %v3963_v50 }
  0x6e   : > { %3155 = vmatmul.mubr.msk.bf16.gmra.mrb[24].mxu0 %vm425_vm3, %v4143_v31 }
  0x6f   : > { %3158 = vmatprep.mubr.msk.bf16.mxu0 %vm425_vm3, %v4147_v56 }
  0x74   : > { %3007 = vmatmul.mubr.msk.bf16.gmra.mrb[12].mxu1 %vm425_vm3, %v3978_v23 }
  0x75   : > { %3010 = vmatprep.mubr.msk.bf16.mxu1 %vm425_vm3, %v3992_v14 }
  0x76   : > { %3159 = vmatmul.mubr.msk.bf16.gmra.mrb[28].mxu0 %vm425_vm3, %v4161_v47 }
  0x77   : > { %3164 = vmatprep.mubr.msk.bf16.mxu0 %vm425_vm3, %v3891_v10 }
  0x7c   : > { %3011 = vmatmul.mubr.msk.bf16.gmra.mrb[16].mxu1 %vm425_vm3, %v4002_v52 }
  0x7d   : > { %3014 = vmatprep.mubr.msk.bf16.mxu1 %vm425_vm3, %v4009_v45 }
  0x7e   : > { %3165 = vmatmul.mubr.msk.bf16.vlgmr.msra.gmra.mrb[0].mxu0 %vm425_vm3, %v3922_v32 }
  0x7f   : > { %3197 = vmatpush3.bf16.msra.mxu0 %v3914_v33  ;;  %3168 = vmatprep.mubr.msk.bf16.mxu0 %vm425_vm3, %v3932_v21  ;;  %v4554_v33 = vld [vmem:[#allocation12_spill] sm:$0xff] }
  0x80   : > { %3230 = vmatprep.subr.bf16.mxu0 %v2287_v51 }
  0x84   : > { %3015 = vmatmul.mubr.msk.bf16.gmra.mrb[20].mxu1 %vm425_vm3, %v4013_v57 }
  0x85   : > { %3018 = vmatprep.mubr.msk.bf16.mxu1 %vm425_vm3, %v4017_v4 }
  0x86   : > { %3169 = vmatmul.mubr.msk.bf16.gmra.mrb[4].mxu0 %vm425_vm3, %v3946_v46 }
  0x87   : > { %3172 = vmatprep.mubr.msk.bf16.mxu0 %vm425_vm3, %v3963_v50 }
  0x8c   : > { %3019 = vmatmul.mubr.msk.bf16.gmra.mrb[24].mxu1 %vm425_vm3, %v4021_v7 }
  0x8d   : > { %3022 = vmatprep.mubr.msk.bf16.mxu1 %vm425_vm3, %v4025_v12 }
  0x8e   : > { %3173 = vmatmul.mubr.msk.bf16.gmra.mrb[8].mxu0 %vm425_vm3, %v3978_v23 }
  0x8f   : > { %3176 = vmatprep.mubr.msk.bf16.mxu0 %vm425_vm3, %v3992_v14 }
  0x94   : > { %3023 = vmatmul.mubr.msk.bf16.gmra.mrb[28].mxu1 %vm425_vm3, %v4029_v36 }
  0x95   : > { %3028 = vmatprep.mubr.msk.bf16.mxu1 %vm425_vm3, %v967_v29  ;;  %v4556_v29 = vld [vmem:[#allocation14_spill] sm:$0xff] }
  0x96   : > { %3177 = vmatmul.mubr.msk.bf16.gmra.mrb[12].mxu0 %vm425_vm3, %v4002_v52 }
  0x97   : > { %3180 = vmatprep.mubr.msk.bf16.mxu0 %vm425_vm3, %v4009_v45 }
  0x9c   : > { %3029 = vmatmul.mubr.msk.bf16.vlgmr.msra.gmra.mrb[0].mxu1 %vm425_vm3, %v4553_v5 }
  0x9d   : > { %3061 = vmatpush3.bf16.msra.mxu1 %v4092_v37  ;;  %3032 = vmatprep.mubr.msk.bf16.mxu1 %vm425_vm3, %v4554_v33  ;;  %v4230_v37 = vpack.c.bf16 %v222_v3, %v221_v17  ;;  %v4560_v17 = vld [vmem:[#allocation4_spill] sm:$0xff]  ;;  %v4561_v3 = vld [vmem:[#allocation5_spill] sm:$0xff] }
  0x9e   : > { %3264 = vmatprep.subr.bf16.mxu1 %v4555_v63  ;;  %3181 = vmatmul.mubr.msk.bf16.gmra.mrb[16].mxu0 %vm425_vm3, %v4013_v57 }
  0x9f   : > { %3184 = vmatprep.mubr.msk.bf16.mxu0 %vm425_vm3, %v4017_v4 }
  0xa4   : > { %3033 = vmatmul.mubr.msk.bf16.gmra.mrb[4].mxu1 %vm425_vm3, %v4556_v29 }
  0xa5   : > { %3036 = vmatprep.mubr.msk.bf16.mxu1 %vm425_vm3, %v4557_v55 }
  0xa6   : > { %3185 = vmatmul.mubr.msk.bf16.gmra.mrb[20].mxu0 %vm425_vm3, %v4021_v7 }
  0xa7   : > { %3188 = vmatprep.mubr.msk.bf16.mxu0 %vm425_vm3, %v4025_v12 }
  0xac   : > { %3037 = vmatmul.mubr.msk.bf16.gmra.mrb[8].mxu1 %vm425_vm3, %v4558_v15 }
  0xad   : > { %3040 = vmatprep.mubr.msk.bf16.mxu1 %vm425_vm3, %v4037_v22 }
  0xae   : > { %3189 = vmatmul.mubr.msk.bf16.gmra.mrb[24].mxu0 %vm425_vm3, %v4029_v36 }
  0xaf   : > { %3192 = vmatprep.mubr.msk.bf16.mxu0 %vm425_vm3, %v4230_v37 }
  0xb4   : > { %3041 = vmatmul.mubr.msk.bf16.gmra.mrb[12].mxu1 %vm425_vm3, %v4044_v49 }
  0xb5   : > { %3044 = vmatprep.mubr.msk.bf16.mxu1 %vm425_vm3, %v4067_v61 }
  0xb6   : > { %3193 = vmatmul.mubr.msk.bf16.gmra.mrb[28].mxu0 %vm425_vm3, %v1856_v34 }
  0xb7   : > { %3198 = vmatprep.mubr.msk.bf16.mxu0 %vm425_vm3, %v4559_v60 }
  0xbc   : > { %3045 = vmatmul.mubr.msk.bf16.gmra.mrb[16].mxu1 %vm425_vm3, %v4074_v54 }
  0xbd   : > { %3048 = vmatprep.mubr.msk.bf16.mxu1 %vm425_vm3, %v4094_v42 }
  0xbe   : > { %3199 = vmatmul.mubr.msk.bf16.vlgmr.msra.gmra.mrb[0].mxu0 %vm425_vm3, %v4560_v17 }
  0xbf   : > { %3231 = vmatpush3.bf16.msra.mxu0 %v2287_v51  ;;  %3202 = vmatprep.mubr.msk.bf16.mxu0 %vm425_vm3, %v4561_v3 }
  0xc4   : > { %3049 = vmatmul.mubr.msk.bf16.gmra.mrb[20].mxu1 %vm425_vm3, %v4098_v43 }
  0xc5   : > { %3052 = vmatprep.mubr.msk.bf16.mxu1 %vm425_vm3, %v4118_v0 }
  0xc6   : > { %3203 = vmatmul.mubr.msk.bf16.gmra.mrb[4].mxu0 %vm425_vm3, %v4562_v18 }
  0xc7   : > { %3206 = vmatprep.mubr.msk.bf16.mxu0 %vm425_vm3, %v4563_v16 }
  0xcc   : > { %3053 = vmatmul.mubr.msk.bf16.gmra.mrb[24].mxu1 %vm425_vm3, %v4122_v53 }
  0xcd   : > { %3056 = vmatprep.mubr.msk.bf16.mxu1 %vm425_vm3, %v4143_v31 }
  0xce   : > { %3207 = vmatmul.mubr.msk.bf16.gmra.mrb[8].mxu0 %vm425_vm3, %v4564_v48 }
  0xcf   : > { %3210 = vmatprep.mubr.msk.bf16.mxu0 %vm425_vm3, %v4565_v58 }
  0xd4   : > { %3057 = vmatmul.mubr.msk.bf16.gmra.mrb[28].mxu1 %vm425_vm3, %v4147_v56 }
  0xd5   : > { %3062 = vmatprep.mubr.msk.bf16.mxu1 %vm425_vm3, %v3632_v26  ;;  %v2062_v26 = vrot.slane %v224_v62, 1 }
  0xd6   : > { %3211 = vmatmul.mubr.msk.bf16.gmra.mrb[12].mxu0 %vm425_vm3, %v4566_v1 }
  0xd7   : > { %3214 = vmatprep.mubr.msk.bf16.mxu0 %vm425_vm3, %v4567_v2 }
  0xdc   : > { %3063 = vmatmul.mubr.msk.bf16.vlgmr.msra.gmra.mrb[0].mxu1 %vm425_vm3, %v3891_v10  ;;  %v2063_v10 = vrot.slane %v225_v8, 1 }
  0xdd   : > { %3265 = vmatpush3.bf16.msra.mxu1 %v4555_v63  ;;  %3066 = vmatprep.mubr.msk.bf16.mxu1 %vm425_vm3, %v3922_v32  ;;  %v2065_v32 = vrot.slane %v226_v25, 1 }
  0xde   : > { %3215 = vmatmul.mubr.msk.bf16.gmra.mrb[16].mxu0 %vm425_vm3, %v4568_v9 }
  0xdf   : > { %3218 = vmatprep.mubr.msk.bf16.mxu0 %vm425_vm3, %v4569_v27 }
  0xe4   : > { %3067 = vmatmul.mubr.msk.bf16.gmra.mrb[4].mxu1 %vm425_vm3, %v3932_v21  ;;  %v2064_v21 = vsel %vm293_vm2, %v2062_v26, %v2063_v10 }
  0xe5   : > { %3070 = vmatprep.mubr.msk.bf16.mxu1 %vm425_vm3, %v3946_v46  ;;  %v2066_v46 = vsel %vm293_vm2, %v2063_v10, %v2065_v32 }
  0xe6   : > { %3219 = vmatmul.mubr.msk.bf16.gmra.mrb[20].mxu0 %vm425_vm3, %v3984_v30  ;;  %v2069_v11 = vpack.c.bf16 %v2066_v46, %v2064_v21 }
  0xe7   : > { %3222 = vmatprep.mubr.msk.bf16.mxu0 %vm425_vm3, %v3996_v19 }
  0xec   : > { %3071 = vmatmul.mubr.msk.bf16.gmra.mrb[8].mxu1 %vm425_vm3, %v3963_v50 }
  0xed   : > { %3074 = vmatprep.mubr.msk.bf16.mxu1 %vm425_vm3, %v3978_v23 }
  0xee   : > { %3223 = vmatmul.mubr.msk.bf16.gmra.mrb[24].mxu0 %vm425_vm3, %v4059_v41 }
  0xef   : > { %3226 = vmatprep.mubr.msk.bf16.mxu0 %vm425_vm3, %v4159_v38 }
  0xf4   : > { %3075 = vmatmul.mubr.msk.bf16.gmra.mrb[12].mxu1 %vm425_vm3, %v3992_v14 }
  0xf5   : > { %3078 = vmatprep.mubr.msk.bf16.mxu1 %vm425_vm3, %v4002_v52 }
  0xf6   : > { %3227 = vmatmul.mubr.msk.bf16.gmra.mrb[28].mxu0 %vm425_vm3, %v2069_v11 }
  0xf7   : > { %3232 = vmatprep.mubr.msk.bf16.mxu0 %vm425_vm3, %v4554_v33 }
  0xfc   : > { %3079 = vmatmul.mubr.msk.bf16.gmra.mrb[16].mxu1 %vm425_vm3, %v4009_v45 }
  0xfd   : > { %3082 = vmatprep.mubr.msk.bf16.mxu1 %vm425_vm3, %v4013_v57 }
  0xfe   : > { %3233 = vmatmul.mubr.msk.bf16.vlgmr.msra.gmra.mrb[0].mxu0 %vm425_vm3, %v4556_v29 }
  0xff   : > { %3236 = vmatprep.mubr.msk.bf16.mxu0 %vm425_vm3, %v4557_v55 }
 0x104   : > { %3083 = vmatmul.mubr.msk.bf16.gmra.mrb[20].mxu1 %vm425_vm3, %v4017_v4 }
 0x105   : > { %3086 = vmatprep.mubr.msk.bf16.mxu1 %vm425_vm3, %v4021_v7 }
 0x106   : > { %3237 = vmatmul.mubr.msk.bf16.gmra.mrb[4].mxu0 %vm425_vm3, %v4558_v15 }
 0x107   : > { %3240 = vmatprep.mubr.msk.bf16.mxu0 %vm425_vm3, %v4037_v22 }
 0x10c   : > { %3087 = vmatmul.mubr.msk.bf16.gmra.mrb[24].mxu1 %vm425_vm3, %v4025_v12 }
 0x10d   : > { %3090 = vmatprep.mubr.msk.bf16.mxu1 %vm425_vm3, %v4029_v36 }
 0x10e   : > { %3241 = vmatmul.mubr.msk.bf16.gmra.mrb[8].mxu0 %vm425_vm3, %v4044_v49 }
 0x10f   : > { %3244 = vmatprep.mubr.msk.bf16.mxu0 %vm425_vm3, %v4067_v61 }
 0x114   : > { %3091 = vmatmul.mubr.msk.bf16.gmra.mrb[28].mxu1 %vm425_vm3, %v4230_v37 }
 0x115   : > { %3112 = vmatprep.mubr.msk.bf16.mxu1 %vm425_vm3, %v4566_v1 }
 0x116   : > { %3245 = vmatmul.mubr.msk.bf16.gmra.mrb[12].mxu0 %vm425_vm3, %v4074_v54 }
 0x117   : > { %3248 = vmatprep.mubr.msk.bf16.mxu0 %vm425_vm3, %v4094_v42  ;;  %v4396_v42 = vld [vmem:[%s4508_s2] ss:$0 sm:$0xff] }
 0x11c   : > { %3113 = vmatmul.mubr.msk.bf16.vlgmr.msra.gmra.mrb[16].mxu1 %vm425_vm3, %v4567_v2 }
 0x11d   : > { %3116 = vmatprep.mubr.msk.bf16.mxu1 %vm425_vm3, %v4568_v9 }
 0x11e   : > { %3249 = vmatmul.mubr.msk.bf16.gmra.mrb[16].mxu0 %vm425_vm3, %v4098_v43 }
 0x11f   : > { %3252 = vmatprep.mubr.msk.bf16.mxu0 %vm425_vm3, %v4118_v0 }
 0x124   : > { %3117 = vmatmul.mubr.msk.bf16.gmra.mrb[20].mxu1 %vm425_vm3, %v4569_v27 }
 0x125   : > { %3120 = vmatprep.mubr.msk.bf16.mxu1 %vm425_vm3, %v3984_v30 }
 0x126   : > { %3253 = vmatmul.mubr.msk.bf16.gmra.mrb[20].mxu0 %vm425_vm3, %v4122_v53 }
 0x127   : > { %3256 = vmatprep.mubr.msk.bf16.mxu0 %vm425_vm3, %v4143_v31 }
 0x12c   : > { %3121 = vmatmul.mubr.msk.bf16.gmra.mrb[24].mxu1 %vm425_vm3, %v3996_v19 }
 0x12d   : > { %3124 = vmatprep.mubr.msk.bf16.mxu1 %vm425_vm3, %v4059_v41 }
 0x12e   : > { %3257 = vmatmul.mubr.msk.bf16.gmra.mrb[24].mxu0 %vm425_vm3, %v4147_v56 }
 0x12f   : > { %3260 = vmatprep.mubr.msk.bf16.mxu0 %vm425_vm3, %v4161_v47 }
 0x134   : > { %3125 = vmatmul.mubr.msk.bf16.gmra.mrb[28].mxu1 %vm425_vm3, %v4159_v38 }
 0x136   : > { %3261 = vmatmul.mubr.msk.bf16.gmra.mrb[28].mxu0 %vm425_vm3, %v2279_v44 }
 0x1af   : > { %v3064_v22 = vpop.f32.mrb[0].mxu1 }
 0x1b0   : > { %v1274_v49 = vpop.f32.mrb[1].mxu1 }
 0x1b1   : > { %v3065_v50 = vpop.f32.mrb[2].mxu1 }
 0x1b2   : > { %v1277_v23 = vpop.f32.mrb[3].mxu1 }
 0x1b7   : > { %v3068_v30 = vpop.f32.mrb[4].mxu1 }
 0x1b8   : > { %v1290_v14 = vpop.f32.mrb[5].mxu1 }
 0x1b9   : > { %v3069_v19 = vpop.f32.mrb[6].mxu1 }
 0x1ba   : > { %v1293_v52 = vpop.f32.mrb[7].mxu1 }
 0x1bf   : > { %v3072_v45 = vpop.f32.mrb[8].mxu1 }
 0x1c0   : > { %v1306_v57 = vpop.f32.mrb[9].mxu1 }
 0x1c1   : > { %v3073_v4 = vpop.f32.mrb[10].mxu1 }
 0x1c2   : > { %v1309_v7 = vpop.f32.mrb[11].mxu1 }
 0x1c7   : > { %v4384_v12 = vpop.f32.mrb[12].mxu1 }
 0x1c8   : > { %v4386_v36 = vpop.f32.mrb[13].mxu1 }
 0x1c9   : > { %v4389_v41 = vpop.f32.mrb[14].mxu1 }
 0x1ca   : > { %v4391_v61 = vpop.f32.mrb[15].mxu1 }
 0x1d1   : > { %v3234_v54 = vpop.f32.mrb[0].mxu0 }
 0x1d2   : > { %v3266_v43 = vadd.f32 %v3234_v54, %v3064_v22  ;;  %v2323_v0 = vpop.f32.mrb[1].mxu0 }
 0x1d3   : > { %v3267_v53 = vadd.f32 %v2323_v0, %v1274_v49  ;;  %v3235_v31 = vpop.f32.mrb[2].mxu0 }
 0x1d4   : > { %v2491_v56 = vadd.f32 %v3266_v43, %v4396_v42  ;;  %v3268_v40 = vadd.f32 %v3235_v31, %v3065_v50  ;;  %v2326_v13 = vpop.f32.mrb[3].mxu0 }
 0x1d5   : > { %v2489_v38 = vadd.f32 %v3267_v53, %v4396_v42  ;;  %v3269_v47 = vadd.f32 %v2326_v13, %v1277_v23 }
 0x1d6   : > { %v2523_v20 = vmax.f32 %v2491_v56, 0.0  ;;  %v2492_v59 = vadd.f32 %v3268_v40, %v4396_v42 }
 0x1d7   : > { %v2521_v51 = vmax.f32 %v2489_v38, 0.0  ;;  %v2490_v5 = vadd.f32 %v3269_v47, %v4396_v42 }
 0x1d8   : > { %2556 = vst.msk [vmem:[%s4402_s17 + $0x10] sm:$0xff] %vm2553_vm5, %v2523_v20  ;;  %v2524_v33 = vmax.f32 %v2492_v59, 0.0 }
 0x1d9   : > { %2554 = vst.msk [vmem:[%s4402_s17] sm:$0xff] %vm2553_vm5, %v2521_v51  ;;  %v2522_v63 = vmax.f32 %v2490_v5, 0.0  ;;  %v3238_v29 = vpop.f32.mrb[4].mxu0 }
 0x1da   : > { %2557 = vst.msk [vmem:[%s4402_s17 + $0x18] sm:$0xff] %vm2553_vm5, %v2524_v33  ;;  %v3270_v55 = vadd.f32 %v3238_v29, %v3068_v30  ;;  %v2339_v15 = vpop.f32.mrb[5].mxu0 }
 0x1db   : > { %2555 = vst.msk [vmem:[%s4402_s17 + $0x8] sm:$0xff] %vm2553_vm5, %v2522_v63  ;;  %v3271_v37 = vadd.f32 %v2339_v15, %v1290_v14  ;;  %v3239_v62 = vpop.f32.mrb[6].mxu0 }
 0x1dc   : > { %v2495_v8 = vadd.f32 %v3270_v55, %v4396_v42  ;;  %v3272_v39 = vadd.f32 %v3239_v62, %v3069_v19  ;;  %v2342_v24 = vpop.f32.mrb[7].mxu0 }
 0x1dd   : > { %v2493_v25 = vadd.f32 %v3271_v37, %v4396_v42  ;;  %v3273_v6 = vadd.f32 %v2342_v24, %v1293_v52 }
 0x1de   : > { %v2527_v34 = vmax.f32 %v2495_v8, 0.0  ;;  %v2496_v28 = vadd.f32 %v3272_v39, %v4396_v42 }
 0x1df   : > { %v2525_v35 = vmax.f32 %v2493_v25, 0.0  ;;  %v2494_v44 = vadd.f32 %v3273_v6, %v4396_v42 }
 0x1e0   : > { %2560 = vst.msk [vmem:[%s4402_s17 + $0x30] sm:$0xff] %vm2553_vm5, %v2527_v34  ;;  %v2528_v60 = vmax.f32 %v2496_v28, 0.0 }
 0x1e1   : > { %2558 = vst.msk [vmem:[%s4402_s17 + $0x20] sm:$0xff] %vm2553_vm5, %v2525_v35  ;;  %v2526_v17 = vmax.f32 %v2494_v44, 0.0  ;;  %v3242_v3 = vpop.f32.mrb[8].mxu0 }
 0x1e2   : > { %2561 = vst.msk [vmem:[%s4402_s17 + $0x38] sm:$0xff] %vm2553_vm5, %v2528_v60  ;;  %v3274_v18 = vadd.f32 %v3242_v3, %v3072_v45  ;;  %v2355_v16 = vpop.f32.mrb[9].mxu0 }
 0x1e3   : > { %2559 = vst.msk [vmem:[%s4402_s17 + $0x28] sm:$0xff] %vm2553_vm5, %v2526_v17  ;;  %v3275_v48 = vadd.f32 %v2355_v16, %v1306_v57  ;;  %v3243_v58 = vpop.f32.mrb[10].mxu0 }
 0x1e4   : > { %v2499_v1 = vadd.f32 %v3274_v18, %v4396_v42  ;;  %v3276_v2 = vadd.f32 %v3243_v58, %v3073_v4  ;;  %v2358_v9 = vpop.f32.mrb[11].mxu0 }
 0x1e5   : > { %v2497_v27 = vadd.f32 %v3275_v48, %v4396_v42  ;;  %v3277_v26 = vadd.f32 %v2358_v9, %v1309_v7 }
 0x1e6   : > { %v2531_v10 = vmax.f32 %v2499_v1, 0.0  ;;  %v2500_v32 = vadd.f32 %v3276_v2, %v4396_v42 }
 0x1e7   : > { %v2529_v21 = vmax.f32 %v2497_v27, 0.0  ;;  %v2498_v46 = vadd.f32 %v3277_v26, %v4396_v42 }
 0x1e8   : > { %2564 = vst.msk [vmem:[%s4402_s17 + $0x50] sm:$0xff] %vm2553_vm5, %v2531_v10  ;;  %v2532_v11 = vmax.f32 %v2500_v32, 0.0 }
 0x1e9   : > { %2562 = vst.msk [vmem:[%s4402_s17 + $0x40] sm:$0xff] %vm2553_vm5, %v2529_v21  ;;  %v2530_v22 = vmax.f32 %v2498_v46, 0.0  ;;  %v3246_v49 = vpop.f32.mrb[12].mxu0 }
 0x1ea   : > { %2565 = vst.msk [vmem:[%s4402_s17 + $0x58] sm:$0xff] %vm2553_vm5, %v2532_v11  ;;  %v3278_v50 = vadd.f32 %v3246_v49, %v4384_v12  ;;  %v2371_v23 = vpop.f32.mrb[13].mxu0 }
 0x1eb   : > { %2563 = vst.msk [vmem:[%s4402_s17 + $0x48] sm:$0xff] %vm2553_vm5, %v2530_v22  ;;  %v3279_v30 = vadd.f32 %v2371_v23, %v4386_v36  ;;  %v3247_v14 = vpop.f32.mrb[14].mxu0 }
 0x1ec   : > { %v2503_v19 = vadd.f32 %v3278_v50, %v4396_v42  ;;  %v3280_v52 = vadd.f32 %v3247_v14, %v4389_v41  ;;  %v2374_v45 = vpop.f32.mrb[15].mxu0 }
 0x1ed   : > { %v2501_v57 = vadd.f32 %v3279_v30, %v4396_v42  ;;  %v3281_v4 = vadd.f32 %v2374_v45, %v4391_v61 }
 0x1ee   : > { %v2535_v7 = vmax.f32 %v2503_v19, 0.0  ;;  %v2504_v12 = vadd.f32 %v3280_v52, %v4396_v42 }
 0x1ef   : > { %v3114_v54 = vpop.f32.mrb[16].mxu1  ;;  %v2533_v43 = vmax.f32 %v2501_v57, 0.0  ;;  %v2502_v36 = vadd.f32 %v3281_v4, %v4396_v42 }
 0x1f0   : > { %v1551_v0 = vpop.f32.mrb[17].mxu1  ;;  %2568 = vst.msk [vmem:[%s4402_s17 + $0x70] sm:$0xff] %vm2553_vm5, %v2535_v7  ;;  %v2536_v53 = vmax.f32 %v2504_v12, 0.0 }
 0x1f1   : > { %v3115_v31 = vpop.f32.mrb[18].mxu1  ;;  %2566 = vst.msk [vmem:[%s4402_s17 + $0x60] sm:$0xff] %vm2553_vm5, %v2533_v43  ;;  %v2534_v41 = vmax.f32 %v2502_v36, 0.0  ;;  %v3250_v56 = vpop.f32.mrb[16].mxu0 }
 0x1f2   : > { %v1554_v40 = vpop.f32.mrb[19].mxu1  ;;  %2569 = vst.msk [vmem:[%s4402_s17 + $0x78] sm:$0xff] %vm2553_vm5, %v2536_v53  ;;  %v3282_v61 = vadd.f32 %v3250_v56, %v3114_v54  ;;  %v2387_v13 = vpop.f32.mrb[17].mxu0 }
 0x1f3   : > { %2567 = vst.msk [vmem:[%s4402_s17 + $0x68] sm:$0xff] %vm2553_vm5, %v2534_v41  ;;  %v3283_v38 = vadd.f32 %v2387_v13, %v1551_v0  ;;  %v3251_v47 = vpop.f32.mrb[18].mxu0 }
 0x1f4   : > { %v2507_v20 = vadd.f32 %v3282_v61, %v4396_v42  ;;  %v3284_v59 = vadd.f32 %v3251_v47, %v3115_v31  ;;  %v2390_v51 = vpop.f32.mrb[19].mxu0 }
 0x1f5   : > { %v2505_v5 = vadd.f32 %v3283_v38, %v4396_v42  ;;  %v3285_v33 = vadd.f32 %v2390_v51, %v1554_v40 }
 0x1f6   : > { %v2539_v63 = vmax.f32 %v2507_v20, 0.0  ;;  %v2508_v29 = vadd.f32 %v3284_v59, %v4396_v42 }
 0x1f7   : > { %v3118_v55 = vpop.f32.mrb[20].mxu1  ;;  %v2537_v15 = vmax.f32 %v2505_v5, 0.0  ;;  %v2506_v37 = vadd.f32 %v3285_v33, %v4396_v42 }
 0x1f8   : > { %v1567_v62 = vpop.f32.mrb[21].mxu1  ;;  %2572 = vst.msk [vmem:[%s4402_s17 + $0x90] sm:$0xff] %vm2553_vm5, %v2539_v63  ;;  %v2540_v8 = vmax.f32 %v2508_v29, 0.0 }
 0x1f9   : > { %v3119_v39 = vpop.f32.mrb[22].mxu1  ;;  %2570 = vst.msk [vmem:[%s4402_s17 + $0x80] sm:$0xff] %vm2553_vm5, %v2537_v15  ;;  %v2538_v24 = vmax.f32 %v2506_v37, 0.0  ;;  %v3254_v25 = vpop.f32.mrb[20].mxu0 }
 0x1fa   : > { %v1570_v6 = vpop.f32.mrb[23].mxu1  ;;  %2573 = vst.msk [vmem:[%s4402_s17 + $0x98] sm:$0xff] %vm2553_vm5, %v2540_v8  ;;  %v3286_v34 = vadd.f32 %v3254_v25, %v3118_v55  ;;  %v2403_v28 = vpop.f32.mrb[21].mxu0 }
 0x1fb   : > { %2571 = vst.msk [vmem:[%s4402_s17 + $0x88] sm:$0xff] %vm2553_vm5, %v2538_v24  ;;  %v3287_v35 = vadd.f32 %v2403_v28, %v1567_v62  ;;  %v3255_v44 = vpop.f32.mrb[22].mxu0 }
 0x1fc   : > { %v2511_v60 = vadd.f32 %v3286_v34, %v4396_v42  ;;  %v3288_v17 = vadd.f32 %v3255_v44, %v3119_v39  ;;  %v2406_v3 = vpop.f32.mrb[23].mxu0 }
 0x1fd   : > { %v2509_v18 = vadd.f32 %v3287_v35, %v4396_v42  ;;  %v3289_v16 = vadd.f32 %v2406_v3, %v1570_v6 }
 0x1fe   : > { %v2543_v48 = vmax.f32 %v2511_v60, 0.0  ;;  %v2512_v58 = vadd.f32 %v3288_v17, %v4396_v42 }
 0x1ff   : > { %v3122_v1 = vpop.f32.mrb[24].mxu1  ;;  %v2541_v2 = vmax.f32 %v2509_v18, 0.0  ;;  %v2510_v9 = vadd.f32 %v3289_v16, %v4396_v42 }
 0x200   : > { %v1583_v27 = vpop.f32.mrb[25].mxu1  ;;  %2576 = vst.msk [vmem:[%s4402_s17 + $0xb0] sm:$0xff] %vm2553_vm5, %v2543_v48  ;;  %v2544_v26 = vmax.f32 %v2512_v58, 0.0 }
 0x201   : > { %v3123_v10 = vpop.f32.mrb[26].mxu1  ;;  %2574 = vst.msk [vmem:[%s4402_s17 + $0xa0] sm:$0xff] %vm2553_vm5, %v2541_v2  ;;  %v2542_v32 = vmax.f32 %v2510_v9, 0.0  ;;  %v3258_v21 = vpop.f32.mrb[24].mxu0 }
 0x202   : > { %v1586_v46 = vpop.f32.mrb[27].mxu1  ;;  %2577 = vst.msk [vmem:[%s4402_s17 + $0xb8] sm:$0xff] %vm2553_vm5, %v2544_v26  ;;  %v3290_v11 = vadd.f32 %v3258_v21, %v3122_v1  ;;  %v2419_v22 = vpop.f32.mrb[25].mxu0 }
 0x203   : > { %2575 = vst.msk [vmem:[%s4402_s17 + $0xa8] sm:$0xff] %vm2553_vm5, %v2542_v32  ;;  %v3291_v49 = vadd.f32 %v2419_v22, %v1583_v27  ;;  %v3259_v50 = vpop.f32.mrb[26].mxu0 }
 0x204   : > { %v2515_v23 = vadd.f32 %v3290_v11, %v4396_v42  ;;  %v3292_v30 = vadd.f32 %v3259_v50, %v3123_v10  ;;  %v2422_v14 = vpop.f32.mrb[27].mxu0 }
 0x205   : > { %v2513_v19 = vadd.f32 %v3291_v49, %v4396_v42  ;;  %v3293_v52 = vadd.f32 %v2422_v14, %v1586_v46 }
 0x206   : > { %v2547_v45 = vmax.f32 %v2515_v23, 0.0  ;;  %v2516_v57 = vadd.f32 %v3292_v30, %v4396_v42 }
 0x207   : > { %v3126_v4 = vpop.f32.mrb[28].mxu1  ;;  %v2545_v7 = vmax.f32 %v2513_v19, 0.0  ;;  %v2514_v12 = vadd.f32 %v3293_v52, %v4396_v42 }
 0x208   : > { %v1599_v54 = vpop.f32.mrb[29].mxu1  ;;  %2580 = vst.msk [vmem:[%s4402_s17 + $0xd0] sm:$0xff] %vm2553_vm5, %v2547_v45  ;;  %v2548_v43 = vmax.f32 %v2516_v57, 0.0 }
 0x209   : > { %v3127_v36 = vpop.f32.mrb[30].mxu1  ;;  %2578 = vst.msk [vmem:[%s4402_s17 + $0xc0] sm:$0xff] %vm2553_vm5, %v2545_v7  ;;  %v2546_v0 = vmax.f32 %v2514_v12, 0.0  ;;  %v3262_v53 = vpop.f32.mrb[28].mxu0 }
 0x20a   : > { %v1602_v31 = vpop.f32.mrb[31].mxu1  ;;  %2581 = vst.msk [vmem:[%s4402_s17 + $0xd8] sm:$0xff] %vm2553_vm5, %v2548_v43  ;;  %v3294_v41 = vadd.f32 %v3262_v53, %v3126_v4  ;;  %v2435_v56 = vpop.f32.mrb[29].mxu0 }
 0x20b   : > { %2579 = vst.msk [vmem:[%s4402_s17 + $0xc8] sm:$0xff] %vm2553_vm5, %v2546_v0  ;;  %v3295_v40 = vadd.f32 %v2435_v56, %v1599_v54  ;;  %v3263_v61 = vpop.f32.mrb[30].mxu0 }
 0x20c   : > { %v2519_v13 = vadd.f32 %v3294_v41, %v4396_v42  ;;  %v3296_v38 = vadd.f32 %v3263_v61, %v3127_v36  ;;  %v2438_v47 = vpop.f32.mrb[31].mxu0 }
 0x20d   : > { %v2517_v20 = vadd.f32 %v3295_v40, %v4396_v42  ;;  %v3297_v59 = vadd.f32 %v2438_v47, %v1602_v31 }
 0x20e   : > { %v2551_v51 = vmax.f32 %v2519_v13, 0.0  ;;  %v2520_v5 = vadd.f32 %v3296_v38, %v4396_v42 }
 0x20f   : > { %v2549_v33 = vmax.f32 %v2517_v20, 0.0  ;;  %v2518_v63 = vadd.f32 %v3297_v59, %v4396_v42 }
 0x210   : > { %2584 = vst.msk [vmem:[%s4402_s17 + $0xf0] sm:$0xff] %vm2553_vm5, %v2551_v51  ;;  %v2552_v29 = vmax.f32 %v2520_v5, 0.0 }
 0x211   : > { %2582 = vst.msk [vmem:[%s4402_s17 + $0xe0] sm:$0xff] %vm2553_vm5, %v2549_v33  ;;  %v2550_v55 = vmax.f32 %v2518_v63, 0.0 }
 0x212   : > { %2585 = vst.msk [vmem:[%s4402_s17 + $0xf8] sm:$0xff] %vm2553_vm5, %v2552_v29 }
 0x213   : > { %2583 = vst.msk [vmem:[%s4402_s17 + $0xe8] sm:$0xff] %vm2553_vm5, %v2550_v55 }
 0x214 PF: > { %s13_s12 = sadd.s32 1, %s3538_s12  }
 0x215   : > { %p10_p5 = scmp.ge.s32.totalorder %s13_s12, 4  }
 0x217   :  { %12 = sbr.rel (!%p10_p5) target bundleno = 1 (0x1), region = 70 }

// kernel: custom-call
= control target key start
LH: loop header
LB: loop body
LE: loop exit
PB: predicated region body
PF: predicated region fallthrough
CT: control target
= control target key end

     0   :  { %5 = vsyncpa [#allocation9], 0  ;;  %v1086_v0 = vmov 2147483648   ;;  %v1087_v1 = vmov 2147483647   ;;  %s1221_s0 = inlined_call_operand.vmem [shape: f32[2,768], index: 0, kind: input, shape index: {}]   ;;  %s1222_s1 = inlined_call_operand.hbm [shape: f32[2,8], index: 1, kind: output, shape index: {0}]   ;;  %s1223_s2 = inlined_call_operand.vmem [shape: s32[2,8], index: 2, kind: output, shape index: {1}]  }
   0x1   :  { %7 = vst [vmem:[#allocation12] sm:$0xff] %v1086_v0  ;;  %8 = vst [vmem:[#allocation14] sm:$0xff] %v1087_v1 }
   0x2   :  { %v1022_v2 = vld [vmem:[%s1221_s0 + $0x8] sm:$0xf]  ;;  %v43_v3 = vlaneseq  ;;  %v27_v4 = vld [vmem:[%s1221_s0] sm:$0xff]  ;;  %v1088_v5 = vmov 2147483648   ;;  %v1089_v6 = vmov 2147483647  }
   0x3   :  { %39 = vst [vmem:[#allocation16 + $0x8] sm:$0xf] %v1022_v2  ;;  %84 = vst [vmem:[#allocation13] sm:$0xff] %v1088_v5  ;;  %v54_v10 = vsub.s32 2147483647, %v27_v4  ;;  %vm53_vm0 = vcmp.lt.s32.totalorder %v27_v4, 0 }
   0x4   :  { %85 = vst [vmem:[#allocation15] sm:$0xff] %v1089_v6  ;;  %v1118_v7 = vshrl.u32 %v43_v3, 7  ;;  %v44_v8 = vand.u32 127, %v43_v3  ;;  %s1122_s0 = smov 0  }
   0x5   :  { %v55_v13 = vsel %vm53_vm0, %v54_v10, %v27_v4 }
   0x6   :  { %v47_v9 = vshrl.u32 %v1118_v7, 1 }
   0x8   :  { %v49_v11 = vmul.u32 128, %v47_v9 }
   0xa   :  { %v50_v12 = vadd.s32 %v49_v11, %v44_v8  ;;  %v61_v14 = vld [vmem:[#allocation16 + $0x8] sm:$0xff] }
   0xb   :  { %vm62_vm1 = vcmp.lt.s32.totalorder %v61_v14, 0  ;;  %v63_v15 = vsub.s32 2147483647, %v61_v14 }
   0xc   :  { %vm57_vm2 = vcmp.lt.s32.totalorder %v50_v12, 768  ;;  %v65_v16 = vadd.s32 512, %v50_v12  ;;  %79 = vst [vmem:[#allocation17] sm:$0xff] %v50_v12 }
   0xd   :  { %v58_v17 = vsel %vm57_vm2, %v55_v13, 2147483648  ;;  %v64_v18 = vsel %vm62_vm1, %v63_v15, %v61_v14 }
   0xe   :  { %59 = vst [vmem:[#allocation16] sm:$0xff] %v58_v17  ;;  %vm66_vm3 = vcmp.lt.s32.totalorder %v65_v16, 768  ;;  %82 = vst [vmem:[#allocation17 + $0x8] sm:$0xff] %v65_v16 }
   0xf   :  { %v67_v19 = vsel %vm66_vm3, %v64_v18, 2147483648 }
  0x10   :  { %68 = vst [vmem:[#allocation16 + $0x8] sm:$0xff] %v67_v19 }
  0x11 LB: > { %s419_s13 = scalar_lea.vmem [#allocation13], %s1084_s0  ;;  %s421_s14 = scalar_lea.vmem [#allocation15], %s1084_s0  ;;  %s1084_s0 = sphi %s1122_s0, %s92_s0  }
  0x12   : > { %s92_s0 = sadd.s32 1, %s1084_s0  }
  0x13   : > { %v94_v21 = vld [vmem:[#allocation17] sm:$0xff]  ;;  %p89_p2 = scmp.ge.s32.totalorder %s92_s0, 8  }
  0x14   :  { %s1095_s0 = smov (%p89_p2), [#allocation8]  }
  0x15   : > { %v93_v20 = vld [vmem:[#allocation16] sm:$0xff]  ;;  %v99_v23 = vld [vmem:[#allocation17 + $0x8] sm:$0xff] }
  0x16   : > { %vm103_vm6 = vcmp.lt.s32.totalorder %v99_v23, %v94_v21 }
  0x17   : > { %v97_v22 = vld [vmem:[#allocation16 + $0x8] sm:$0xff] }
  0x18   : > { %vm101_vm4 = vcmp.gt.s32.totalorder %v97_v22, %v93_v20  ;;  %vm102_vm5 = vcmp.eq.s32.totalorder %v97_v22, %v93_v20 }
  0x19   : > { %vm104_vm7 = vmand %vm102_vm5, %vm103_vm6 }
  0x1a   : > { %vm105_vm8 = vmor %vm101_vm4, %vm104_vm7 }
  0x1b   : > { %v106_v24 = vsel %vm105_vm8, %v97_v22, %v93_v20  ;;  %v107_v25 = vsel %vm105_vm8, %v99_v23, %v94_v21 }
  0x1c   : > { %v109_v26 = vrot.slane %v106_v24, 2  ;;  %v110_v27 = vrot.slane %v107_v25, 2 }
  0x1e   : > { %vm112_vm9 = vcmp.gt.s32.totalorder %v109_v26, %v106_v24  ;;  %vm113_vm10 = vcmp.eq.s32.totalorder %v109_v26, %v106_v24  ;;  %vm114_vm11 = vcmp.lt.s32.totalorder %v110_v27, %v107_v25 }
  0x1f   : > { %vm115_vm12 = vmand %vm113_vm10, %vm114_vm11 }
  0x20   : > { %vm116_vm13 = vmor %vm112_vm9, %vm115_vm12 }
  0x21   : > { %v117_v28 = vsel %vm116_vm13, %v109_v26, %v106_v24  ;;  %v118_v29 = vsel %vm116_vm13, %v110_v27, %v107_v25 }
  0x22   : > { %v120_v30 = vrot.slane %v117_v28, 2  ;;  %v121_v31 = vrot.slane %v118_v29, 2 }
  0x24   : > { %vm123_vm14 = vcmp.gt.s32.totalorder %v120_v30, %v117_v28  ;;  %vm124_vm15 = vcmp.eq.s32.totalorder %v120_v30, %v117_v28  ;;  %vm125_vm0 = vcmp.lt.s32.totalorder %v121_v31, %v118_v29 }
  0x25   : > { %vm126_vm1 = vmand %vm124_vm15, %vm125_vm0 }
  0x26   : > { %vm127_vm2 = vmor %vm123_vm14, %vm126_vm1 }
  0x27   : > { %v128_v32 = vsel %vm127_vm2, %v120_v30, %v117_v28  ;;  %v129_v33 = vsel %vm127_vm2, %v121_v31, %v118_v29 }
  0x28   : > { %v131_v34 = vrot.slane %v128_v32, 2  ;;  %v132_v35 = vrot.slane %v129_v33, 2 }
  0x2a   : > { %vm134_vm3 = vcmp.gt.s32.totalorder %v131_v34, %v128_v32  ;;  %vm135_vm4 = vcmp.eq.s32.totalorder %v131_v34, %v128_v32  ;;  %vm136_vm5 = vcmp.lt.s32.totalorder %v132_v35, %v129_v33 }
  0x2b   : > { %vm137_vm6 = vmand %vm135_vm4, %vm136_vm5 }
  0x2c   : > { %vm138_vm7 = vmor %vm134_vm3, %vm137_vm6 }
  0x2d   : > { %v140_v36 = vsel %vm138_vm7, %v132_v35, %v129_v33  ;;  %v139_v37 = vsel %vm138_vm7, %v131_v34, %v128_v32 }
  0x2e   : > { %174 = vxpose.xlu1.b32.start [1/16] %v140_v36, 128  ;;  %142 = vxpose.xlu0.b32.start [1/16] %v139_v37, 128 }
  0x32   : > { %175 = vxpose.xlu1.b32.cont [2/16] %v140_v36, 128  ;;  %143 = vxpose.xlu0.b32.cont [2/16] %v139_v37, 128 }
  0x36   : > { %176 = vxpose.xlu1.b32.cont [3/16] %v140_v36, 128  ;;  %144 = vxpose.xlu0.b32.cont [3/16] %v139_v37, 128 }
  0x3a   : > { %177 = vxpose.xlu1.b32.cont [4/16] %v140_v36, 128  ;;  %145 = vxpose.xlu0.b32.cont [4/16] %v139_v37, 128 }
  0x3e   : > { %178 = vxpose.xlu1.b32.cont [5/16] %v140_v36, 128  ;;  %146 = vxpose.xlu0.b32.cont [5/16] %v139_v37, 128 }
  0x42   : > { %179 = vxpose.xlu1.b32.cont [6/16] %v140_v36, 128  ;;  %147 = vxpose.xlu0.b32.cont [6/16] %v139_v37, 128 }
  0x46   : > { %180 = vxpose.xlu1.b32.cont [7/16] %v140_v36, 128  ;;  %148 = vxpose.xlu0.b32.cont [7/16] %v139_v37, 128 }
  0x4a   : > { %181 = vxpose.xlu1.b32.cont [8/16] %v140_v36, 128  ;;  %149 = vxpose.xlu0.b32.cont [8/16] %v139_v37, 128 }
  0x4e   : > { %182 = vxpose.xlu1.b32.cont [9/16] %v140_v36, 128  ;;  %150 = vxpose.xlu0.b32.cont [9/16] %v139_v37, 128 }
  0x52   : > { %183 = vxpose.xlu1.b32.cont [10/16] %v140_v36, 128  ;;  %151 = vxpose.xlu0.b32.cont [10/16] %v139_v37, 128 }
  0x56   : > { %184 = vxpose.xlu1.b32.cont [11/16] %v140_v36, 128  ;;  %152 = vxpose.xlu0.b32.cont [11/16] %v139_v37, 128 }
  0x5a   : > { %185 = vxpose.xlu1.b32.cont [12/16] %v140_v36, 128  ;;  %153 = vxpose.xlu0.b32.cont [12/16] %v139_v37, 128 }
  0x5e   : > { %186 = vxpose.xlu1.b32.cont [13/16] %v140_v36, 128  ;;  %154 = vxpose.xlu0.b32.cont [13/16] %v139_v37, 128 }
  0x62   : > { %187 = vxpose.xlu1.b32.cont [14/16] %v140_v36, 128  ;;  %155 = vxpose.xlu0.b32.cont [14/16] %v139_v37, 128 }
  0x66   : > { %188 = vxpose.xlu1.b32.cont [15/16] %v140_v36, 128  ;;  %156 = vxpose.xlu0.b32.cont [15/16] %v139_v37, 128 }
  0x6a   : > { %189 = vxpose.xlu1.b32.end [16/16] %v140_v36, 128  ;;  %157 = vxpose.xlu0.b32.end [16/16] %v139_v37, 128 }
  0xae   : > { %v190_v38 = vpop.trf.xlu1  ;;  %v158_v39 = vpop.trf.xlu0 }
  0xb2   : > { %v191_v40 = vpop.trf.xlu1  ;;  %v159_v41 = vpop.trf.xlu0 }
  0xb3   : > { %vm210_vm8 = vcmp.lt.s32.totalorder %v191_v40, %v190_v38  ;;  %vm208_vm9 = vcmp.gt.s32.totalorder %v159_v41, %v158_v39  ;;  %vm209_vm10 = vcmp.eq.s32.totalorder %v159_v41, %v158_v39 }
  0xb4   : > { %vm211_vm11 = vmand %vm209_vm10, %vm210_vm8 }
  0xb5   : > { %vm212_vm12 = vmor %vm208_vm9, %vm211_vm11 }
  0xb6   : > { %v213_v42 = vsel %vm212_vm12, %v159_v41, %v158_v39  ;;  %v192_v43 = vpop.trf.xlu1  ;;  %v214_v44 = vsel %vm212_vm12, %v191_v40, %v190_v38  ;;  %v160_v45 = vpop.trf.xlu0 }
  0xb7   : > { %vm219_vm13 = vcmp.lt.s32.totalorder %v192_v43, %v214_v44  ;;  %vm217_vm14 = vcmp.gt.s32.totalorder %v160_v45, %v213_v42  ;;  %vm218_vm15 = vcmp.eq.s32.totalorder %v160_v45, %v213_v42 }
  0xb8   : > { %vm220_vm0 = vmand %vm218_vm15, %vm219_vm13 }
  0xb9   : > { %vm221_vm1 = vmor %vm217_vm14, %vm220_vm0 }
  0xba   : > { %v222_v46 = vsel %vm221_vm1, %v160_v45, %v213_v42  ;;  %v193_v47 = vpop.trf.xlu1  ;;  %v223_v48 = vsel %vm221_vm1, %v192_v43, %v214_v44  ;;  %v161_v49 = vpop.trf.xlu0 }
  0xbb   : > { %vm228_vm2 = vcmp.lt.s32.totalorder %v193_v47, %v223_v48  ;;  %vm226_vm3 = vcmp.gt.s32.totalorder %v161_v49, %v222_v46  ;;  %vm227_vm4 = vcmp.eq.s32.totalorder %v161_v49, %v222_v46 }
  0xbc   : > { %vm229_vm5 = vmand %vm227_vm4, %vm228_vm2 }
  0xbd   : > { %vm230_vm6 = vmor %vm226_vm3, %vm229_vm5 }
  0xbe   : > { %v231_v50 = vsel %vm230_vm6, %v161_v49, %v222_v46  ;;  %v194_v51 = vpop.trf.xlu1  ;;  %v232_v52 = vsel %vm230_vm6, %v193_v47, %v223_v48  ;;  %v162_v53 = vpop.trf.xlu0 }
  0xbf   : > { %vm237_vm7 = vcmp.lt.s32.totalorder %v194_v51, %v232_v52  ;;  %vm235_vm8 = vcmp.gt.s32.totalorder %v162_v53, %v231_v50  ;;  %vm236_vm9 = vcmp.eq.s32.totalorder %v162_v53, %v231_v50 }
  0xc0   : > { %vm238_vm10 = vmand %vm236_vm9, %vm237_vm7 }
  0xc1   : > { %vm239_vm11 = vmor %vm235_vm8, %vm238_vm10 }
  0xc2   : > { %v240_v54 = vsel %vm239_vm11, %v162_v53, %v231_v50  ;;  %v195_v55 = vpop.trf.xlu1  ;;  %v241_v56 = vsel %vm239_vm11, %v194_v51, %v232_v52  ;;  %v163_v57 = vpop.trf.xlu0 }
  0xc3   : > { %vm246_vm12 = vcmp.lt.s32.totalorder %v195_v55, %v241_v56  ;;  %vm244_vm13 = vcmp.gt.s32.totalorder %v163_v57, %v240_v54  ;;  %vm245_vm14 = vcmp.eq.s32.totalorder %v163_v57, %v240_v54 }
  0xc4   : > { %vm247_vm15 = vmand %vm245_vm14, %vm246_vm12 }
  0xc5   : > { %vm248_vm0 = vmor %vm244_vm13, %vm247_vm15 }
  0xc6   : > { %v249_v58 = vsel %vm248_vm0, %v163_v57, %v240_v54  ;;  %v196_v59 = vpop.trf.xlu1  ;;  %v250_v60 = vsel %vm248_vm0, %v195_v55, %v241_v56  ;;  %v164_v61 = vpop.trf.xlu0 }
  0xc7   : > { %vm255_vm1 = vcmp.lt.s32.totalorder %v196_v59, %v250_v60  ;;  %vm253_vm2 = vcmp.gt.s32.totalorder %v164_v61, %v249_v58  ;;  %vm254_vm3 = vcmp.eq.s32.totalorder %v164_v61, %v249_v58 }
  0xc8   : > { %vm256_vm4 = vmand %vm254_vm3, %vm255_vm1 }
  0xc9   : > { %vm257_vm5 = vmor %vm253_vm2, %vm256_vm4 }
  0xca   : > { %v258_v62 = vsel %vm257_vm5, %v164_v61, %v249_v58  ;;  %v197_v63 = vpop.trf.xlu1  ;;  %v259_v0 = vsel %vm257_vm5, %v196_v59, %v250_v60  ;;  %v165_v1 = vpop.trf.xlu0 }
  0xcb   : > { %vm264_vm6 = vcmp.lt.s32.totalorder %v197_v63, %v259_v0  ;;  %vm262_vm7 = vcmp.gt.s32.totalorder %v165_v1, %v258_v62  ;;  %vm263_vm8 = vcmp.eq.s32.totalorder %v165_v1, %v258_v62 }
  0xcc   : > { %vm265_vm9 = vmand %vm263_vm8, %vm264_vm6 }
  0xcd   : > { %vm266_vm10 = vmor %vm262_vm7, %vm265_vm9 }
  0xce   : > { %v267_v2 = vsel %vm266_vm10, %v165_v1, %v258_v62  ;;  %v198_v4 = vpop.trf.xlu1  ;;  %v268_v5 = vsel %vm266_vm10, %v197_v63, %v259_v0  ;;  %v166_v6 = vpop.trf.xlu0 }
  0xcf   : > { %vm273_vm11 = vcmp.lt.s32.totalorder %v198_v4, %v268_v5  ;;  %vm271_vm12 = vcmp.gt.s32.totalorder %v166_v6, %v267_v2  ;;  %vm272_vm13 = vcmp.eq.s32.totalorder %v166_v6, %v267_v2 }
  0xd0   : > { %vm274_vm14 = vmand %vm272_vm13, %vm273_vm11 }
  0xd1   : > { %vm275_vm15 = vmor %vm271_vm12, %vm274_vm14 }
  0xd2   : > { %v276_v8 = vsel %vm275_vm15, %v166_v6, %v267_v2  ;;  %v199_v9 = vpop.trf.xlu1  ;;  %v277_v10 = vsel %vm275_vm15, %v198_v4, %v268_v5  ;;  %v167_v11 = vpop.trf.xlu0  ;;  %v1090_v6 = vmov 2147483648  }
  0xd3   : > { %vm282_vm0 = vcmp.lt.s32.totalorder %v199_v9, %v277_v10  ;;  %vm280_vm1 = vcmp.gt.s32.totalorder %v167_v11, %v276_v8  ;;  %vm281_vm2 = vcmp.eq.s32.totalorder %v167_v11, %v276_v8 }
  0xd4   : > { %vm283_vm3 = vmand %vm281_vm2, %vm282_vm0 }
  0xd5   : > { %vm284_vm4 = vmor %vm280_vm1, %vm283_vm3 }
  0xd6   : > { %v285_v12 = vsel %vm284_vm4, %v167_v11, %v276_v8  ;;  %v200_v13 = vpop.trf.xlu1  ;;  %v286_v14 = vsel %vm284_vm4, %v199_v9, %v277_v10  ;;  %v168_v15 = vpop.trf.xlu0  ;;  %v1091_v8 = vmov 2147483647  }
  0xd7   : > { %vm291_vm5 = vcmp.lt.s32.totalorder %v200_v13, %v286_v14  ;;  %vm289_vm6 = vcmp.gt.s32.totalorder %v168_v15, %v285_v12  ;;  %vm290_vm7 = vcmp.eq.s32.totalorder %v168_v15, %v285_v12 }
  0xd8   : > { %vm292_vm8 = vmand %vm290_vm7, %vm291_vm5 }
  0xd9   : > { %vm293_vm9 = vmor %vm289_vm6, %vm292_vm8 }
  0xda   : > { %v294_v16 = vsel %vm293_vm9, %v168_v15, %v285_v12  ;;  %v201_v17 = vpop.trf.xlu1  ;;  %v295_v18 = vsel %vm293_vm9, %v200_v13, %v286_v14  ;;  %v169_v19 = vpop.trf.xlu0  ;;  %v517_v13 = vld [vmem:[#allocation12] sm:$0xff] (%p89_p2)  ;;  %v518_v14 = vld [vmem:[#allocation14] sm:$0xff] (%p89_p2)  ;;  %v1092_v15 = vmov (%p89_p2), 839939668  }
  0xdb   : > { %vm300_vm10 = vcmp.lt.s32.totalorder %v201_v17, %v295_v18  ;;  %vm298_vm11 = vcmp.gt.s32.totalorder %v169_v19, %v294_v16  ;;  %vm299_vm12 = vcmp.eq.s32.totalorder %v169_v19, %v294_v16 }
  0xdc   : > { %vm301_vm13 = vmand %vm299_vm12, %vm300_vm10 }
  0xdd   : > { %vm302_vm14 = vmor %vm298_vm11, %vm301_vm13 }
  0xde   : > { %v303_v20 = vsel %vm302_vm14, %v169_v19, %v294_v16  ;;  %v202_v21 = vpop.trf.xlu1  ;;  %v304_v22 = vsel %vm302_vm14, %v201_v17, %v295_v18  ;;  %v170_v23 = vpop.trf.xlu0  ;;  %v542_v16 = vunpack.c.l.s4 (%p89_p2), %v1092_v15  ;;  %v1093_v17 = vmov (%p89_p2), 1417023538  }
  0xdf   : > { %vm309_vm15 = vcmp.lt.s32.totalorder %v202_v21, %v304_v22  ;;  %vm307_vm0 = vcmp.gt.s32.totalorder %v170_v23, %v303_v20  ;;  %vm308_vm1 = vcmp.eq.s32.totalorder %v170_v23, %v303_v20  ;;  %v570_v18 = vunpack.c.l.s4 (%p89_p2), %v1093_v17 }
  0xe0   : > { %vm310_vm2 = vmand %vm308_vm1, %vm309_vm15  ;;  %v543_v19 = vunpack.c.0.s8 (%p89_p2), %v542_v16 }
  0xe1   : > { %vm311_vm3 = vmor %vm307_vm0, %vm310_vm2 }
  0xe2   : > { %v312_v24 = vsel %vm311_vm3, %v170_v23, %v303_v20  ;;  %v203_v25 = vpop.trf.xlu1  ;;  %v313_v26 = vsel %vm311_vm3, %v202_v21, %v304_v22  ;;  %v171_v27 = vpop.trf.xlu0  ;;  %v563_v23 = vand.u32 (%p89_p2), 4, %v1118_v7 }
  0xe3   : > { %vm318_vm4 = vcmp.lt.s32.totalorder %v203_v25, %v313_v26  ;;  %vm316_vm5 = vcmp.gt.s32.totalorder %v171_v27, %v312_v24  ;;  %vm317_vm6 = vcmp.eq.s32.totalorder %v171_v27, %v312_v24 }
  0xe4   : > { %vm319_vm7 = vmand %vm317_vm6, %vm318_vm4 }
  0xe5   : > { %vm320_vm8 = vmor %vm316_vm5, %vm319_vm7 }
  0xe6   : > { %v321_v28 = vsel %vm320_vm8, %v171_v27, %v312_v24  ;;  %v204_v29 = vpop.trf.xlu1  ;;  %v322_v30 = vsel %vm320_vm8, %v203_v25, %v313_v26  ;;  %v172_v31 = vpop.trf.xlu0  ;;  %v571_v25 = vunpack.c.0.s8 (%p89_p2), %v570_v18 }
  0xe7   : > { %vm327_vm9 = vcmp.lt.s32.totalorder %v204_v29, %v322_v30  ;;  %vm325_vm10 = vcmp.gt.s32.totalorder %v172_v31, %v321_v28  ;;  %vm326_vm11 = vcmp.eq.s32.totalorder %v172_v31, %v321_v28 }
  0xe8   : > { %vm328_vm12 = vmand %vm326_vm11, %vm327_vm9 }
  0xe9   : > { %vm329_vm13 = vmor %vm325_vm10, %vm328_vm12 }
  0xea   : > { %v330_v32 = vsel %vm329_vm13, %v172_v31, %v321_v28  ;;  %v205_v33 = vpop.trf.xlu1  ;;  %v331_v34 = vsel %vm329_vm13, %v204_v29, %v322_v30  ;;  %v173_v35 = vpop.trf.xlu0  ;;  %v1094_v31 = vmov (%p89_p2), 1732584193  }
  0xeb   : > { %vm336_vm14 = vcmp.lt.s32.totalorder %v205_v33, %v331_v34  ;;  %vm334_vm15 = vcmp.gt.s32.totalorder %v173_v35, %v330_v32  ;;  %vm335_vm0 = vcmp.eq.s32.totalorder %v173_v35, %v330_v32 }
  0xec   : > { %vm337_vm1 = vmand %vm335_vm0, %vm336_vm14 }
  0xed   : > { %vm338_vm2 = vmor %vm334_vm15, %vm337_vm1 }
  0xee   : > { %v339_v36 = vsel %vm338_vm2, %v173_v35, %v330_v32  ;;  %v340_v37 = vsel %vm338_vm2, %v205_v33, %v331_v34  ;;  %v598_v32 = vunpack.c.l.s4 (%p89_p2), %v1094_v31  ;;  %v1147_v33 = vsub.s32 (%p89_p2), %v571_v25, %v1118_v7 }
  0xef   : > { %v342_v38 = vrot.slane %v339_v36, 1  ;;  %v343_v39 = vrot.slane %v340_v37, 1  ;;  %v591_v34 = vand.u32 (%p89_p2), 2, %v1118_v7 }
  0xf1   : > { %vm345_vm3 = vcmp.gt.s32.totalorder %v342_v38, %v339_v36  ;;  %vm346_vm4 = vcmp.eq.s32.totalorder %v342_v38, %v339_v36  ;;  %vm347_vm5 = vcmp.lt.s32.totalorder %v343_v39, %v340_v37 }
  0xf2   : > { %vm348_vm6 = vmand %vm346_vm4, %vm347_vm5 }
  0xf3   : > { %vm349_vm7 = vmor %vm345_vm3, %vm348_vm6 }
  0xf4   : > { %v350_v40 = vsel %vm349_vm7, %v342_v38, %v339_v36  ;;  %v351_v41 = vsel %vm349_vm7, %v343_v39, %v340_v37  ;;  %v599_v37 = vunpack.c.0.s8 (%p89_p2), %v598_v32 }
  0xf5   : > { %v353_v42 = vrot.slane %v350_v40, 1  ;;  %v354_v43 = vrot.slane %v351_v41, 1 }
  0xf7   : > { %vm356_vm8 = vcmp.gt.s32.totalorder %v353_v42, %v350_v40  ;;  %vm357_vm9 = vcmp.eq.s32.totalorder %v353_v42, %v350_v40  ;;  %vm358_vm10 = vcmp.lt.s32.totalorder %v354_v43, %v351_v41 }
  0xf8   : > { %vm359_vm11 = vmand %vm357_vm9, %vm358_vm10 }
  0xf9   : > { %vm360_vm12 = vmor %vm356_vm8, %vm359_vm11 }
  0xfa   : > { %v361_v44 = vsel %vm360_vm12, %v353_v42, %v350_v40  ;;  %v362_v45 = vsel %vm360_vm12, %v354_v43, %v351_v41  ;;  %v1161_v42 = vsub.s32 (%p89_p2), %v599_v37, %v1118_v7 }
  0xfb   : > { %v364_v46 = vrot.slane %v361_v44, 1  ;;  %v365_v47 = vrot.slane %v362_v45, 1 }
  0xfd   : > { %vm369_vm13 = vcmp.lt.s32.totalorder %v365_v47, %v362_v45  ;;  %vm367_vm14 = vcmp.gt.s32.totalorder %v364_v46, %v361_v44  ;;  %vm368_vm15 = vcmp.eq.s32.totalorder %v364_v46, %v361_v44 }
  0xfe   : > { %vm370_vm0 = vmand %vm368_vm15, %vm369_vm13 }
  0xff   : > { %vm371_vm1 = vmor %vm367_vm14, %vm370_vm0 }
 0x100   : > { %v372_v48 = vsel %vm371_vm1, %v364_v46, %v361_v44  ;;  %v373_v49 = vsel %vm371_vm1, %v365_v47, %v362_v45  ;;  %v619_v46 = vand.u32 (%p89_p2), 1, %v1118_v7 }
 0x101   : > { %v375_v50 = vrot.slane %v372_v48, 1  ;;  %v376_v51 = vrot.slane %v373_v49, 1 }
 0x103   : > { %vm378_vm2 = vcmp.gt.s32.totalorder %v375_v50, %v372_v48  ;;  %vm379_vm3 = vcmp.eq.s32.totalorder %v375_v50, %v372_v48  ;;  %vm380_vm4 = vcmp.lt.s32.totalorder %v376_v51, %v373_v49 }
 0x104   : > { %vm381_vm5 = vmand %vm379_vm3, %vm380_vm4 }
 0x105   : > { %vm382_vm6 = vmor %vm378_vm2, %vm381_vm5 }
 0x106   : > { %v383_v52 = vsel %vm382_vm6, %v375_v50, %v372_v48  ;;  %v384_v53 = vsel %vm382_vm6, %v376_v51, %v373_v49 }
 0x107   : > { %v386_v54 = vrot.slane %v383_v52, 1  ;;  %v387_v55 = vrot.slane %v384_v53, 1 }
 0x109   : > { %vm389_vm7 = vcmp.gt.s32.totalorder %v386_v54, %v383_v52  ;;  %vm390_vm8 = vcmp.eq.s32.totalorder %v386_v54, %v383_v52  ;;  %vm391_vm9 = vcmp.lt.s32.totalorder %v387_v55, %v384_v53 }
 0x10a   : > { %vm392_vm10 = vmand %vm390_vm8, %vm391_vm9 }
 0x10b   : > { %vm393_vm11 = vmor %vm389_vm7, %vm392_vm10 }
 0x10c   : > { %v394_v56 = vsel %vm393_vm11, %v386_v54, %v383_v52  ;;  %v395_v57 = vsel %vm393_vm11, %v387_v55, %v384_v53 }
 0x10d   : > { %v397_v58 = vrot.slane %v394_v56, 1  ;;  %v398_v59 = vrot.slane %v395_v57, 1 }
 0x10f   : > { %vm400_vm12 = vcmp.gt.s32.totalorder %v397_v58, %v394_v56  ;;  %vm401_vm13 = vcmp.eq.s32.totalorder %v397_v58, %v394_v56  ;;  %vm402_vm14 = vcmp.lt.s32.totalorder %v398_v59, %v395_v57 }
 0x110   : > { %vm403_vm15 = vmand %vm401_vm13, %vm402_vm14  ;;  %vm1141_vm13 = vcmp.ne.s32.totalorder (%p89_p2), %v563_v23, 0 }
 0x111   : > { %vm404_vm0 = vmor %vm400_vm12, %vm403_vm15 }
 0x112   : > { %v405_v60 = vsel %vm404_vm0, %v397_v58, %v394_v56  ;;  %v406_v61 = vsel %vm404_vm0, %v398_v59, %v395_v57 }
 0x113   : > { %v408_v62 = vrot.slane %v405_v60, 1  ;;  %v409_v63 = vrot.slane %v406_v61, 1 }
 0x115   : > { %vm411_vm1 = vcmp.gt.s32.totalorder %v408_v62, %v405_v60  ;;  %vm412_vm2 = vcmp.eq.s32.totalorder %v408_v62, %v405_v60  ;;  %vm413_vm3 = vcmp.lt.s32.totalorder %v409_v63, %v406_v61 }
 0x116   : > { %vm414_vm4 = vmand %vm412_vm2, %vm413_vm3 }
 0x117   : > { %vm415_vm5 = vmor %vm411_vm1, %vm414_vm4 }
 0x118   : > { %v417_v0 = vsel %vm415_vm5, %v409_v63, %v406_v61  ;;  %v416_v1 = vsel %vm415_vm5, %v408_v62, %v405_v60 }
 0x119   : > { %424 = vxpose.xlu0.b32.start.end [1/1] (short) (narrow) %v417_v0, 8  ;;  %420 = vst [vmem:[%s419_s13] sm:$0x1] %v416_v1  ;;  %422 = vst [vmem:[%s421_s14] sm:$0x1] %v417_v0  ;;  %s958_s13 = sshll.u32 (%p89_p2), %s1095_s0, 4  ;;  %s959_s13 = int_to_ptr.vmem [resolvable:$true] %s958_s13 }
 0x11a   :  { %s1054_s14 = scalar_lea.vmem (%p89_p2), %s959_s13, 32  ;;  %p1059_p4 = scmp.lt.s32.totalorder (%p89_p2), %s959_s13, %s959_s13 }
 0x11b   :  { %p1055_p3 = scmp.ne.s32.totalorder (%p89_p2), %s959_s13, %s1054_s14  ;;  %p1060_p5 = scmp.lt.s32.totalorder (%p89_p2), %s1054_s14, %s1054_s14 }
 0x11d   :  { %p1061_p6 = por (%p89_p2), %p1060_p5, %p1059_p4 }
 0x11f   :  { %p1062_p7 = pnand (%p89_p2), %p1061_p6, %p1055_p3 }
 0x120   :  { %v505_v11 = vld [vmem:[#allocation13 + $0x7] ss:$-1 sm:$0xff] (%p89_p2)  ;;  %v511_v12 = vld [vmem:[#allocation15 + $0x7] ss:$-1 sm:$0xff] (%p89_p2) }
 0x121   :  { %vm523_vm8 = vcmp.gt.s32.totalorder (%p89_p2), %v517_v13, %v505_v11  ;;  %vm524_vm9 = vcmp.eq.s32.totalorder (%p89_p2), %v517_v13, %v505_v11  ;;  %vm525_vm10 = vcmp.lt.s32.totalorder (%p89_p2), %v518_v14, %v511_v12 }
 0x122   :  { %vm526_vm11 = vmand (%p89_p2), %vm524_vm9, %vm525_vm10  ;;  %vm1154_vm9 = vcmp.ne.s32.totalorder (%p89_p2), %v591_v34, 0 }
 0x123   :  { %vm527_vm12 = vmor (%p89_p2), %vm523_vm8, %vm526_vm11 }
 0x124   :  { %v528_v20 = vsel (%p89_p2), %vm527_vm12, %v517_v13, %v505_v11  ;;  %v530_v21 = vsel (%p89_p2), %vm527_vm12, %v505_v11, %v517_v13  ;;  %v532_v22 = vsel (%p89_p2), %vm527_vm12, %v518_v14, %v511_v12  ;;  %v534_v24 = vsel (%p89_p2), %vm527_vm12, %v511_v12, %v518_v14 }
 0x199   : > { %v440_v2 = vpop.trf.xlu0 }
 0x19a   : > { %v479_v4 = vrot.slane %v440_v2, 1  ;;  %1031 = vpush %v440_v2 }
 0x19c   : > { %1033 = vpush %v479_v4 }
 0x1cb   : > { %s1032_s15 = spop %1031 }
 0x1cc   : > { %s457_s16 = sshrl.u32 %s1032_s15, 9  ;;  %s459_s17 = ssub.s32 0, %s1032_s15 }
 0x1cd   : > { %p458_p0 = scmp.lt.s32.totalorder %s1032_s15, 0  ;;  %s1023_s18 = smin.u32 %s1032_s15, %s459_s17 }
 0x1ce   : > { %s461_s19 = sand.u32 511, %s1023_s18   ;;  %s1025_s20 = sshll.u32 %s457_s16, 3 }
 0x1cf   : > { %s462_s21 = ssub.s32 0, %s461_s19  ;;  %s1034_s22 = spop %1033 }
 0x1d0   : > { %s1231_s21 = smov (!%p458_p0, %s462_s21), %s461_s19  ;;  %s483_s26 = ssub.s32 0, %s1034_s22 }
 0x1d1   : > { %s464_s23 = sshrl.u32 %s1231_s21, 7  ;;  %s466_s24 = sand.u32 127, %s1231_s21  }
 0x1d2   : > { %s1024_s25 = sshll.u32 %s464_s23, 8  ;;  %s1027_s28 = smin.u32 %s1034_s22, %s483_s26 }
 0x1d3   : > { %s467_s27 = sadd.s32 %s1024_s25, %s466_s24  ;;  %p482_p1 = scmp.lt.s32.totalorder %s1034_s22, 0 }
 0x1d4   : > { %v469_v5 = vstv %s467_s27  ;;  %s485_s29 = sand.u32 511, %s1027_s28   ;;  %s473_s3 = scalar_lea.vmem [#allocation16], %s1025_s20 }
 0x1d5   : > { %vm471_vm6 = vcmp.eq.s32.totalorder %v43_v3, %v469_v5  ;;  %s486_s30 = ssub.s32 0, %s485_s29  ;;  %s476_s4 = scalar_lea.vmem [#allocation17], %s1025_s20 }
 0x1d6   : > { %474 = vst.msk [vmem:[%s473_s3] sm:$0xff] %vm471_vm6, %v1090_v6  ;;  %477 = vst.msk [vmem:[%s476_s4] sm:$0xff] %vm471_vm6, %v1091_v8  ;;  %s1233_s30 = smov (!%p482_p1, %s486_s30), %s485_s29  ;;  %s481_s5 = sshrl.u32 %s1034_s22, 9 }
 0x1d7   : > { %s488_s6 = sshrl.u32 %s1233_s30, 7  ;;  %s490_s7 = sand.u32 127, %s1233_s30  }
 0x1d8   : > { %s1028_s8 = sshll.u32 %s488_s6, 8  ;;  %s1029_s10 = sshll.u32 %s481_s5, 3 }
 0x1d9   : > { %s491_s9 = sadd.s32 %s1028_s8, %s490_s7  ;;  %s497_s11 = scalar_lea.vmem [#allocation16], %s1029_s10 }
 0x1da   : > { %v493_v9 = vstv %s491_s9  ;;  %s500_s12 = scalar_lea.vmem [#allocation17], %s1029_s10  ;;  %91 = sbr.rel (!%p89_p2) target bundleno = 17 (0x11), region = 107 }
 0x1db   : > { %v494_v10 = vadd.s32 128, %v493_v9 }
 0x1dd   : > { %vm495_vm7 = vcmp.eq.s32.totalorder %v43_v3, %v494_v10  ;;  %v1136_v3 = vsub.s32 (%p89_p2), %v543_v19, %v1118_v7 }
 0x1de   : > { %498 = vst.msk [vmem:[%s497_s11] sm:$0xff] %vm495_vm7, %v1090_v6  ;;  %501 = vst.msk [vmem:[%s500_s12] sm:$0xff] %vm495_vm7, %v1091_v8 }
 0x1df   :  { %v547_v26 = vrot.slane (%p89_p2), %v528_v20, %v1136_v3  ;;  %v554_v27 = vrot.slane (%p89_p2), %v532_v22, %v1136_v3  ;;  %v728_v28 = vrot.slane (%p89_p2), %v530_v21, %v1136_v3  ;;  %v735_v30 = vrot.slane (%p89_p2), %v534_v24, %v1136_v3 }
 0x1e1   :  { %vm556_vm14 = vcmp.gt.s32.totalorder %v528_v20, %v547_v26  ;;  %vm557_vm15 = vcmp.eq.s32.totalorder %v528_v20, %v547_v26  ;;  %vm558_vm0 = vcmp.lt.s32.totalorder %v532_v22, %v554_v27  ;;  %vm738_vm2 = vcmp.eq.s32.totalorder %v530_v21, %v728_v28 }
 0x1e2   :  { %vm559_vm1 = vmand %vm557_vm15, %vm558_vm0  ;;  %vm739_vm3 = vcmp.lt.s32.totalorder %v534_v24, %v735_v30  ;;  %vm737_vm5 = vcmp.gt.s32.totalorder %v530_v21, %v728_v28 }
 0x1e3   :  { %vm560_vm4 = vmor %vm556_vm14, %vm559_vm1 }
 0x1e4   :  { %vm565_vm6 = vmxor %vm560_vm4, %vm1141_vm13 }
 0x1e5   :  { %v566_v35 = vsel %vm565_vm6, %v528_v20, %v547_v26  ;;  %v567_v36 = vsel %vm565_vm6, %v532_v22, %v554_v27  ;;  %vm740_vm7 = vmand %vm738_vm2, %vm739_vm3 }
 0x1e6   :  { %v575_v38 = vrot.slane %v566_v35, %v1147_v33  ;;  %v582_v39 = vrot.slane %v567_v36, %v1147_v33  ;;  %vm741_vm8 = vmor %vm737_vm5, %vm740_vm7 }
 0x1e7   :  { %vm746_vm10 = vmxor %vm741_vm8, %vm1141_vm13 }
 0x1e8   :  { %vm584_vm11 = vcmp.gt.s32.totalorder %v566_v35, %v575_v38  ;;  %vm585_vm12 = vcmp.eq.s32.totalorder %v566_v35, %v575_v38  ;;  %vm586_vm14 = vcmp.lt.s32.totalorder %v567_v36, %v582_v39  ;;  %v747_v41 = vsel %vm746_vm10, %v530_v21, %v728_v28 }
 0x1e9   :  { %vm587_vm15 = vmand %vm585_vm12, %vm586_vm14  ;;  %v748_v43 = vsel %vm746_vm10, %v534_v24, %v735_v30  ;;  %v756_v44 = vrot.slane %v747_v41, %v1147_v33 }
 0x1ea   :  { %vm588_vm0 = vmor %vm584_vm11, %vm587_vm15  ;;  %v763_v45 = vrot.slane %v748_v43, %v1147_v33  ;;  %vm1170_vm11 = vcmp.ne.s32.totalorder %v619_v46, 0 }
 0x1eb   :  { %vm593_vm1 = vmxor %vm588_vm0, %vm1154_vm9  ;;  %vm765_vm2 = vcmp.gt.s32.totalorder %v747_v41, %v756_v44  ;;  %vm766_vm3 = vcmp.eq.s32.totalorder %v747_v41, %v756_v44 }
 0x1ec   :  { %v594_v47 = vsel %vm593_vm1, %v566_v35, %v575_v38  ;;  %v595_v48 = vsel %vm593_vm1, %v567_v36, %v582_v39  ;;  %vm767_vm4 = vcmp.lt.s32.totalorder %v748_v43, %v763_v45 }
 0x1ed   :  { %v603_v49 = vrot.slane %v594_v47, %v1161_v42  ;;  %v610_v50 = vrot.slane %v595_v48, %v1161_v42  ;;  %vm768_vm5 = vmand %vm766_vm3, %vm767_vm4 }
 0x1ee   :  { %vm769_vm6 = vmor %vm765_vm2, %vm768_vm5 }
 0x1ef   :  { %vm612_vm7 = vcmp.gt.s32.totalorder %v594_v47, %v603_v49  ;;  %vm613_vm8 = vcmp.eq.s32.totalorder %v594_v47, %v603_v49  ;;  %vm614_vm10 = vcmp.lt.s32.totalorder %v595_v48, %v610_v50  ;;  %vm774_vm12 = vmxor %vm769_vm6, %vm1154_vm9 }
 0x1f0   :  { %vm615_vm14 = vmand %vm613_vm8, %vm614_vm10  ;;  %v775_v7 = vsel %vm774_vm12, %v747_v41, %v756_v44  ;;  %v776_v52 = vsel %vm774_vm12, %v748_v43, %v763_v45 }
 0x1f1   :  { %vm616_vm15 = vmor %vm612_vm7, %vm615_vm14  ;;  %v784_v53 = vrot.slane %v775_v7, %v1161_v42  ;;  %v791_v54 = vrot.slane %v776_v52, %v1161_v42 }
 0x1f2   :  { %vm621_vm0 = vmxor %vm616_vm15, %vm1170_vm11 }
 0x1f3   :  { %v622_v55 = vsel %vm621_vm0, %v594_v47, %v603_v49  ;;  %v623_v56 = vsel %vm621_vm0, %v595_v48, %v610_v50  ;;  %vm793_vm1 = vcmp.gt.s32.totalorder %v775_v7, %v784_v53  ;;  %vm794_vm2 = vcmp.eq.s32.totalorder %v775_v7, %v784_v53 }
 0x1f4   :  { %v637_v57 = vrot.slane %v622_v55, %v1136_v3  ;;  %v644_v58 = vrot.slane %v623_v56, %v1136_v3  ;;  %vm795_vm3 = vcmp.lt.s32.totalorder %v776_v52, %v791_v54 }
 0x1f5   :  { %vm796_vm4 = vmand %vm794_vm2, %vm795_vm3 }
 0x1f6   :  { %vm646_vm5 = vcmp.gt.s32.totalorder %v622_v55, %v637_v57  ;;  %vm647_vm6 = vcmp.eq.s32.totalorder %v622_v55, %v637_v57  ;;  %vm648_vm7 = vcmp.lt.s32.totalorder %v623_v56, %v644_v58  ;;  %vm797_vm8 = vmor %vm793_vm1, %vm796_vm4 }
 0x1f7   :  { %vm649_vm10 = vmand %vm647_vm6, %vm648_vm7 }
 0x1f8   :  { %vm650_vm12 = vmor %vm646_vm5, %vm649_vm10 }
 0x1f9   :  { %vm655_vm14 = vmxor %vm650_vm12, %vm1141_vm13 }
 0x1fa   :  { %v656_v59 = vsel %vm655_vm14, %v622_v55, %v637_v57  ;;  %v657_v60 = vsel %vm655_vm14, %v623_v56, %v644_v58  ;;  %vm802_vm15 = vmxor %vm797_vm8, %vm1170_vm11 }
 0x1fb   :  { %v665_v61 = vrot.slane %v656_v59, %v1147_v33  ;;  %v672_v62 = vrot.slane %v657_v60, %v1147_v33  ;;  %v803_v63 = vsel %vm802_vm15, %v775_v7, %v784_v53  ;;  %v804_v0 = vsel %vm802_vm15, %v776_v52, %v791_v54 }
 0x1fc   :  { %v818_v1 = vrot.slane %v803_v63, %v1136_v3  ;;  %v825_v2 = vrot.slane %v804_v0, %v1136_v3 }
 0x1fd   :  { %vm674_vm0 = vcmp.gt.s32.totalorder %v656_v59, %v665_v61  ;;  %vm675_vm1 = vcmp.eq.s32.totalorder %v656_v59, %v665_v61  ;;  %vm676_vm2 = vcmp.lt.s32.totalorder %v657_v60, %v672_v62 }
 0x1fe   :  { %vm677_vm3 = vmand %vm675_vm1, %vm676_vm2  ;;  %vm828_vm4 = vcmp.eq.s32.totalorder %v803_v63, %v818_v1  ;;  %vm829_vm5 = vcmp.lt.s32.totalorder %v804_v0, %v825_v2  ;;  %vm827_vm7 = vcmp.gt.s32.totalorder %v803_v63, %v818_v1 }
 0x1ff   :  { %vm678_vm6 = vmor %vm674_vm0, %vm677_vm3 }
 0x200   :  { %vm683_vm8 = vmxor %vm678_vm6, %vm1154_vm9 }
 0x201   :  { %v684_v4 = vsel %vm683_vm8, %v656_v59, %v665_v61  ;;  %v685_v5 = vsel %vm683_vm8, %v657_v60, %v672_v62  ;;  %vm830_vm10 = vmand %vm828_vm4, %vm829_vm5 }
 0x202   :  { %v693_v6 = vrot.slane %v684_v4, %v1161_v42  ;;  %v700_v8 = vrot.slane %v685_v5, %v1161_v42  ;;  %vm831_vm12 = vmor %vm827_vm7, %vm830_vm10 }
 0x203   :  { %vm836_vm14 = vmxor %vm831_vm12, %vm1141_vm13 }
 0x204   :  { %vm702_vm15 = vcmp.gt.s32.totalorder %v684_v4, %v693_v6  ;;  %vm703_vm1 = vcmp.eq.s32.totalorder %v684_v4, %v693_v6  ;;  %vm704_vm2 = vcmp.lt.s32.totalorder %v685_v5, %v700_v8  ;;  %v837_v9 = vsel %vm836_vm14, %v803_v63, %v818_v1 }
 0x205   :  { %vm705_vm0 = vmand %vm703_vm1, %vm704_vm2  ;;  %v838_v10 = vsel %vm836_vm14, %v804_v0, %v825_v2  ;;  %v846_v11 = vrot.slane %v837_v9, %v1147_v33 }
 0x206   :  { %vm706_vm3 = vmor %vm702_vm15, %vm705_vm0  ;;  %v853_v12 = vrot.slane %v838_v10, %v1147_v33 }
 0x207   :  { %vm711_vm4 = vmxor %vm706_vm3, %vm1170_vm11  ;;  %vm855_vm5 = vcmp.gt.s32.totalorder %v837_v9, %v846_v11  ;;  %vm856_vm6 = vcmp.eq.s32.totalorder %v837_v9, %v846_v11 }
 0x208   :  { %v712_v13 = vsel %vm711_vm4, %v684_v4, %v693_v6  ;;  %v713_v14 = vsel %vm711_vm4, %v685_v5, %v700_v8  ;;  %vm857_vm7 = vcmp.lt.s32.totalorder %v838_v10, %v853_v12 }
 0x209   :  { %715 = vst [vmem:[#allocation12] sm:$0xff] %v712_v13  ;;  %716 = vst [vmem:[#allocation14] sm:$0xff] %v713_v14 }
 0x20a   :  { %vm858_vm13 = vmand %vm856_vm6, %vm857_vm7 }
 0x20b   :  { %vm859_vm8 = vmor %vm855_vm5, %vm858_vm13 }
 0x20c   :  { %vm864_vm10 = vmxor %vm859_vm8, %vm1154_vm9 }
 0x20d   :  { %v865_v15 = vsel %vm864_vm10, %v837_v9, %v846_v11  ;;  %v866_v16 = vsel %vm864_vm10, %v838_v10, %v853_v12 }
 0x20e   :  { %v874_v17 = vrot.slane %v865_v15, %v1161_v42  ;;  %v881_v18 = vrot.slane %v866_v16, %v1161_v42 }
 0x210   :  { %vm883_vm12 = vcmp.gt.s32.totalorder %v865_v15, %v874_v17  ;;  %vm884_vm14 = vcmp.eq.s32.totalorder %v865_v15, %v874_v17  ;;  %vm885_vm15 = vcmp.lt.s32.totalorder %v866_v16, %v881_v18  ;;  %v923_v21 = vld [vmem:[#allocation14] sm:$0xff]  ;;  %v899_v22 = vld [vmem:[#allocation12] sm:$0xff] }
 0x211   :  { %vm886_vm1 = vmand %vm884_vm14, %vm885_vm15  ;;  %924 = vxpose.xlu0.b32.start.end [1/1] (short) (narrow) %v923_v21, 8  ;;  %vm900_vm9 = vcmp.lt.s32.totalorder %v899_v22, 0  ;;  %v901_v23 = vsub.s32 2147483647, %v899_v22 }
 0x212   :  { %vm887_vm2 = vmor %vm883_vm12, %vm886_vm1 }
 0x213   :  { %vm892_vm0 = vmxor %vm887_vm2, %vm1170_vm11  ;;  %v902_v24 = vsel %vm900_vm9, %v901_v23, %v899_v22 }
 0x214   :  { %v893_v19 = vsel %vm892_vm0, %v865_v15, %v874_v17  ;;  %v894_v20 = vsel %vm892_vm0, %v866_v16, %v881_v18  ;;  %903 = vst [vmem:[#allocation12] sm:$0xff] %v902_v24 }
 0x215   :  { %896 = vst [vmem:[#allocation13] sm:$0xff] %v893_v19  ;;  %897 = vst [vmem:[#allocation15] sm:$0xff] %v894_v20  ;;  %905 = vxpose.xlu0.b32.start.end [1/1] (short) (narrow) %v902_v24, 8 }
 0x291   :  { %v925_v3 = vpop.trf.xlu0 }
 0x292   :  { %941 = vst [vmem:[#allocation10] sm:$0xff] %v925_v3 }
 0x295   :  { %v906_v25 = vpop.trf.xlu0 }
 0x296   :  { %922 = vst [vmem:[#allocation7] sm:$0xff] %v906_v25 }
 0x299   :  { %v951_v26 = vld [vmem:[#allocation10] sm:$0x3] }
 0x29a   :  { %953 = vst [vmem:[#allocation11] sm:$0x3] %v951_v26 }
 0x29d   :  { %v945_v27 = vld [vmem:[#allocation7] sm:$0x3] }
 0x29e   :  { %947 = vst [vmem:[#allocation8] sm:$0x3] %v945_v27 }
 0x29f   :  { %1065 = shalt.err (!%p1062_p7)
}
 0x2a0   :  { %s1066_s17 = scalar_lea.hbm %s1222_s1, 32 }
 0x2a1   :  { %p1067_p8 = scmp.ne.s32.totalorder %s1222_s1, %s1066_s17  ;;  %p1070_p9 = scmp.lt.u32.totalorder %s1066_s17, %s1222_s1 }
 0x2a3   :  { %p1072_p10 = pnand %p1070_p9, %p1067_p8 }
 0x2a5   :  { %1075 = shalt.err (!%p1072_p10)
}
 0x2a6   :  { %961 = dma.vmem_to_hbm [thread:$0]  %s959_s13, 32, %s1222_s1, [#allocation9]   ;;  %v977_v28 = vld [vmem:[#allocation11] sm:$0x3] }
 0x2a7   :  { %978 = vst [vmem:[%s1223_s2] sm:$0x3] %v977_v28 }
 0x2a8   :  { %1080 = dma.done.wait [#allocation9], 32  }
 0x2a9   :  { %1081 = vsyncadd [#allocation9], 4294967264 }
 0x2aa   :  { %994 = vsyncpa [#allocation9], 1 }

// kernel: faster_rcnn_forward.9
= control target key start
LH: loop header
LB: loop body
LE: loop exit
PB: predicated region body
PF: predicated region fallthrough
CT: control target
= control target key end

     0   :  { %s3544_s12 = smov 0   ;;  %s4509_s0 = inlined_call_operand.vmem [shape: f32[2,18,18,16], index: 0, kind: input, shape index: {}]   ;;  %s4510_s1 = inlined_call_operand.vmem [shape: f32[9,16,16], index: 1, kind: input, shape index: {}]   ;;  %s4511_s2 = inlined_call_operand.vmem [shape: f32[1,16], index: 2, kind: input, shape index: {}]   ;;  %s4512_s3 = inlined_call_operand.vmem [shape: f32[512,16], index: 3, kind: output, shape index: {}]  }
   0x1 LB: > { %s3550_s13 = sadd.s32 4294967295, %s3522_s12   ;;  %p2623_p0 = scmp.ge.s32.totalorder %s3522_s12, 1  ;;  %s3522_s12 = sphi %s3544_s12, %s13_s12  }
   0x2   : > { %p137_p1 = scmp.lt.s32.totalorder %s3522_s12, 3 }
   0x4   : > { %p138_p2 = pnand %p2623_p0, %p137_p1 }
   0x6   : > { %141 = sbr.rel (%p138_p2) target bundleno = 532 (0x214), region = 32 }
   0xd   : > { %v2627_v0 = vld [vmem:[%s4510_s1 + $0x10] sm:$0xff]  ;;  %v2628_v1 = vld [vmem:[%s4510_s1 + $0x18] sm:$0xff]  ;;  %v2697_v2 = vld [vmem:[%s4510_s1 + $0x40] sm:$0xff]  ;;  %p161_p3 = scmp.lt.s32.totalorder %s3550_s13, 1  ;;  %vm294_vm0 = vcmask 1046528   ;;  %vm427_vm1 = vcmask 130048  }
   0xe   : > { %v426_v3 = vpack.c.bf16 %v2628_v1, %v2627_v0  ;;  %v2698_v4 = vld [vmem:[%s4510_s1 + $0x48] sm:$0xff]  ;;  %v243_v5 = vld [vmem:[%s4510_s1] sm:$0xff]  ;;  %v2715_v9 = vld [vmem:[%s4510_s1 + $0x50] sm:$0xff]  ;;  %vm846_vm2 = vcmask 1045504   ;;  %s2625_s30 = sshll.u32 %s3550_s13, 5 }
   0xf   : > { %v244_v6 = vld [vmem:[%s4510_s1 + $0x8] sm:$0xff]  ;;  %v3573_v7 = vpack.c.bf16 %v2698_v4, %v2697_v2  ;;  %s162_s26 = scalar_select %p161_p3, %s3550_s13, 1  ;;  %v2716_v10 = vld [vmem:[%s4510_s1 + $0x58] sm:$0xff]  ;;  %v2733_v24 = vld [vmem:[%s4510_s1 + $0x60] sm:$0xff] }
  0x10   : > { %v3576_v8 = vpack.c.bf16 %v244_v6, %v243_v5  ;;  %2943 = vmatprep.subr.bf16.mxu1 %v426_v3  ;;  %v3584_v11 = vpack.c.bf16 %v2716_v10, %v2715_v9  ;;  %v2661_v25 = vld [vmem:[%s4510_s1 + $0x20] sm:$0xff]  ;;  %v2662_v32 = vld [vmem:[%s4510_s1 + $0x28] sm:$0xff]  ;;  %p167_p4 = scmp.lt.s32.totalorder %s2625_s30, 63 }
  0x11   : > { %4538 = vst [vmem:[#allocation2_spill] sm:$0xff] %v3573_v7  ;;  %3079 = vmatprep.subr.bf16.mxu0 %v3573_v7  ;;  %2944 = vmatpush3.bf16.msra.mxu1 %v426_v3  ;;  %s3507_s4 = smul.u32 432, %s162_s26  ;;  %v2734_v36 = vld [vmem:[%s4510_s1 + $0x68] sm:$0xff]  ;;  %v3673_v48 = vpack.c.bf16 %v2662_v32, %v2661_v25 }
  0x12   : > { %3080 = vmatpush3.bf16.msra.mxu0 %v3573_v7  ;;  %2977 = vmatprep.subr.bf16.mxu1 %v3576_v8  ;;  %v3684_v54 = vpack.c.bf16 %v2734_v36, %v2733_v24  ;;  %s4571_s30 = smov (!%p167_p4, %s2625_s30), 63 }
  0x13   : > { %s3592_s7 = scalar_lea.vmem %s4509_s0, %s3507_s4  ;;  %3113 = vmatprep.subr.bf16.mxu0 %v3584_v11  ;;  %s2626_s6 = sshll.u32 %s4571_s30, 3 }
  0x14   : > { %v3596_v12 = vld [vmem:[%s3592_s7] sm:$0xff]  ;;  %v3599_v13 = vld [vmem:[%s3592_s7 + $0x8] sm:$0xff]  ;;  %v3602_v14 = vld [vmem:[%s3592_s7 + $0x10] sm:$0x3]  ;;  %s4405_s8 = scalar_lea.vmem %s4512_s3, %s2626_s6 }
  0x15   : > { %v295_v15 = vrot.slane %v3596_v12, 1  ;;  %v296_v16 = vrot.slane %v3599_v13, 1  ;;  %v298_v17 = vrot.slane %v3602_v14, 1  ;;  %v3608_v18 = vld [vmem:[%s3592_s7 + $0x18] sm:$0xff]  ;;  %v3611_v19 = vld [vmem:[%s3592_s7 + $0x20] sm:$0xff]  ;;  %v3622_v23 = vld [vmem:[%s3592_s7 + $0x30] sm:$0xff] }
  0x16   : > { %v3614_v20 = vld [vmem:[%s3592_s7 + $0x28] sm:$0x3]  ;;  %v3618_v21 = vpack.c.bf16 %v3611_v19, %v3608_v18  ;;  %v300_v22 = vrot.slane %v3608_v18, 1  ;;  %v301_v28 = vrot.slane %v3611_v19, 1  ;;  %v3635_v30 = vld [vmem:[%s3592_s7 + $0x38] sm:$0xff]  ;;  %v3647_v35 = vld [vmem:[%s3592_s7 + $0x50] sm:$0xff] }
  0x17   : > { %v297_v26 = vsel %vm294_vm0, %v295_v15, %v296_v16  ;;  %v299_v27 = vsel %vm294_vm0, %v296_v16, %v298_v17  ;;  %v303_v29 = vrot.slane %v3614_v20, 1  ;;  %v3638_v31 = vld [vmem:[%s3592_s7 + $0x40] sm:$0x3]  ;;  %v3644_v34 = vld [vmem:[%s3592_s7 + $0x48] sm:$0xff]  ;;  %v305_v39 = vrot.slane %v3622_v23, 1  ;;  %v3671_v47 = vld [vmem:[%s3592_s7 + $0x78] sm:$0xff] }
  0x18   : > { %v407_v33 = vpack.c.bf16 %v299_v27, %v297_v26  ;;  %v302_v37 = vsel %vm294_vm0, %v300_v22, %v301_v28  ;;  %v306_v40 = vrot.slane %v3635_v30, 1  ;;  %v3657_v41 = vld [vmem:[%s3592_s7 + $0x58] sm:$0x3]  ;;  %v3660_v42 = vld [vmem:[%s3592_s7 + $0x60] sm:$0xff]  ;;  %v3663_v43 = vld [vmem:[%s3592_s7 + $0x68] sm:$0xff]  ;;  %v308_v45 = vrot.slane %v3638_v31, 1 }
  0x19   : > { %v304_v38 = vsel %vm294_vm0, %v301_v28, %v303_v29  ;;  %v3668_v46 = vld [vmem:[%s3592_s7 + $0x70] sm:$0x3]  ;;  %v310_v50 = vrot.slane %v3644_v34, 1  ;;  %v311_v51 = vrot.slane %v3647_v35, 1  ;;  %v3679_v52 = vld [vmem:[%s3592_s7 + $0x80] sm:$0xff]  ;;  %v313_v56 = vrot.slane %v3657_v41, 1 }
  0x1a   : > { %2945 = vmatprep.mubr.msk.bf16.mxu1 %vm427_vm1, %v407_v33  ;;  %v408_v44 = vpack.c.bf16 %v304_v38, %v302_v37  ;;  %v307_v49 = vsel %vm294_vm0, %v305_v39, %v306_v40  ;;  %v3682_v53 = vld [vmem:[%s3592_s7 + $0x88] sm:$0x3]  ;;  %v309_v55 = vsel %vm294_vm0, %v306_v40, %v308_v45  ;;  %v315_v57 = vrot.slane %v3660_v42, 1  ;;  %v3719_v9 = vld [vmem:[%s3592_s7 + $0x98] sm:$0xff]  ;;  %v3722_v10 = vld [vmem:[%s3592_s7 + $0xa0] sm:$0x3] }
  0x1b   : > { %v316_v58 = vrot.slane %v3663_v43, 1  ;;  %v3693_v59 = vpack.c.bf16 %v309_v55, %v307_v49  ;;  %v312_v60 = vsel %vm294_vm0, %v310_v50, %v311_v51  ;;  %v318_v61 = vrot.slane %v3668_v46, 1  ;;  %v3729_v15 = vld [vmem:[%s3592_s7 + $0xb0] sm:$0xff]  ;;  %v3732_v16 = vld [vmem:[%s3592_s7 + $0xb8] sm:$0x3]  ;;  %v3755_v36 = vld [vmem:[%s3592_s7 + $0xc0] sm:$0xff] }
  0x1c   : > { %3081 = vmatprep.mubr.msk.bf16.mxu0 %vm427_vm1, %v408_v44  ;;  %2946 = vmatmul.mubr.msk.bf16.vlgmr.msra.gmra.mrb[0].mxu1 %vm427_vm1, %v408_v44  ;;  %v320_v62 = vrot.slane %v3671_v47, 1  ;;  %v314_v63 = vsel %vm294_vm0, %v311_v51, %v313_v56  ;;  %v321_v0 = vrot.slane %v3679_v52, 1  ;;  %v323_v1 = vrot.slane %v3682_v53, 1  ;;  %v3758_v37 = vld [vmem:[%s3592_s7 + $0xc8] sm:$0xff]  ;;  %v3763_v40 = vld [vmem:[%s3592_s7 + $0xd0] sm:$0x3] }
  0x1d   : > { %2978 = vmatpush3.bf16.msra.mxu1 %v3576_v8  ;;  %4539 = vst [vmem:[#allocation3_spill] sm:$0xff] %v3693_v59  ;;  %3082 = vmatmul.mubr.msk.bf16.vlgmr.msra.gmra.mrb[0].mxu0 %vm427_vm1, %v3693_v59  ;;  %v3706_v2 = vpack.c.bf16 %v314_v63, %v312_v60  ;;  %v317_v3 = vsel %vm294_vm0, %v315_v57, %v316_v58  ;;  %v3716_v8 = vld [vmem:[%s3592_s7 + $0x90] sm:$0xff]  ;;  %v326_v25 = vrot.slane %v3719_v9, 1  ;;  %v328_v26 = vrot.slane %v3722_v10, 1  ;;  %v3786_v57 = vld [vmem:[%s3592_s7 + $0xe8] sm:$0x3] }
  0x1e   : > { %3011 = vmatprep.subr.bf16.mxu1 %v3673_v48  ;;  %2949 = vmatprep.mubr.msk.bf16.mxu1 %vm427_vm1, %v3693_v59  ;;  %v319_v4 = vsel %vm294_vm0, %v316_v58, %v318_v61  ;;  %v322_v5 = vsel %vm294_vm0, %v320_v62, %v321_v0  ;;  %v324_v6 = vsel %vm294_vm0, %v321_v0, %v323_v1  ;;  %v325_v24 = vrot.slane %v3716_v8, 1  ;;  %v3791_v61 = vld [vmem:[%s3592_s7 + $0xf0] sm:$0xff]  ;;  %v3794_v62 = vld [vmem:[%s3592_s7 + $0xf8] sm:$0xff] }
  0x1f   : > { %4540 = vst [vmem:[#allocation4_spill] sm:$0xff] %v3706_v2  ;;  %3114 = vmatpush3.bf16.msra.mxu0 %v3584_v11  ;;  %3085 = vmatprep.mubr.msk.bf16.mxu0 %vm427_vm1, %v3706_v2  ;;  %v3726_v11 = vld [vmem:[%s3592_s7 + $0xa8] sm:$0xff]  ;;  %v3734_v17 = vpack.c.bf16 %v319_v4, %v317_v3  ;;  %v3738_v22 = vpack.c.bf16 %v324_v6, %v322_v5  ;;  %v331_v28 = vrot.slane %v3729_v15, 1  ;;  %v333_v29 = vrot.slane %v3732_v16, 1  ;;  %v3803_v4 = vld [vmem:[%s3592_s7 + $0x100] sm:$0x3] }
  0x20   : > { %3147 = vmatprep.subr.bf16.mxu0 %v3684_v54  ;;  %v330_v27 = vrot.slane %v3726_v11, 1  ;;  %v327_v32 = vsel %vm294_vm0, %v325_v24, %v326_v25  ;;  %v329_v33 = vsel %vm294_vm0, %v326_v25, %v328_v26  ;;  %v852_v44 = vrot.slane %v3608_v18, 2 }
  0x21   : > { %4541 = vst [vmem:[#allocation5_spill] sm:$0xff] %v3734_v17  ;;  %4542 = vst [vmem:[#allocation6_spill] sm:$0xff] %v3738_v22  ;;  %v334_v39 = vsel %vm294_vm0, %v331_v28, %v333_v29  ;;  %v853_v45 = vrot.slane %v3611_v19, 2  ;;  %v855_v49 = vrot.slane %v3614_v20, 2  ;;  %v3768_v50 = vpack.c.bf16 %v329_v33, %v327_v32  ;;  %v3780_v19 = vld [vmem:[%s3592_s7 + $0xd8] sm:$0xff]  ;;  %v3783_v20 = vld [vmem:[%s3592_s7 + $0xe0] sm:$0xff] }
  0x22   : > { %v332_v38 = vsel %vm294_vm0, %v330_v27, %v331_v28  ;;  %v335_v51 = vrot.slane %v3755_v36, 1  ;;  %v336_v55 = vrot.slane %v3758_v37, 1  ;;  %v338_v18 = vrot.slane %v3763_v40, 1  ;;  %v3819_v32 = vld [vmem:[%s3592_s7 + $0x108] sm:$0xff]  ;;  %v3822_v33 = vld [vmem:[%s3592_s7 + $0x110] sm:$0xff] }
  0x23   : > { %4543 = vst [vmem:[#allocation7_spill] sm:$0xff] %v3768_v50  ;;  %v3774_v56 = vpack.c.bf16 %v334_v39, %v332_v38  ;;  %v857_v58 = vrot.slane %v3622_v23, 2  ;;  %v858_v60 = vrot.slane %v3635_v30, 2  ;;  %v860_v63 = vrot.slane %v3638_v31, 2  ;;  %v3825_v38 = vld [vmem:[%s3592_s7 + $0x118] sm:$0x3] }
  0x24   : > { %2950 = vmatmul.mubr.msk.bf16.gmra.mrb[4].mxu1 %vm427_vm1, %v3706_v2  ;;  %v337_v0 = vsel %vm294_vm0, %v335_v51, %v336_v55  ;;  %v854_v1 = vsel %vm846_vm2, %v852_v44, %v853_v45  ;;  %v856_v3 = vsel %vm846_vm2, %v853_v45, %v855_v49  ;;  %v339_v5 = vsel %vm294_vm0, %v336_v55, %v338_v18  ;;  %v3834_v51 = vld [vmem:[%s3592_s7 + $0x120] sm:$0xff] }
  0x25   : > { %2953 = vmatprep.mubr.msk.bf16.mxu1 %vm427_vm1, %v3734_v17  ;;  %3086 = vmatmul.mubr.msk.bf16.gmra.mrb[4].mxu0 %vm427_vm1, %v3734_v17  ;;  %4544 = vst [vmem:[#allocation8_spill] sm:$0xff] %v3774_v56  ;;  %v340_v31 = vrot.slane %v3780_v19, 1  ;;  %v341_v6 = vrot.slane %v3783_v20, 1  ;;  %v343_v24 = vrot.slane %v3786_v57, 1  ;;  %v345_v25 = vrot.slane %v3791_v61, 1 }
  0x26   : > { %3089 = vmatprep.mubr.msk.bf16.mxu0 %vm427_vm1, %v3738_v22  ;;  %v346_v26 = vrot.slane %v3794_v62, 1  ;;  %v348_v27 = vrot.slane %v3803_v4, 1  ;;  %v3814_v28 = vpack.c.bf16 %v339_v5, %v337_v0  ;;  %v3816_v29 = vpack.c.bf16 %v856_v3, %v854_v1  ;;  %v3843_v3 = vld [vmem:[%s3592_s7 + $0x128] sm:$0xff]  ;;  %v3846_v5 = vld [vmem:[%s3592_s7 + $0x130] sm:$0x3] }
  0x27   : > { %v342_v39 = vsel %vm294_vm0, %v340_v31, %v341_v6  ;;  %v344_v44 = vsel %vm294_vm0, %v341_v6, %v343_v24  ;;  %v859_v45 = vsel %vm846_vm2, %v857_v58, %v858_v60  ;;  %v861_v49 = vsel %vm846_vm2, %v858_v60, %v860_v63 }
  0x28   : > { %4545 = vst [vmem:[#allocation9_spill] sm:$0xff] %v3814_v28  ;;  %v347_v55 = vsel %vm294_vm0, %v345_v25, %v346_v26  ;;  %v862_v18 = vrot.slane %v3644_v34, 2  ;;  %v863_v0 = vrot.slane %v3647_v35, 2  ;;  %v865_v1 = vrot.slane %v3657_v41, 2 }
  0x29   : > { %v349_v58 = vsel %vm294_vm0, %v346_v26, %v348_v27  ;;  %v350_v60 = vrot.slane %v3819_v32, 1  ;;  %v351_v63 = vrot.slane %v3822_v33, 1  ;;  %v353_v31 = vrot.slane %v3825_v38, 1 }
  0x2a   : > { %v3856_v41 = vpack.c.bf16 %v344_v44, %v342_v39  ;;  %v355_v6 = vrot.slane %v3834_v51, 1  ;;  %v356_v24 = vrot.slane %v3843_v3, 1  ;;  %v358_v25 = vrot.slane %v3846_v5, 1  ;;  %v2751_v39 = vld [vmem:[%s4510_s1 + $0x70] sm:$0xff] }
  0x2b   : > { %v3861_v26 = vpack.c.bf16 %v861_v49, %v859_v45  ;;  %v3863_v27 = vpack.c.bf16 %v349_v58, %v347_v55  ;;  %v352_v44 = vsel %vm294_vm0, %v350_v60, %v351_v63  ;;  %v868_v17 = vrot.slane %v3663_v43, 2  ;;  %v3875_v45 = vld [vmem:[%s3592_s7 + $0x138] sm:$0xff]  ;;  %v3878_v49 = vld [vmem:[%s3592_s7 + $0x140] sm:$0xff]  ;;  %v3887_v58 = vld [vmem:[%s3592_s7 + $0x148] sm:$0x3] }
  0x2c   : > { %2954 = vmatmul.mubr.msk.bf16.gmra.mrb[8].mxu1 %vm427_vm1, %v3738_v22  ;;  %4546 = vst [vmem:[#allocation10_spill] sm:$0xff] %v3856_v41  ;;  %v867_v22 = vrot.slane %v3660_v42, 2  ;;  %v2752_v55 = vld [vmem:[%s4510_s1 + $0x78] sm:$0xff]  ;;  %v3891_v60 = vpack.c.bf16 %v3635_v30, %v3622_v23  ;;  %v359_v2 = vsel %vm294_vm0, %v356_v24, %v358_v25  ;;  %v360_v59 = vrot.slane %v3875_v45, 1  ;;  %v3905_v23 = vld [vmem:[%s3592_s7 + $0x150] sm:$0xff] }
  0x2d   : > { %2957 = vmatprep.mubr.msk.bf16.mxu1 %vm427_vm1, %v3768_v50  ;;  %3090 = vmatmul.mubr.msk.bf16.gmra.mrb[8].mxu0 %vm427_vm1, %v3768_v50  ;;  %4547 = vst [vmem:[#allocation11_spill] sm:$0xff] %v3861_v26  ;;  %4548 = vst [vmem:[#allocation12_spill] sm:$0xff] %v3863_v27  ;;  %v354_v50 = vsel %vm294_vm0, %v351_v63, %v353_v31  ;;  %v357_v31 = vsel %vm294_vm0, %v355_v6, %v356_v24  ;;  %v361_v7 = vrot.slane %v3878_v49, 1  ;;  %v3908_v30 = vld [vmem:[%s3592_s7 + $0x158] sm:$0xff] }
  0x2e   : > { %3093 = vmatprep.mubr.msk.bf16.mxu0 %vm427_vm1, %v3774_v56  ;;  %v869_v6 = vsel %vm846_vm2, %v867_v22, %v868_v17  ;;  %v3921_v24 = vpack.c.bf16 %v3647_v35, %v3644_v34  ;;  %v365_v35 = vrot.slane %v3905_v23, 1 }
  0x2f   : > { %v362_v22 = vsel %vm294_vm0, %v360_v59, %v361_v7  ;;  %v883_v59 = vrot.slane %v3729_v15, 2 }
  0x34   : > { %2958 = vmatmul.mubr.msk.bf16.gmra.mrb[12].mxu1 %vm427_vm1, %v3774_v56  ;;  %v864_v56 = vsel %vm846_vm2, %v862_v18, %v863_v0  ;;  %v870_v18 = vrot.slane %v3668_v46, 2  ;;  %v875_v46 = vrot.slane %v3682_v53, 2  ;;  %v363_v53 = vrot.slane %v3887_v58, 1 }
  0x35   : > { %2961 = vmatprep.mubr.msk.bf16.mxu1 %vm427_vm1, %v3814_v28  ;;  %3094 = vmatmul.mubr.msk.bf16.gmra.mrb[12].mxu0 %vm427_vm1, %v3814_v28  ;;  %v866_v28 = vsel %vm846_vm2, %v863_v0, %v865_v1  ;;  %v872_v0 = vrot.slane %v3671_v47, 2  ;;  %v873_v1 = vrot.slane %v3679_v52, 2 }
  0x36   : > { %3115 = vmatprep.mubr.msk.bf16.mxu0 %vm427_vm1, %v3816_v29  ;;  %v3895_v63 = vpack.c.bf16 %v866_v28, %v864_v56  ;;  %v3913_v56 = vpack.c.bf16 %v2752_v55, %v2751_v39  ;;  %v3915_v28 = vpack.c.bf16 %v354_v50, %v352_v44  ;;  %v871_v25 = vsel %vm846_vm2, %v868_v17, %v870_v18 }
  0x37   : > { %v874_v39 = vsel %vm846_vm2, %v872_v0, %v873_v1  ;;  %v3931_v50 = vpack.c.bf16 %v3663_v43, %v3660_v42  ;;  %v876_v34 = vsel %vm846_vm2, %v873_v1, %v875_v46  ;;  %v366_v17 = vrot.slane %v3908_v30, 1  ;;  %v3958_v46 = vld [vmem:[%s3592_s7 + $0x168] sm:$0xff] }
  0x38   : > { %4549 = vst [vmem:[#allocation13_spill] sm:$0xff] %v3895_v63  ;;  %4550 = vst [vmem:[#allocation14_spill] sm:$0xff] %v3915_v28  ;;  %v877_v44 = vrot.slane %v3716_v8, 2  ;;  %v878_v42 = vrot.slane %v3719_v9, 2  ;;  %v3945_v43 = vpack.c.bf16 %v3679_v52, %v3671_v47  ;;  %v880_v55 = vrot.slane %v3722_v10, 2 }
  0x39   : > { %v882_v18 = vrot.slane %v3726_v11, 2  ;;  %v847_v0 = vrot.slane %v3596_v12, 2  ;;  %v3953_v1 = vpack.c.bf16 %v871_v25, %v869_v6  ;;  %v3962_v47 = vpack.c.bf16 %v3719_v9, %v3716_v8  ;;  %v3973_v6 = vld [vmem:[%s3592_s7 + $0x178] sm:$0x3] }
  0x3a   : > { %v885_v10 = vrot.slane %v3732_v16, 2  ;;  %v3977_v25 = vpack.c.bf16 %v3729_v15, %v3726_v11  ;;  %v848_v8 = vrot.slane %v3599_v13, 2  ;;  %v850_v9 = vrot.slane %v3602_v14, 2 }
  0x3b   : > { %4552 = vst [vmem:[#allocation16_spill] sm:$0xff] %v3953_v1  ;;  %v881_v16 = vsel %vm846_vm2, %v878_v42, %v880_v55  ;;  %v3991_v11 = vpack.c.bf16 %v3758_v37, %v3755_v36  ;;  %v4016_v55 = vpack.c.bf16 %v3843_v3, %v3834_v51 }
  0x3c   : > { %2962 = vmatmul.mubr.msk.bf16.gmra.mrb[16].mxu1 %vm427_vm1, %v3856_v41  ;;  %v3911_v41 = vld [vmem:[%s3592_s7 + $0x160] sm:$0x3] }
  0x3d   : > { %2965 = vmatprep.mubr.msk.bf16.mxu1 %vm427_vm1, %v3863_v27  ;;  %3116 = vmatmul.mubr.msk.bf16.vlgmr.msra.gmra.mrb[0].mxu0 %vm427_vm1, %v3861_v26  ;;  %v3926_v27 = vpack.c.bf16 %v359_v2, %v357_v31  ;;  %v368_v2 = vrot.slane %v3911_v41, 1  ;;  %v3955_v31 = vpack.c.bf16 %v876_v34, %v874_v39  ;;  %v879_v34 = vsel %vm846_vm2, %v877_v44, %v878_v42 }
  0x3e   : > { %3148 = vmatpush3.bf16.msra.mxu0 %v3684_v54  ;;  %3119 = vmatprep.mubr.msk.bf16.mxu0 %vm427_vm1, %v3895_v63  ;;  %v364_v54 = vsel %vm294_vm0, %v361_v7, %v363_v53  ;;  %v367_v7 = vsel %vm294_vm0, %v365_v35, %v366_v17  ;;  %v3970_v53 = vld [vmem:[%s3592_s7 + $0x170] sm:$0xff]  ;;  %v884_v35 = vsel %vm846_vm2, %v882_v18, %v883_v59  ;;  %v890_v26 = vrot.slane %v3763_v40, 2 }
  0x3f   : > { %4551 = vst [vmem:[#allocation15_spill] sm:$0xff] %v3926_v27  ;;  %3181 = vmatprep.subr.bf16.mxu0 %v3913_v56  ;;  %4553 = vst [vmem:[#allocation17_spill] sm:$0xff] %v3955_v31  ;;  %v369_v52 = vsel %vm294_vm0, %v366_v17, %v368_v2  ;;  %v3983_v39 = vpack.c.bf16 %v364_v54, %v362_v22  ;;  %v370_v17 = vrot.slane %v3958_v46, 1  ;;  %v371_v15 = vrot.slane %v3970_v53, 1 }
  0x40   : > { %v3995_v14 = vpack.c.bf16 %v369_v52, %v367_v7  ;;  %v373_v2 = vrot.slane %v3973_v6, 1  ;;  %v4001_v22 = vpack.c.bf16 %v3783_v20, %v3780_v19  ;;  %v886_v44 = vsel %vm846_vm2, %v883_v59, %v885_v10 }
  0x41   : > { %v4008_v42 = vpack.c.bf16 %v3794_v62, %v3791_v61  ;;  %v4012_v54 = vpack.c.bf16 %v3822_v33, %v3819_v32  ;;  %v4020_v18 = vpack.c.bf16 %v3878_v49, %v3875_v45  ;;  %v4024_v7 = vpack.c.bf16 %v3908_v30, %v3905_v23 }
  0x42   : > { %v4028_v59 = vpack.c.bf16 %v3970_v53, %v3958_v46  ;;  %v4031_v52 = vsel %vm846_vm2, %v847_v0, %v848_v8  ;;  %v4034_v10 = vsel %vm846_vm2, %v848_v8, %v850_v9  ;;  %v372_v63 = vsel %vm294_vm0, %v370_v17, %v371_v15 }
  0x43   : > { %v888_v0 = vrot.slane %v3758_v37, 2  ;;  %v374_v8 = vsel %vm294_vm0, %v371_v15, %v373_v2  ;;  %v893_v9 = vrot.slane %v3783_v20, 2  ;;  %v905_v15 = vrot.slane %v3825_v38, 2  ;;  %v2679_v2 = vld [vmem:[%s4510_s1 + $0x30] sm:$0xff] }
  0x44   : > { %2966 = vmatmul.mubr.msk.bf16.gmra.mrb[20].mxu1 %vm427_vm1, %v3915_v28  ;;  %v887_v28 = vrot.slane %v3755_v36, 2  ;;  %v892_v36 = vrot.slane %v3780_v19, 2  ;;  %v4058_v37 = vpack.c.bf16 %v374_v8, %v372_v63  ;;  %v897_v63 = vrot.slane %v3791_v61, 2  ;;  %v2680_v61 = vld [vmem:[%s4510_s1 + $0x38] sm:$0xff] }
  0x45   : > { %2969 = vmatprep.mubr.msk.bf16.mxu1 %vm427_vm1, %v3926_v27  ;;  %3120 = vmatmul.mubr.msk.bf16.gmra.mrb[4].mxu0 %vm427_vm1, %v3953_v1  ;;  %v4036_v27 = vpack.c.bf16 %v881_v16, %v879_v34  ;;  %v4043_v1 = vpack.c.bf16 %v886_v44, %v884_v35  ;;  %v895_v34 = vrot.slane %v3786_v57, 2  ;;  %v891_v16 = vsel %vm846_vm2, %v888_v0, %v890_v26 }
  0x46   : > { %3123 = vmatprep.mubr.msk.bf16.mxu0 %vm427_vm1, %v3955_v31  ;;  %v959_v31 = vpack.c.bf16 %v4034_v10, %v4031_v52  ;;  %v889_v40 = vsel %vm846_vm2, %v887_v28, %v888_v0  ;;  %v227_v35 = vpack.c.bf16 %v3599_v13, %v3596_v12  ;;  %v894_v19 = vsel %vm846_vm2, %v892_v36, %v893_v9  ;;  %v4557_v52 = vld [vmem:[#allocation16_spill] sm:$0xff] }
  0x47   : > { %v896_v20 = vsel %vm846_vm2, %v893_v9, %v895_v34  ;;  %v4066_v57 = vpack.c.bf16 %v891_v16, %v889_v40  ;;  %v898_v28 = vrot.slane %v3794_v62, 2  ;;  %v900_v26 = vrot.slane %v3803_v4, 2 }
  0x48   : > { %v4070_v17 = vpack.c.bf16 %v896_v20, %v894_v19  ;;  %v902_v12 = vrot.slane %v3819_v32, 2  ;;  %v903_v13 = vrot.slane %v3822_v33, 2  ;;  %v4093_v38 = vpack.c.bf16 %v2680_v61, %v2679_v2 }
  0x49   : > { %v899_v62 = vsel %vm846_vm2, %v897_v63, %v898_v28  ;;  %v901_v4 = vsel %vm846_vm2, %v898_v28, %v900_v26  ;;  %v907_v8 = vrot.slane %v3834_v51, 2  ;;  %v908_v36 = vrot.slane %v3843_v3, 2 }
  0x4a   : > { %v904_v32 = vsel %vm846_vm2, %v902_v12, %v903_v13  ;;  %v906_v33 = vsel %vm846_vm2, %v903_v13, %v905_v15  ;;  %v4095_v44 = vpack.c.bf16 %v901_v4, %v899_v62  ;;  %v910_v9 = vrot.slane %v3846_v5, 2  ;;  %v221_v12 = vld [vmem:[%s3592_s7 + $0x180] sm:$0xff]  ;;  %v223_v13 = vld [vmem:[%s3592_s7 + $0x190] sm:$0x3] }
  0x4b   : > { %v4099_v0 = vpack.c.bf16 %v906_v33, %v904_v32  ;;  %v912_v34 = vrot.slane %v3875_v45, 2  ;;  %v913_v40 = vrot.slane %v3878_v49, 2  ;;  %v915_v16 = vrot.slane %v3887_v58, 2 }
  0x4c   : > { %2970 = vmatmul.mubr.msk.bf16.gmra.mrb[24].mxu1 %vm427_vm1, %v3983_v39  ;;  %v909_v51 = vsel %vm846_vm2, %v907_v8, %v908_v36  ;;  %v917_v58 = vrot.slane %v3905_v23, 2  ;;  %v920_v19 = vrot.slane %v3911_v41, 2  ;;  %v922_v20 = vrot.slane %v3958_v46, 2  ;;  %v222_v46 = vld [vmem:[%s3592_s7 + $0x188] sm:$0xff] }
  0x4d   : > { %2973 = vmatprep.mubr.msk.bf16.mxu1 %vm427_vm1, %v3995_v14  ;;  %3124 = vmatmul.mubr.msk.bf16.gmra.mrb[8].mxu0 %vm427_vm1, %v4036_v27  ;;  %v914_v3 = vsel %vm846_vm2, %v912_v34, %v913_v40  ;;  %v916_v5 = vsel %vm846_vm2, %v913_v40, %v915_v16  ;;  %v923_v63 = vrot.slane %v3970_v53, 2  ;;  %v925_v28 = vrot.slane %v3973_v6, 2  ;;  %v2769_v16 = vld [vmem:[%s4510_s1 + $0x80] sm:$0xff] }
  0x4e   : > { %3127 = vmatprep.mubr.msk.bf16.mxu0 %vm427_vm1, %v4043_v1  ;;  %v4123_v49 = vpack.c.bf16 %v916_v5, %v914_v3  ;;  %v1632_v15 = vrot.slane %v221_v12, 2  ;;  %v1633_v2 = vrot.slane %v222_v46, 2  ;;  %v1635_v61 = vrot.slane %v223_v13, 2  ;;  %v4555_v3 = vld [vmem:[#allocation2_spill] sm:$0xff] }
  0x4f   : > { %v924_v41 = vsel %vm846_vm2, %v922_v20, %v923_v63  ;;  %v926_v26 = vsel %vm846_vm2, %v923_v63, %v925_v28  ;;  %v1424_v62 = vrot.slane %v221_v12, 1  ;;  %v1425_v4 = vrot.slane %v222_v46, 1  ;;  %v225_v5 = vld [vmem:[%s3592_s7 + $0x1a0] sm:$0xff] }
  0x50   : > { %v4148_v6 = vpack.c.bf16 %v926_v26, %v924_v41  ;;  %v1427_v32 = vrot.slane %v223_v13, 1  ;;  %v1634_v33 = vsel %vm846_vm2, %v1632_v15, %v1633_v2  ;;  %v1636_v8 = vsel %vm846_vm2, %v1633_v2, %v1635_v61  ;;  %v4559_v41 = vld [vmem:[#allocation3_spill] sm:$0xff]  ;;  %v4560_v26 = vld [vmem:[#allocation4_spill] sm:$0xff]  ;;  %v4565_v2 = vld [vmem:[#allocation9_spill] sm:$0xff] }
  0x51   : > { %v4162_v40 = vpack.c.bf16 %v1636_v8, %v1634_v33  ;;  %v4233_v10 = vpack.c.bf16 %v222_v46, %v221_v12  ;;  %v4561_v12 = vld [vmem:[#allocation5_spill] sm:$0xff]  ;;  %v4562_v46 = vld [vmem:[#allocation6_spill] sm:$0xff]  ;;  %v4563_v13 = vld [vmem:[#allocation7_spill] sm:$0xff] }
  0x52   : > { %v4564_v15 = vld [vmem:[#allocation8_spill] sm:$0xff]  ;;  %v4566_v61 = vld [vmem:[#allocation10_spill] sm:$0xff] }
  0x54   : > { %2974 = vmatmul.mubr.msk.bf16.gmra.mrb[28].mxu1 %vm427_vm1, %v4058_v37 }
  0x55   : > { %2979 = vmatprep.mubr.msk.bf16.mxu1 %vm427_vm1, %v227_v35  ;;  %3128 = vmatmul.mubr.msk.bf16.gmra.mrb[12].mxu0 %vm427_vm1, %v4066_v57  ;;  %v918_v35 = vrot.slane %v3908_v30, 2 }
  0x56   : > { %3131 = vmatprep.mubr.msk.bf16.mxu0 %vm427_vm1, %v4070_v17 }
  0x57   : > { %v919_v23 = vsel %vm846_vm2, %v917_v58, %v918_v35  ;;  %v921_v30 = vsel %vm846_vm2, %v918_v35, %v920_v19  ;;  %v2253_v35 = vrot.slane %v225_v5, 2  ;;  %v226_v19 = vld [vmem:[%s3592_s7 + $0x1a8] sm:$0x3] }
  0x58   : > { %v4144_v53 = vpack.c.bf16 %v921_v30, %v919_v23  ;;  %v2255_v20 = vrot.slane %v226_v19, 2 }
  0x5a   : > { %v4250_v23 = vsel %vm846_vm2, %v2253_v35, %v2255_v20 }
  0x5c   : > { %2980 = vmatmul.mubr.msk.bf16.vlgmr.msra.gmra.mrb[0].mxu1 %vm427_vm1, %v3618_v21 }
  0x5d   : > { %3012 = vmatpush3.bf16.msra.mxu1 %v3673_v48  ;;  %2983 = vmatprep.mubr.msk.bf16.mxu1 %vm427_vm1, %v3891_v60  ;;  %v911_v48 = vsel %vm846_vm2, %v908_v36, %v910_v9  ;;  %v1426_v36 = vsel %vm294_vm0, %v1424_v62, %v1425_v4  ;;  %v1428_v9 = vsel %vm294_vm0, %v1425_v4, %v1427_v32  ;;  %v4567_v62 = vld [vmem:[#allocation12_spill] sm:$0xff]  ;;  %v4568_v4 = vld [vmem:[#allocation14_spill] sm:$0xff]  ;;  %v4569_v32 = vld [vmem:[#allocation15_spill] sm:$0xff] }
  0x5e   : > { %3045 = vmatprep.subr.bf16.mxu1 %v4093_v38  ;;  %3132 = vmatmul.mubr.msk.bf16.gmra.mrb[16].mxu0 %vm427_vm1, %v4095_v44  ;;  %v4119_v45 = vpack.c.bf16 %v911_v48, %v909_v51  ;;  %v4160_v34 = vpack.c.bf16 %v1428_v9, %v1426_v36  ;;  %v2770_v51 = vld [vmem:[%s4510_s1 + $0x88] sm:$0xff] }
  0x5f   : > { %3135 = vmatprep.mubr.msk.bf16.mxu0 %vm427_vm1, %v4099_v0  ;;  %v2263_v48 = vpack.c.bf16 %v2770_v51, %v2769_v16 }
  0x64   : > { %2984 = vmatmul.mubr.msk.bf16.gmra.mrb[4].mxu1 %vm427_vm1, %v3921_v24 }
  0x65   : > { %2987 = vmatprep.mubr.msk.bf16.mxu1 %vm427_vm1, %v3931_v50 }
  0x66   : > { %3136 = vmatmul.mubr.msk.bf16.gmra.mrb[20].mxu0 %vm427_vm1, %v4119_v45 }
  0x67   : > { %3139 = vmatprep.mubr.msk.bf16.mxu0 %vm427_vm1, %v4123_v49 }
  0x6c   : > { %2988 = vmatmul.mubr.msk.bf16.gmra.mrb[8].mxu1 %vm427_vm1, %v3945_v43 }
  0x6d   : > { %2991 = vmatprep.mubr.msk.bf16.mxu1 %vm427_vm1, %v3962_v47 }
  0x6e   : > { %3140 = vmatmul.mubr.msk.bf16.gmra.mrb[24].mxu0 %vm427_vm1, %v4144_v53 }
  0x6f   : > { %3143 = vmatprep.mubr.msk.bf16.mxu0 %vm427_vm1, %v4148_v6 }
  0x74   : > { %2992 = vmatmul.mubr.msk.bf16.gmra.mrb[12].mxu1 %vm427_vm1, %v3977_v25 }
  0x75   : > { %2995 = vmatprep.mubr.msk.bf16.mxu1 %vm427_vm1, %v3991_v11 }
  0x76   : > { %3144 = vmatmul.mubr.msk.bf16.gmra.mrb[28].mxu0 %vm427_vm1, %v4162_v40 }
  0x77   : > { %3149 = vmatprep.mubr.msk.bf16.mxu0 %vm427_vm1, %v3891_v60 }
  0x7c   : > { %2996 = vmatmul.mubr.msk.bf16.gmra.mrb[16].mxu1 %vm427_vm1, %v4001_v22 }
  0x7d   : > { %2999 = vmatprep.mubr.msk.bf16.mxu1 %vm427_vm1, %v4008_v42 }
  0x7e   : > { %3150 = vmatmul.mubr.msk.bf16.vlgmr.msra.gmra.mrb[0].mxu0 %vm427_vm1, %v3921_v24 }
  0x7f   : > { %3182 = vmatpush3.bf16.msra.mxu0 %v3913_v56  ;;  %3153 = vmatprep.mubr.msk.bf16.mxu0 %vm427_vm1, %v3931_v50  ;;  %v4554_v56 = vld [vmem:[#allocation11_spill] sm:$0xff] }
  0x80   : > { %3215 = vmatprep.subr.bf16.mxu0 %v2263_v48 }
  0x84   : > { %3000 = vmatmul.mubr.msk.bf16.gmra.mrb[20].mxu1 %vm427_vm1, %v4012_v54 }
  0x85   : > { %3003 = vmatprep.mubr.msk.bf16.mxu1 %vm427_vm1, %v4016_v55 }
  0x86   : > { %3154 = vmatmul.mubr.msk.bf16.gmra.mrb[4].mxu0 %vm427_vm1, %v3945_v43 }
  0x87   : > { %3157 = vmatprep.mubr.msk.bf16.mxu0 %vm427_vm1, %v3962_v47 }
  0x8c   : > { %3004 = vmatmul.mubr.msk.bf16.gmra.mrb[24].mxu1 %vm427_vm1, %v4020_v18 }
  0x8d   : > { %3007 = vmatprep.mubr.msk.bf16.mxu1 %vm427_vm1, %v4024_v7 }
  0x8e   : > { %3158 = vmatmul.mubr.msk.bf16.gmra.mrb[8].mxu0 %vm427_vm1, %v3977_v25 }
  0x8f   : > { %3161 = vmatprep.mubr.msk.bf16.mxu0 %vm427_vm1, %v3991_v11 }
  0x94   : > { %3008 = vmatmul.mubr.msk.bf16.gmra.mrb[28].mxu1 %vm427_vm1, %v4028_v59 }
  0x95   : > { %3013 = vmatprep.mubr.msk.bf16.mxu1 %vm427_vm1, %v959_v31  ;;  %v4556_v31 = vld [vmem:[#allocation13_spill] sm:$0xff] }
  0x96   : > { %3162 = vmatmul.mubr.msk.bf16.gmra.mrb[12].mxu0 %vm427_vm1, %v4001_v22 }
  0x97   : > { %3165 = vmatprep.mubr.msk.bf16.mxu0 %vm427_vm1, %v4008_v42 }
  0x9c   : > { %3014 = vmatmul.mubr.msk.bf16.vlgmr.msra.gmra.mrb[0].mxu1 %vm427_vm1, %v3816_v29  ;;  %v4558_v29 = vld [vmem:[#allocation17_spill] sm:$0xff] }
  0x9d   : > { %3046 = vmatpush3.bf16.msra.mxu1 %v4093_v38  ;;  %3017 = vmatprep.mubr.msk.bf16.mxu1 %vm427_vm1, %v4554_v56  ;;  %v224_v38 = vld [vmem:[%s3592_s7 + $0x198] sm:$0xff] }
  0x9e   : > { %3249 = vmatprep.subr.bf16.mxu1 %v4555_v3  ;;  %3166 = vmatmul.mubr.msk.bf16.gmra.mrb[16].mxu0 %vm427_vm1, %v4012_v54  ;;  %v2252_v58 = vrot.slane %v224_v38, 2  ;;  %v1840_v63 = vpack.c.bf16 %v225_v5, %v224_v38 }
  0x9f   : > { %3169 = vmatprep.mubr.msk.bf16.mxu0 %vm427_vm1, %v4016_v55 }
  0xa0   : > { %v4247_v28 = vsel %vm846_vm2, %v2252_v58, %v2253_v35 }
  0xa1   : > { %v2259_v30 = vpack.c.bf16 %v4250_v23, %v4247_v28 }
  0xa4   : > { %3018 = vmatmul.mubr.msk.bf16.gmra.mrb[4].mxu1 %vm427_vm1, %v4556_v31 }
  0xa5   : > { %3021 = vmatprep.mubr.msk.bf16.mxu1 %vm427_vm1, %v4557_v52 }
  0xa6   : > { %3170 = vmatmul.mubr.msk.bf16.gmra.mrb[20].mxu0 %vm427_vm1, %v4020_v18 }
  0xa7   : > { %3173 = vmatprep.mubr.msk.bf16.mxu0 %vm427_vm1, %v4024_v7 }
  0xac   : > { %3022 = vmatmul.mubr.msk.bf16.gmra.mrb[8].mxu1 %vm427_vm1, %v4558_v29 }
  0xad   : > { %3025 = vmatprep.mubr.msk.bf16.mxu1 %vm427_vm1, %v4036_v27 }
  0xae   : > { %3174 = vmatmul.mubr.msk.bf16.gmra.mrb[24].mxu0 %vm427_vm1, %v4028_v59 }
  0xaf   : > { %3177 = vmatprep.mubr.msk.bf16.mxu0 %vm427_vm1, %v4233_v10 }
  0xb4   : > { %3026 = vmatmul.mubr.msk.bf16.gmra.mrb[12].mxu1 %vm427_vm1, %v4043_v1 }
  0xb5   : > { %3029 = vmatprep.mubr.msk.bf16.mxu1 %vm427_vm1, %v4066_v57 }
  0xb6   : > { %3178 = vmatmul.mubr.msk.bf16.gmra.mrb[28].mxu0 %vm427_vm1, %v1840_v63 }
  0xb7   : > { %3183 = vmatprep.mubr.msk.bf16.mxu0 %vm427_vm1, %v4559_v41 }
  0xbc   : > { %3030 = vmatmul.mubr.msk.bf16.gmra.mrb[16].mxu1 %vm427_vm1, %v4070_v17 }
  0xbd   : > { %3033 = vmatprep.mubr.msk.bf16.mxu1 %vm427_vm1, %v4095_v44 }
  0xbe   : > { %3184 = vmatmul.mubr.msk.bf16.vlgmr.msra.gmra.mrb[0].mxu0 %vm427_vm1, %v4560_v26 }
  0xbf   : > { %3216 = vmatpush3.bf16.msra.mxu0 %v2263_v48  ;;  %3187 = vmatprep.mubr.msk.bf16.mxu0 %vm427_vm1, %v4561_v12 }
  0xc4   : > { %3034 = vmatmul.mubr.msk.bf16.gmra.mrb[20].mxu1 %vm427_vm1, %v4099_v0 }
  0xc5   : > { %3037 = vmatprep.mubr.msk.bf16.mxu1 %vm427_vm1, %v4119_v45 }
  0xc6   : > { %3188 = vmatmul.mubr.msk.bf16.gmra.mrb[4].mxu0 %vm427_vm1, %v4562_v46 }
  0xc7   : > { %3191 = vmatprep.mubr.msk.bf16.mxu0 %vm427_vm1, %v4563_v13 }
  0xcc   : > { %3038 = vmatmul.mubr.msk.bf16.gmra.mrb[24].mxu1 %vm427_vm1, %v4123_v49 }
  0xcd   : > { %3041 = vmatprep.mubr.msk.bf16.mxu1 %vm427_vm1, %v4144_v53 }
  0xce   : > { %3192 = vmatmul.mubr.msk.bf16.gmra.mrb[8].mxu0 %vm427_vm1, %v4564_v15 }
  0xcf   : > { %3195 = vmatprep.mubr.msk.bf16.mxu0 %vm427_vm1, %v4565_v2 }
  0xd4   : > { %3042 = vmatmul.mubr.msk.bf16.gmra.mrb[28].mxu1 %vm427_vm1, %v4148_v6 }
  0xd5   : > { %3047 = vmatprep.mubr.msk.bf16.mxu1 %vm427_vm1, %v3618_v21  ;;  %v2044_v21 = vrot.slane %v224_v38, 1 }
  0xd6   : > { %3196 = vmatmul.mubr.msk.bf16.gmra.mrb[12].mxu0 %vm427_vm1, %v4566_v61 }
  0xd7   : > { %3199 = vmatprep.mubr.msk.bf16.mxu0 %vm427_vm1, %v4567_v62 }
  0xdc   : > { %3048 = vmatmul.mubr.msk.bf16.vlgmr.msra.gmra.mrb[0].mxu1 %vm427_vm1, %v3891_v60  ;;  %v2045_v60 = vrot.slane %v225_v5, 1 }
  0xdd   : > { %3250 = vmatpush3.bf16.msra.mxu1 %v4555_v3  ;;  %3051 = vmatprep.mubr.msk.bf16.mxu1 %vm427_vm1, %v3921_v24  ;;  %v2047_v24 = vrot.slane %v226_v19, 1 }
  0xde   : > { %3200 = vmatmul.mubr.msk.bf16.gmra.mrb[16].mxu0 %vm427_vm1, %v4568_v4 }
  0xdf   : > { %3203 = vmatprep.mubr.msk.bf16.mxu0 %vm427_vm1, %v4569_v32 }
  0xe4   : > { %3052 = vmatmul.mubr.msk.bf16.gmra.mrb[4].mxu1 %vm427_vm1, %v3931_v50  ;;  %v2046_v50 = vsel %vm294_vm0, %v2044_v21, %v2045_v60 }
  0xe5   : > { %3055 = vmatprep.mubr.msk.bf16.mxu1 %vm427_vm1, %v3945_v43  ;;  %v2048_v43 = vsel %vm294_vm0, %v2045_v60, %v2047_v24 }
  0xe6   : > { %3204 = vmatmul.mubr.msk.bf16.gmra.mrb[20].mxu0 %vm427_vm1, %v3983_v39  ;;  %v2051_v33 = vpack.c.bf16 %v2048_v43, %v2046_v50 }
  0xe7   : > { %3207 = vmatprep.mubr.msk.bf16.mxu0 %vm427_vm1, %v3995_v14 }
  0xec   : > { %3056 = vmatmul.mubr.msk.bf16.gmra.mrb[8].mxu1 %vm427_vm1, %v3962_v47 }
  0xed   : > { %3059 = vmatprep.mubr.msk.bf16.mxu1 %vm427_vm1, %v3977_v25 }
  0xee   : > { %3208 = vmatmul.mubr.msk.bf16.gmra.mrb[24].mxu0 %vm427_vm1, %v4058_v37 }
  0xef   : > { %3211 = vmatprep.mubr.msk.bf16.mxu0 %vm427_vm1, %v4160_v34 }
  0xf4   : > { %3060 = vmatmul.mubr.msk.bf16.gmra.mrb[12].mxu1 %vm427_vm1, %v3991_v11 }
  0xf5   : > { %3063 = vmatprep.mubr.msk.bf16.mxu1 %vm427_vm1, %v4001_v22 }
  0xf6   : > { %3212 = vmatmul.mubr.msk.bf16.gmra.mrb[28].mxu0 %vm427_vm1, %v2051_v33 }
  0xf7   : > { %3217 = vmatprep.mubr.msk.bf16.mxu0 %vm427_vm1, %v4554_v56 }
  0xfc   : > { %3064 = vmatmul.mubr.msk.bf16.gmra.mrb[16].mxu1 %vm427_vm1, %v4008_v42 }
  0xfd   : > { %3067 = vmatprep.mubr.msk.bf16.mxu1 %vm427_vm1, %v4012_v54 }
  0xfe   : > { %3218 = vmatmul.mubr.msk.bf16.vlgmr.msra.gmra.mrb[0].mxu0 %vm427_vm1, %v4556_v31 }
  0xff   : > { %3221 = vmatprep.mubr.msk.bf16.mxu0 %vm427_vm1, %v4557_v52 }
 0x104   : > { %3068 = vmatmul.mubr.msk.bf16.gmra.mrb[20].mxu1 %vm427_vm1, %v4016_v55 }
 0x105   : > { %3071 = vmatprep.mubr.msk.bf16.mxu1 %vm427_vm1, %v4020_v18 }
 0x106   : > { %3222 = vmatmul.mubr.msk.bf16.gmra.mrb[4].mxu0 %vm427_vm1, %v4558_v29 }
 0x107   : > { %3225 = vmatprep.mubr.msk.bf16.mxu0 %vm427_vm1, %v4036_v27 }
 0x10c   : > { %3072 = vmatmul.mubr.msk.bf16.gmra.mrb[24].mxu1 %vm427_vm1, %v4024_v7 }
 0x10d   : > { %3075 = vmatprep.mubr.msk.bf16.mxu1 %vm427_vm1, %v4028_v59 }
 0x10e   : > { %3226 = vmatmul.mubr.msk.bf16.gmra.mrb[8].mxu0 %vm427_vm1, %v4043_v1 }
 0x10f   : > { %3229 = vmatprep.mubr.msk.bf16.mxu0 %vm427_vm1, %v4066_v57 }
 0x114   : > { %3076 = vmatmul.mubr.msk.bf16.gmra.mrb[28].mxu1 %vm427_vm1, %v4233_v10 }
 0x115   : > { %3097 = vmatprep.mubr.msk.bf16.mxu1 %vm427_vm1, %v4566_v61 }
 0x116   : > { %3230 = vmatmul.mubr.msk.bf16.gmra.mrb[12].mxu0 %vm427_vm1, %v4070_v17 }
 0x117   : > { %3233 = vmatprep.mubr.msk.bf16.mxu0 %vm427_vm1, %v4095_v44  ;;  %v4399_v44 = vld [vmem:[%s4511_s2] ss:$0 sm:$0xff] }
 0x11c   : > { %3098 = vmatmul.mubr.msk.bf16.vlgmr.msra.gmra.mrb[16].mxu1 %vm427_vm1, %v4567_v62 }
 0x11d   : > { %3101 = vmatprep.mubr.msk.bf16.mxu1 %vm427_vm1, %v4568_v4 }
 0x11e   : > { %3234 = vmatmul.mubr.msk.bf16.gmra.mrb[16].mxu0 %vm427_vm1, %v4099_v0 }
 0x11f   : > { %3237 = vmatprep.mubr.msk.bf16.mxu0 %vm427_vm1, %v4119_v45 }
 0x124   : > { %3102 = vmatmul.mubr.msk.bf16.gmra.mrb[20].mxu1 %vm427_vm1, %v4569_v32 }
 0x125   : > { %3105 = vmatprep.mubr.msk.bf16.mxu1 %vm427_vm1, %v3983_v39 }
 0x126   : > { %3238 = vmatmul.mubr.msk.bf16.gmra.mrb[20].mxu0 %vm427_vm1, %v4123_v49 }
 0x127   : > { %3241 = vmatprep.mubr.msk.bf16.mxu0 %vm427_vm1, %v4144_v53 }
 0x12c   : > { %3106 = vmatmul.mubr.msk.bf16.gmra.mrb[24].mxu1 %vm427_vm1, %v3995_v14 }
 0x12d   : > { %3109 = vmatprep.mubr.msk.bf16.mxu1 %vm427_vm1, %v4058_v37 }
 0x12e   : > { %3242 = vmatmul.mubr.msk.bf16.gmra.mrb[24].mxu0 %vm427_vm1, %v4148_v6 }
 0x12f   : > { %3245 = vmatprep.mubr.msk.bf16.mxu0 %vm427_vm1, %v4162_v40 }
 0x134   : > { %3110 = vmatmul.mubr.msk.bf16.gmra.mrb[28].mxu1 %vm427_vm1, %v4160_v34 }
 0x136   : > { %3246 = vmatmul.mubr.msk.bf16.gmra.mrb[28].mxu0 %vm427_vm1, %v2259_v30 }
 0x1af   : > { %v3049_v27 = vpop.f32.mrb[0].mxu1 }
 0x1b0   : > { %v1262_v1 = vpop.f32.mrb[1].mxu1 }
 0x1b1   : > { %v3050_v47 = vpop.f32.mrb[2].mxu1 }
 0x1b2   : > { %v1265_v25 = vpop.f32.mrb[3].mxu1 }
 0x1b7   : > { %v3053_v39 = vpop.f32.mrb[4].mxu1 }
 0x1b8   : > { %v1278_v11 = vpop.f32.mrb[5].mxu1 }
 0x1b9   : > { %v3054_v14 = vpop.f32.mrb[6].mxu1 }
 0x1ba   : > { %v1281_v22 = vpop.f32.mrb[7].mxu1 }
 0x1bf   : > { %v3057_v42 = vpop.f32.mrb[8].mxu1 }
 0x1c0   : > { %v1294_v54 = vpop.f32.mrb[9].mxu1 }
 0x1c1   : > { %v3058_v55 = vpop.f32.mrb[10].mxu1 }
 0x1c2   : > { %v1297_v18 = vpop.f32.mrb[11].mxu1 }
 0x1c7   : > { %v4387_v7 = vpop.f32.mrb[12].mxu1 }
 0x1c8   : > { %v4389_v59 = vpop.f32.mrb[13].mxu1 }
 0x1c9   : > { %v4392_v37 = vpop.f32.mrb[14].mxu1 }
 0x1ca   : > { %v4394_v57 = vpop.f32.mrb[15].mxu1 }
 0x1d1   : > { %v3219_v17 = vpop.f32.mrb[0].mxu0 }
 0x1d2   : > { %v3251_v0 = vadd.f32 %v3219_v17, %v3049_v27  ;;  %v2301_v45 = vpop.f32.mrb[1].mxu0 }
 0x1d3   : > { %v3252_v49 = vadd.f32 %v2301_v45, %v1262_v1  ;;  %v3220_v53 = vpop.f32.mrb[2].mxu0 }
 0x1d4   : > { %v2469_v6 = vadd.f32 %v3251_v0, %v4399_v44  ;;  %v3253_v8 = vadd.f32 %v3220_v53, %v3050_v47  ;;  %v2304_v36 = vpop.f32.mrb[3].mxu0 }
 0x1d5   : > { %v2467_v9 = vadd.f32 %v3252_v49, %v4399_v44  ;;  %v3254_v34 = vadd.f32 %v2304_v36, %v1265_v25 }
 0x1d6   : > { %v2501_v40 = vmax.f32 %v2469_v6, 0.0  ;;  %v2470_v16 = vadd.f32 %v3253_v8, %v4399_v44 }
 0x1d7   : > { %v2499_v51 = vmax.f32 %v2467_v9, 0.0  ;;  %v2468_v48 = vadd.f32 %v3254_v34, %v4399_v44 }
 0x1d8   : > { %2533 = vst.msk [vmem:[%s4405_s8 + $0x10] sm:$0xff] %vm427_vm1, %v2501_v40  ;;  %v2502_v56 = vmax.f32 %v2470_v16, 0.0 }
 0x1d9   : > { %2531 = vst.msk [vmem:[%s4405_s8] sm:$0xff] %vm427_vm1, %v2499_v51  ;;  %v2500_v3 = vmax.f32 %v2468_v48, 0.0  ;;  %v3223_v31 = vpop.f32.mrb[4].mxu0 }
 0x1da   : > { %2534 = vst.msk [vmem:[%s4405_s8 + $0x18] sm:$0xff] %vm427_vm1, %v2502_v56  ;;  %v3255_v52 = vadd.f32 %v3223_v31, %v3053_v39  ;;  %v2317_v29 = vpop.f32.mrb[5].mxu0 }
 0x1db   : > { %2532 = vst.msk [vmem:[%s4405_s8 + $0x8] sm:$0xff] %vm427_vm1, %v2500_v3  ;;  %v3256_v10 = vadd.f32 %v2317_v29, %v1278_v11  ;;  %v3224_v38 = vpop.f32.mrb[6].mxu0 }
 0x1dc   : > { %v2473_v5 = vadd.f32 %v3255_v52, %v4399_v44  ;;  %v3257_v58 = vadd.f32 %v3224_v38, %v3054_v14  ;;  %v2320_v35 = vpop.f32.mrb[7].mxu0 }
 0x1dd   : > { %v2471_v19 = vadd.f32 %v3256_v10, %v4399_v44  ;;  %v3258_v20 = vadd.f32 %v2320_v35, %v1281_v22 }
 0x1de   : > { %v2505_v63 = vmax.f32 %v2473_v5, 0.0  ;;  %v2474_v28 = vadd.f32 %v3257_v58, %v4399_v44 }
 0x1df   : > { %v2503_v23 = vmax.f32 %v2471_v19, 0.0  ;;  %v2472_v30 = vadd.f32 %v3258_v20, %v4399_v44 }
 0x1e0   : > { %2537 = vst.msk [vmem:[%s4405_s8 + $0x30] sm:$0xff] %vm427_vm1, %v2505_v63  ;;  %v2506_v41 = vmax.f32 %v2474_v28, 0.0 }
 0x1e1   : > { %2535 = vst.msk [vmem:[%s4405_s8 + $0x20] sm:$0xff] %vm427_vm1, %v2503_v23  ;;  %v2504_v26 = vmax.f32 %v2472_v30, 0.0  ;;  %v3227_v12 = vpop.f32.mrb[8].mxu0 }
 0x1e2   : > { %2538 = vst.msk [vmem:[%s4405_s8 + $0x38] sm:$0xff] %vm427_vm1, %v2506_v41  ;;  %v3259_v46 = vadd.f32 %v3227_v12, %v3057_v42  ;;  %v2333_v13 = vpop.f32.mrb[9].mxu0 }
 0x1e3   : > { %2536 = vst.msk [vmem:[%s4405_s8 + $0x28] sm:$0xff] %vm427_vm1, %v2504_v26  ;;  %v3260_v15 = vadd.f32 %v2333_v13, %v1294_v54  ;;  %v3228_v2 = vpop.f32.mrb[10].mxu0 }
 0x1e4   : > { %v2477_v61 = vadd.f32 %v3259_v46, %v4399_v44  ;;  %v3261_v62 = vadd.f32 %v3228_v2, %v3058_v55  ;;  %v2336_v4 = vpop.f32.mrb[11].mxu0 }
 0x1e5   : > { %v2475_v32 = vadd.f32 %v3260_v15, %v4399_v44  ;;  %v3262_v21 = vadd.f32 %v2336_v4, %v1297_v18 }
 0x1e6   : > { %v2509_v60 = vmax.f32 %v2477_v61, 0.0  ;;  %v2478_v24 = vadd.f32 %v3261_v62, %v4399_v44 }
 0x1e7   : > { %v2507_v50 = vmax.f32 %v2475_v32, 0.0  ;;  %v2476_v43 = vadd.f32 %v3262_v21, %v4399_v44 }
 0x1e8   : > { %2541 = vst.msk [vmem:[%s4405_s8 + $0x50] sm:$0xff] %vm427_vm1, %v2509_v60  ;;  %v2510_v33 = vmax.f32 %v2478_v24, 0.0 }
 0x1e9   : > { %2539 = vst.msk [vmem:[%s4405_s8 + $0x40] sm:$0xff] %vm427_vm1, %v2507_v50  ;;  %v2508_v27 = vmax.f32 %v2476_v43, 0.0  ;;  %v3231_v1 = vpop.f32.mrb[12].mxu0 }
 0x1ea   : > { %2542 = vst.msk [vmem:[%s4405_s8 + $0x58] sm:$0xff] %vm427_vm1, %v2510_v33  ;;  %v3263_v47 = vadd.f32 %v3231_v1, %v4387_v7  ;;  %v2349_v25 = vpop.f32.mrb[13].mxu0 }
 0x1eb   : > { %2540 = vst.msk [vmem:[%s4405_s8 + $0x48] sm:$0xff] %vm427_vm1, %v2508_v27  ;;  %v3264_v39 = vadd.f32 %v2349_v25, %v4389_v59  ;;  %v3232_v11 = vpop.f32.mrb[14].mxu0 }
 0x1ec   : > { %v2481_v14 = vadd.f32 %v3263_v47, %v4399_v44  ;;  %v3265_v22 = vadd.f32 %v3232_v11, %v4392_v37  ;;  %v2352_v42 = vpop.f32.mrb[15].mxu0 }
 0x1ed   : > { %v2479_v54 = vadd.f32 %v3264_v39, %v4399_v44  ;;  %v3266_v55 = vadd.f32 %v2352_v42, %v4394_v57 }
 0x1ee   : > { %v2513_v18 = vmax.f32 %v2481_v14, 0.0  ;;  %v2482_v7 = vadd.f32 %v3265_v22, %v4399_v44 }
 0x1ef   : > { %v3099_v17 = vpop.f32.mrb[16].mxu1  ;;  %v2511_v0 = vmax.f32 %v2479_v54, 0.0  ;;  %v2480_v59 = vadd.f32 %v3266_v55, %v4399_v44 }
 0x1f0   : > { %v1537_v45 = vpop.f32.mrb[17].mxu1  ;;  %2545 = vst.msk [vmem:[%s4405_s8 + $0x70] sm:$0xff] %vm427_vm1, %v2513_v18  ;;  %v2514_v49 = vmax.f32 %v2482_v7, 0.0 }
 0x1f1   : > { %v3100_v53 = vpop.f32.mrb[18].mxu1  ;;  %2543 = vst.msk [vmem:[%s4405_s8 + $0x60] sm:$0xff] %vm427_vm1, %v2511_v0  ;;  %v2512_v37 = vmax.f32 %v2480_v59, 0.0  ;;  %v3235_v6 = vpop.f32.mrb[16].mxu0 }
 0x1f2   : > { %v1540_v8 = vpop.f32.mrb[19].mxu1  ;;  %2546 = vst.msk [vmem:[%s4405_s8 + $0x78] sm:$0xff] %vm427_vm1, %v2514_v49  ;;  %v3267_v57 = vadd.f32 %v3235_v6, %v3099_v17  ;;  %v2365_v36 = vpop.f32.mrb[17].mxu0 }
 0x1f3   : > { %2544 = vst.msk [vmem:[%s4405_s8 + $0x68] sm:$0xff] %vm427_vm1, %v2512_v37  ;;  %v3268_v9 = vadd.f32 %v2365_v36, %v1537_v45  ;;  %v3236_v34 = vpop.f32.mrb[18].mxu0 }
 0x1f4   : > { %v2485_v40 = vadd.f32 %v3267_v57, %v4399_v44  ;;  %v3269_v16 = vadd.f32 %v3236_v34, %v3100_v53  ;;  %v2368_v51 = vpop.f32.mrb[19].mxu0 }
 0x1f5   : > { %v2483_v48 = vadd.f32 %v3268_v9, %v4399_v44  ;;  %v3270_v56 = vadd.f32 %v2368_v51, %v1540_v8 }
 0x1f6   : > { %v2517_v3 = vmax.f32 %v2485_v40, 0.0  ;;  %v2486_v31 = vadd.f32 %v3269_v16, %v4399_v44 }
 0x1f7   : > { %v3103_v52 = vpop.f32.mrb[20].mxu1  ;;  %v2515_v29 = vmax.f32 %v2483_v48, 0.0  ;;  %v2484_v10 = vadd.f32 %v3270_v56, %v4399_v44 }
 0x1f8   : > { %v1553_v38 = vpop.f32.mrb[21].mxu1  ;;  %2549 = vst.msk [vmem:[%s4405_s8 + $0x90] sm:$0xff] %vm427_vm1, %v2517_v3  ;;  %v2518_v5 = vmax.f32 %v2486_v31, 0.0 }
 0x1f9   : > { %v3104_v58 = vpop.f32.mrb[22].mxu1  ;;  %2547 = vst.msk [vmem:[%s4405_s8 + $0x80] sm:$0xff] %vm427_vm1, %v2515_v29  ;;  %v2516_v35 = vmax.f32 %v2484_v10, 0.0  ;;  %v3239_v19 = vpop.f32.mrb[20].mxu0 }
 0x1fa   : > { %v1556_v20 = vpop.f32.mrb[23].mxu1  ;;  %2550 = vst.msk [vmem:[%s4405_s8 + $0x98] sm:$0xff] %vm427_vm1, %v2518_v5  ;;  %v3271_v63 = vadd.f32 %v3239_v19, %v3103_v52  ;;  %v2381_v28 = vpop.f32.mrb[21].mxu0 }
 0x1fb   : > { %2548 = vst.msk [vmem:[%s4405_s8 + $0x88] sm:$0xff] %vm427_vm1, %v2516_v35  ;;  %v3272_v23 = vadd.f32 %v2381_v28, %v1553_v38  ;;  %v3240_v30 = vpop.f32.mrb[22].mxu0 }
 0x1fc   : > { %v2489_v41 = vadd.f32 %v3271_v63, %v4399_v44  ;;  %v3273_v26 = vadd.f32 %v3240_v30, %v3104_v58  ;;  %v2384_v12 = vpop.f32.mrb[23].mxu0 }
 0x1fd   : > { %v2487_v46 = vadd.f32 %v3272_v23, %v4399_v44  ;;  %v3274_v13 = vadd.f32 %v2384_v12, %v1556_v20 }
 0x1fe   : > { %v2521_v15 = vmax.f32 %v2489_v41, 0.0  ;;  %v2490_v2 = vadd.f32 %v3273_v26, %v4399_v44 }
 0x1ff   : > { %v3107_v61 = vpop.f32.mrb[24].mxu1  ;;  %v2519_v62 = vmax.f32 %v2487_v46, 0.0  ;;  %v2488_v4 = vadd.f32 %v3274_v13, %v4399_v44 }
 0x200   : > { %v1569_v32 = vpop.f32.mrb[25].mxu1  ;;  %2553 = vst.msk [vmem:[%s4405_s8 + $0xb0] sm:$0xff] %vm427_vm1, %v2521_v15  ;;  %v2522_v21 = vmax.f32 %v2490_v2, 0.0 }
 0x201   : > { %v3108_v60 = vpop.f32.mrb[26].mxu1  ;;  %2551 = vst.msk [vmem:[%s4405_s8 + $0xa0] sm:$0xff] %vm427_vm1, %v2519_v62  ;;  %v2520_v24 = vmax.f32 %v2488_v4, 0.0  ;;  %v3243_v50 = vpop.f32.mrb[24].mxu0 }
 0x202   : > { %v1572_v43 = vpop.f32.mrb[27].mxu1  ;;  %2554 = vst.msk [vmem:[%s4405_s8 + $0xb8] sm:$0xff] %vm427_vm1, %v2522_v21  ;;  %v3275_v33 = vadd.f32 %v3243_v50, %v3107_v61  ;;  %v2397_v27 = vpop.f32.mrb[25].mxu0 }
 0x203   : > { %2552 = vst.msk [vmem:[%s4405_s8 + $0xa8] sm:$0xff] %vm427_vm1, %v2520_v24  ;;  %v3276_v1 = vadd.f32 %v2397_v27, %v1569_v32  ;;  %v3244_v47 = vpop.f32.mrb[26].mxu0 }
 0x204   : > { %v2493_v25 = vadd.f32 %v3275_v33, %v4399_v44  ;;  %v3277_v39 = vadd.f32 %v3244_v47, %v3108_v60  ;;  %v2400_v11 = vpop.f32.mrb[27].mxu0 }
 0x205   : > { %v2491_v14 = vadd.f32 %v3276_v1, %v4399_v44  ;;  %v3278_v22 = vadd.f32 %v2400_v11, %v1572_v43 }
 0x206   : > { %v2525_v42 = vmax.f32 %v2493_v25, 0.0  ;;  %v2494_v54 = vadd.f32 %v3277_v39, %v4399_v44 }
 0x207   : > { %v3111_v55 = vpop.f32.mrb[28].mxu1  ;;  %v2523_v18 = vmax.f32 %v2491_v14, 0.0  ;;  %v2492_v7 = vadd.f32 %v3278_v22, %v4399_v44 }
 0x208   : > { %v1585_v17 = vpop.f32.mrb[29].mxu1  ;;  %2557 = vst.msk [vmem:[%s4405_s8 + $0xd0] sm:$0xff] %vm427_vm1, %v2525_v42  ;;  %v2526_v0 = vmax.f32 %v2494_v54, 0.0 }
 0x209   : > { %v3112_v59 = vpop.f32.mrb[30].mxu1  ;;  %2555 = vst.msk [vmem:[%s4405_s8 + $0xc0] sm:$0xff] %vm427_vm1, %v2523_v18  ;;  %v2524_v45 = vmax.f32 %v2492_v7, 0.0  ;;  %v3247_v49 = vpop.f32.mrb[28].mxu0 }
 0x20a   : > { %v1588_v53 = vpop.f32.mrb[31].mxu1  ;;  %2558 = vst.msk [vmem:[%s4405_s8 + $0xd8] sm:$0xff] %vm427_vm1, %v2526_v0  ;;  %v3279_v37 = vadd.f32 %v3247_v49, %v3111_v55  ;;  %v2413_v6 = vpop.f32.mrb[29].mxu0 }
 0x20b   : > { %2556 = vst.msk [vmem:[%s4405_s8 + $0xc8] sm:$0xff] %vm427_vm1, %v2524_v45  ;;  %v3280_v8 = vadd.f32 %v2413_v6, %v1585_v17  ;;  %v3248_v57 = vpop.f32.mrb[30].mxu0 }
 0x20c   : > { %v2497_v36 = vadd.f32 %v3279_v37, %v4399_v44  ;;  %v3281_v9 = vadd.f32 %v3248_v57, %v3112_v59  ;;  %v2416_v34 = vpop.f32.mrb[31].mxu0 }
 0x20d   : > { %v2495_v40 = vadd.f32 %v3280_v8, %v4399_v44  ;;  %v3282_v16 = vadd.f32 %v2416_v34, %v1588_v53 }
 0x20e   : > { %v2529_v51 = vmax.f32 %v2497_v36, 0.0  ;;  %v2498_v48 = vadd.f32 %v3281_v9, %v4399_v44 }
 0x20f   : > { %v2527_v56 = vmax.f32 %v2495_v40, 0.0  ;;  %v2496_v3 = vadd.f32 %v3282_v16, %v4399_v44 }
 0x210   : > { %2561 = vst.msk [vmem:[%s4405_s8 + $0xf0] sm:$0xff] %vm427_vm1, %v2529_v51  ;;  %v2530_v31 = vmax.f32 %v2498_v48, 0.0 }
 0x211   : > { %2559 = vst.msk [vmem:[%s4405_s8 + $0xe0] sm:$0xff] %vm427_vm1, %v2527_v56  ;;  %v2528_v52 = vmax.f32 %v2496_v3, 0.0 }
 0x212   : > { %2562 = vst.msk [vmem:[%s4405_s8 + $0xf8] sm:$0xff] %vm427_vm1, %v2530_v31 }
 0x213   : > { %2560 = vst.msk [vmem:[%s4405_s8 + $0xe8] sm:$0xff] %vm427_vm1, %v2528_v52 }
 0x214 PF: > { %s13_s12 = sadd.s32 1, %s3522_s12  }
 0x215   : > { %p10_p5 = scmp.ge.s32.totalorder %s13_s12, 4  }
 0x217   :  { %12 = sbr.rel (!%p10_p5) target bundleno = 1 (0x1), region = 70 }

// kernel: faster_rcnn_forward.11
= control target key start
LH: loop header
LB: loop body
LE: loop exit
PB: predicated region body
PF: predicated region fallthrough
CT: control target
= control target key end

     0   :  { %vm19_vm0 = vcmask 261120   ;;  %v170_v54 = vmov 0.0   ;;  %s314_s1 = inlined_call_operand.vmem [shape: f32[256,32], index: 1, kind: input, shape index: {}]   ;;  %s315_s0 = inlined_call_operand.vmem [shape: f32[16,256], index: 0, kind: input, shape index: {}]   ;;  %s316_s2 = inlined_call_operand.vmem [shape: f32[1,32], index: 2, kind: input, shape index: {}]   ;;  %s317_s3 = inlined_call_operand.vmem [shape: f32[16,32], index: 3, kind: output, shape index: {}]  }
   0x1   :  { %v46_v0 = vld [vmem:[%s314_s1 + $0x80] sm:$0xff]  ;;  %v47_v1 = vld [vmem:[%s314_s1 + $0x88] sm:$0xff]  ;;  %v48_v5 = vld [vmem:[%s314_s1 + $0x90] sm:$0xff]  ;;  %20 = vst.msk [vmem:[#allocation2] sm:$0xff] %vm19_vm0, %v170_v54 }
   0x2   :  { %v30_v2 = vld [vmem:[%s314_s1] sm:$0xff]  ;;  %v70_v3 = vpack.c.bf16 %v47_v1, %v46_v0  ;;  %v31_v4 = vld [vmem:[%s314_s1 + $0x8] sm:$0xff]  ;;  %v49_v6 = vld [vmem:[%s314_s1 + $0x98] sm:$0xff]  ;;  %21 = vst.msk [vmem:[#allocation2 + $0x8] sm:$0xff] %vm19_vm0, %v170_v54 }
   0x3   :  { %v62_v7 = vpack.c.bf16 %v31_v4, %v30_v2  ;;  %v71_v8 = vpack.c.bf16 %v49_v6, %v48_v5  ;;  %v32_v9 = vld [vmem:[%s314_s1 + $0x10] sm:$0xff]  ;;  %v33_v10 = vld [vmem:[%s314_s1 + $0x18] sm:$0xff]  ;;  %v50_v11 = vld [vmem:[%s314_s1 + $0xa0] sm:$0xff] }
   0x4   :  { %147 = vmatprep.subr.bf16.mxu0 %v70_v3  ;;  %v51_v12 = vld [vmem:[%s314_s1 + $0xa8] sm:$0xff]  ;;  %v63_v13 = vpack.c.bf16 %v33_v10, %v32_v9  ;;  %v34_v15 = vld [vmem:[%s314_s1 + $0x20] sm:$0xff]  ;;  %v52_v17 = vld [vmem:[%s314_s1 + $0xb0] sm:$0xff] }
   0x5   :  { %148 = vmatpush3.bf16.msra.mxu0 %v62_v7  ;;  %v72_v14 = vpack.c.bf16 %v51_v12, %v50_v11  ;;  %v35_v16 = vld [vmem:[%s314_s1 + $0x28] sm:$0xff]  ;;  %v53_v18 = vld [vmem:[%s314_s1 + $0xb8] sm:$0xff]  ;;  %v36_v21 = vld [vmem:[%s314_s1 + $0x30] sm:$0xff] }
   0x6   :  { %149 = vmatprep.subr.bf16.mxu0 %v71_v8  ;;  %v64_v19 = vpack.c.bf16 %v35_v16, %v34_v15  ;;  %v73_v20 = vpack.c.bf16 %v53_v18, %v52_v17  ;;  %v37_v22 = vld [vmem:[%s314_s1 + $0x38] sm:$0xff]  ;;  %v54_v23 = vld [vmem:[%s314_s1 + $0xc0] sm:$0xff]  ;;  %v55_v24 = vld [vmem:[%s314_s1 + $0xc8] sm:$0xff] }
   0x7   :  { %v25_v25 = vld [vmem:[%s315_s0 + $0x8] sm:$0xff]  ;;  %v27_v26 = vld [vmem:[%s315_s0 + $0x18] sm:$0xff]  ;;  %v65_v27 = vpack.c.bf16 %v37_v22, %v36_v21  ;;  %v74_v29 = vpack.c.bf16 %v55_v24, %v54_v23  ;;  %v38_v30 = vld [vmem:[%s314_s1 + $0x40] sm:$0xff] }
   0x8   :  { %v29_v28 = vpack.c.bf16 %v27_v26, %v25_v25  ;;  %v39_v31 = vld [vmem:[%s314_s1 + $0x48] sm:$0xff]  ;;  %v56_v32 = vld [vmem:[%s314_s1 + $0xd0] sm:$0xff]  ;;  %v57_v33 = vld [vmem:[%s314_s1 + $0xd8] sm:$0xff] }
   0x9   :  { %150 = vmatpush3.bf16.msra.mxu0 %v63_v13  ;;  %v66_v34 = vpack.c.bf16 %v39_v31, %v38_v30  ;;  %v75_v35 = vpack.c.bf16 %v57_v33, %v56_v32  ;;  %v40_v36 = vld [vmem:[%s314_s1 + $0x50] sm:$0xff]  ;;  %v41_v37 = vld [vmem:[%s314_s1 + $0x58] sm:$0xff]  ;;  %v58_v38 = vld [vmem:[%s314_s1 + $0xe0] sm:$0xff] }
   0xa   :  { %151 = vmatprep.subr.bf16.mxu0 %v72_v14  ;;  %110 = vmatprep.mubr.bf16.mxu0 %v29_v28  ;;  %v59_v39 = vld [vmem:[%s314_s1 + $0xe8] sm:$0xff]  ;;  %v67_v40 = vpack.c.bf16 %v41_v37, %v40_v36  ;;  %v42_v42 = vld [vmem:[%s314_s1 + $0x60] sm:$0xff]  ;;  %v60_v44 = vld [vmem:[%s314_s1 + $0xf0] sm:$0xff] }
   0xb   :  { %v76_v41 = vpack.c.bf16 %v59_v39, %v58_v38  ;;  %v43_v43 = vld [vmem:[%s314_s1 + $0x68] sm:$0xff]  ;;  %v61_v45 = vld [vmem:[%s314_s1 + $0xf8] sm:$0xff]  ;;  %v44_v48 = vld [vmem:[%s314_s1 + $0x70] sm:$0xff] }
   0xc   :  { %v68_v46 = vpack.c.bf16 %v43_v43, %v42_v42  ;;  %v77_v47 = vpack.c.bf16 %v61_v45, %v60_v44  ;;  %v45_v49 = vld [vmem:[%s314_s1 + $0x78] sm:$0xff]  ;;  %v24_v51 = vld [vmem:[%s315_s0] sm:$0xff]  ;;  %v26_v52 = vld [vmem:[%s315_s0 + $0x10] sm:$0xff] }
   0xd   :  { %152 = vmatpush3.bf16.msra.mxu0 %v64_v19  ;;  %v69_v50 = vpack.c.bf16 %v45_v49, %v44_v48  ;;  %v28_v53 = vpack.c.bf16 %v26_v52, %v24_v51  ;;  %v22_v56 = vld [vmem:[#allocation2] sm:$0xff]  ;;  %v23_v60 = vld [vmem:[#allocation2 + $0x8] sm:$0xff] }
   0xe   :  { %153 = vmatprep.subr.bf16.mxu0 %v73_v20  ;;  %v146_v1 = vld [vmem:[%s316_s2] ss:$0 sm:$0xff] }
  0x11   :  { %154 = vmatpush3.bf16.msra.mxu0 %v65_v27 }
  0x12   :  { %155 = vmatprep.subr.bf16.mxu0 %v74_v29 }
  0x15   :  { %156 = vmatpush3.bf16.msra.mxu0 %v66_v34 }
  0x16   :  { %157 = vmatprep.subr.bf16.mxu0 %v75_v35 }
  0x19   :  { %158 = vmatpush3.bf16.msra.mxu0 %v67_v40 }
  0x1a   :  { %159 = vmatprep.subr.bf16.mxu0 %v76_v41 }
  0x1d   :  { %160 = vmatpush3.bf16.msra.mxu0 %v68_v46 }
  0x1e   :  { %161 = vmatprep.subr.bf16.mxu0 %v77_v47 }
  0x21   :  { %162 = vmatpush3.bf16.msra.mxu0 %v69_v50 }
  0x24   :  { %111 = vmatmul.mubr.bf16.vlgmr.msra.gmra.mrb[0].mxu0 %v28_v53 }
  0xf7   :  { %v163_v55 = vpop.f32.mrb[0].mxu0 }
  0xf8   :  { %v164_v57 = vpop.f32.mrb[1].mxu0 }
  0xf9   :  { %v165_v58 = vadd.f32 %v164_v57, %v163_v55  ;;  %v166_v59 = vpop.f32.mrb[2].mxu0 }
  0xfa   :  { %v167_v61 = vpop.f32.mrb[3].mxu0 }
  0xfb   :  { %v119_v62 = vadd.f32 %v165_v58, %v22_v56  ;;  %v168_v63 = vadd.f32 %v167_v61, %v166_v59 }
  0xfd   :  { %122 = vst.msk [vmem:[#allocation2] sm:$0xff] %vm19_vm0, %v119_v62  ;;  %v120_v0 = vadd.f32 %v168_v63, %v23_v60 }
  0xff   :  { %123 = vst.msk [vmem:[#allocation2 + $0x8] sm:$0xff] %vm19_vm0, %v120_v0 }
 0x104   :  { %v127_v2 = vld [vmem:[#allocation2] sm:$0xff] }
 0x105   :  { %v136_v3 = vadd.f32 %v146_v1, %v127_v2 }
 0x106   :  { %v128_v4 = vld [vmem:[#allocation2 + $0x8] sm:$0xff] }
 0x107   :  { %v138_v5 = vmax.f32 %v136_v3, 0.0  ;;  %v137_v6 = vadd.f32 %v146_v1, %v128_v4 }
 0x109   :  { %140 = vst.msk [vmem:[%s317_s3] sm:$0xff] %vm19_vm0, %v138_v5  ;;  %v139_v7 = vmax.f32 %v137_v6, 0.0 }
 0x10b   :  { %141 = vst.msk [vmem:[%s317_s3 + $0x8] sm:$0xff] %vm19_vm0, %v139_v7 }

// kernel: faster_rcnn_forward.12
= control target key start
LH: loop header
LB: loop body
LE: loop exit
PB: predicated region body
PF: predicated region fallthrough
CT: control target
= control target key end

     0   :  { %vm19_vm0 = vcmask 261120   ;;  %v119_v0 = vmov 0.0   ;;  %vm120_vm1 = vmmov 0   ;;  %s175_s1 = inlined_call_operand.vmem [shape: f32[32,32], index: 1, kind: input, shape index: {}]   ;;  %s176_s0 = inlined_call_operand.vmem [shape: f32[16,32], index: 0, kind: input, shape index: {}]   ;;  %s177_s2 = inlined_call_operand.vmem [shape: f32[1,32], index: 2, kind: input, shape index: {}]   ;;  %s178_s3 = inlined_call_operand.vmem [shape: f32[16,32], index: 3, kind: output, shape index: {}]  }
   0x1   :  { %109 = vmatprep.subr.bf16.mxu0 %v119_v0  ;;  %v27_v1 = vld [vmem:[%s175_s1] sm:$0xff]  ;;  %v28_v2 = vld [vmem:[%s175_s1 + $0x8] sm:$0xff]  ;;  %v29_v3 = vld [vmem:[%s175_s1 + $0x10] sm:$0xff]  ;;  %113 = vmatprep.mubr.msk.bf16.mxu0 %vm120_vm1, %v119_v0  ;;  %20 = vst.msk [vmem:[#allocation2] sm:$0xff] %vm19_vm0, %v119_v0 }
   0x2   :  { %21 = vst.msk [vmem:[#allocation2 + $0x8] sm:$0xff] %vm19_vm0, %v119_v0  ;;  %v31_v4 = vpack.c.bf16 %v28_v2, %v27_v1  ;;  %v30_v5 = vld [vmem:[%s175_s1 + $0x18] sm:$0xff]  ;;  %v24_v7 = vld [vmem:[%s176_s0] sm:$0xff]  ;;  %v25_v8 = vld [vmem:[%s176_s0 + $0x8] sm:$0xff] }
   0x3   :  { %v32_v6 = vpack.c.bf16 %v30_v5, %v29_v3  ;;  %v26_v9 = vpack.c.bf16 %v25_v8, %v24_v7  ;;  %v105_v18 = vld [vmem:[%s177_s2] ss:$0 sm:$0xff] }
   0x4   :  { %110 = vmatpush3.bf16.msra.mxu0 %v31_v4 }
   0x5   :  { %111 = vmatprep.subr.bf16.mxu0 %v119_v0 }
   0x8   :  { %112 = vmatpush3.bf16.msra.mxu0 %v32_v6  ;;  %v22_v10 = vld [vmem:[#allocation2] sm:$0xff] }
   0x9   :  { %v23_v12 = vld [vmem:[#allocation2 + $0x8] sm:$0xff] }
   0xb   :  { %114 = vmatmul.mubr.msk.bf16.vlgmr.msra.gmra.mrb[0].mxu0 %vm19_vm0, %v26_v9 }
  0xde   :  { %v71_v11 = vpop.f32.mrb[0].mxu0 }
  0xdf   :  { %v78_v13 = vadd.f32 %v71_v11, %v22_v10  ;;  %v115_v14 = vpop.f32.mrb[1].mxu0 }
  0xe0   :  { %v74_v15 = vpop.f32.mrb[2].mxu0 }
  0xe1   :  { %80 = vst.msk [vmem:[#allocation2] sm:$0xff] %vm19_vm0, %v78_v13  ;;  %v79_v16 = vadd.f32 %v74_v15, %v23_v12  ;;  %v116_v17 = vpop.f32.mrb[3].mxu0 }
  0xe3   :  { %81 = vst.msk [vmem:[#allocation2 + $0x8] sm:$0xff] %vm19_vm0, %v79_v16 }
  0xe8   :  { %v85_v19 = vld [vmem:[#allocation2] sm:$0xff] }
  0xe9   :  { %v94_v20 = vadd.f32 %v105_v18, %v85_v19 }
  0xea   :  { %v86_v21 = vld [vmem:[#allocation2 + $0x8] sm:$0xff] }
  0xeb   :  { %v96_v22 = vmax.f32 %v94_v20, 0.0  ;;  %v95_v23 = vadd.f32 %v105_v18, %v86_v21 }
  0xed   :  { %98 = vst.msk [vmem:[%s178_s3] sm:$0xff] %vm19_vm0, %v96_v22  ;;  %v97_v24 = vmax.f32 %v95_v23, 0.0 }
  0xef   :  { %99 = vst.msk [vmem:[%s178_s3 + $0x8] sm:$0xff] %vm19_vm0, %v97_v24 }

// kernel: faster_rcnn_forward.13
= control target key start
LH: loop header
LB: loop body
LE: loop exit
PB: predicated region body
PF: predicated region fallthrough
CT: control target
= control target key end

     0   :  { %vm19_vm0 = vcmask 203776   ;;  %v118_v0 = vmov 0.0   ;;  %vm119_vm1 = vmmov 0   ;;  %vm33_vm2 = vcmask 261120   ;;  %s173_s1 = inlined_call_operand.vmem [shape: f32[32,25], index: 1, kind: input, shape index: {}]   ;;  %s174_s0 = inlined_call_operand.vmem [shape: f32[16,32], index: 0, kind: input, shape index: {}]   ;;  %s175_s2 = inlined_call_operand.vmem [shape: f32[1,25], index: 2, kind: input, shape index: {}]   ;;  %s176_s3 = inlined_call_operand.vmem [shape: f32[16,25], index: 3, kind: output, shape index: {}]  }
   0x1   :  { %108 = vmatprep.subr.bf16.mxu0 %v118_v0  ;;  %v27_v1 = vld [vmem:[%s173_s1] sm:$0xff]  ;;  %v28_v2 = vld [vmem:[%s173_s1 + $0x8] sm:$0xff]  ;;  %v29_v3 = vld [vmem:[%s173_s1 + $0x10] sm:$0xff]  ;;  %112 = vmatprep.mubr.msk.bf16.mxu0 %vm119_vm1, %v118_v0  ;;  %20 = vst.msk [vmem:[#allocation2] sm:$0xff] %vm19_vm0, %v118_v0 }
   0x2   :  { %21 = vst.msk [vmem:[#allocation2 + $0x8] sm:$0xff] %vm19_vm0, %v118_v0  ;;  %v31_v4 = vpack.c.bf16 %v28_v2, %v27_v1  ;;  %v30_v5 = vld [vmem:[%s173_s1 + $0x18] sm:$0xff]  ;;  %v24_v7 = vld [vmem:[%s174_s0] sm:$0xff]  ;;  %v25_v8 = vld [vmem:[%s174_s0 + $0x8] sm:$0xff] }
   0x3   :  { %v32_v6 = vpack.c.bf16 %v30_v5, %v29_v3  ;;  %v26_v9 = vpack.c.bf16 %v25_v8, %v24_v7  ;;  %v104_v18 = vld [vmem:[%s175_s2] ss:$0 sm:$0xff] }
   0x4   :  { %109 = vmatpush3.bf16.msra.mxu0 %v31_v4 }
   0x5   :  { %110 = vmatprep.subr.bf16.mxu0 %v118_v0 }
   0x8   :  { %111 = vmatpush3.bf16.msra.mxu0 %v32_v6  ;;  %v22_v10 = vld [vmem:[#allocation2] sm:$0xff] }
   0x9   :  { %v23_v12 = vld [vmem:[#allocation2 + $0x8] sm:$0xff] }
   0xb   :  { %113 = vmatmul.mubr.msk.bf16.vlgmr.msra.gmra.mrb[0].mxu0 %vm33_vm2, %v26_v9 }
  0xde   :  { %v71_v11 = vpop.f32.mrb[0].mxu0 }
  0xdf   :  { %v78_v13 = vadd.f32 %v71_v11, %v22_v10  ;;  %v114_v14 = vpop.f32.mrb[1].mxu0 }
  0xe0   :  { %v74_v15 = vpop.f32.mrb[2].mxu0 }
  0xe1   :  { %81 = vst.msk [vmem:[#allocation2] sm:$0xff] %vm19_vm0, %v78_v13  ;;  %v79_v16 = vadd.f32 %v74_v15, %v23_v12  ;;  %v115_v17 = vpop.f32.mrb[3].mxu0 }
  0xe3   :  { %82 = vst.msk [vmem:[#allocation2 + $0x8] sm:$0xff] %vm19_vm0, %v79_v16 }
  0xe8   :  { %v86_v19 = vld [vmem:[#allocation2] sm:$0xff] }
  0xe9   :  { %v95_v20 = vadd.f32 %v104_v18, %v86_v19 }
  0xea   :  { %v87_v21 = vld [vmem:[#allocation2 + $0x8] sm:$0xff] }
  0xeb   :  { %97 = vst.msk [vmem:[%s176_s3] sm:$0xff] %vm19_vm0, %v95_v20  ;;  %v96_v22 = vadd.f32 %v104_v18, %v87_v21 }
  0xed   :  { %98 = vst.msk [vmem:[%s176_s3 + $0x8] sm:$0xff] %vm19_vm0, %v96_v22 }

</bundles_post_ra>
